<compile_context>
chip_gen: v7x
topology: tpu7x:2x2x1
jax: 0.10.0
libtpu: 0.0.40
codegen_flags: <defaults>
</compile_context>

<pallas_src>
import jax
import jax.numpy as jnp
from jax.experimental import pallas as pl
from jax.experimental.pallas import tpu as pltpu

LEAKY_SLOPE = 0.2
BN_EPS = 1e-5
N_UP = 4           # number of ConvTranspose1d(k=4, s=2, p=1) stages (fixed by module)
UP_K = 4           # transposed-conv kernel size
PAD_L = 128        # left halo: lane-aligned activation origin, >= any conv pad
OUT_K = 7          # conv_out kernel size


def _leaky(v):
    return jnp.where(v >= 0.0, v, LEAKY_SLOPE * v)


def _round8(n):
    return ((n + 7) // 8) * 8


# ----------------------------------------------------------------------------
# Fused decoder kernel (whole network, one grid step per batch element).
# Activation layout inside the kernel: (channels on sublanes, time on lanes).
# ----------------------------------------------------------------------------
def _build_decoder_kernel(*, dils, C_buf, Cout, Cout_pad, T0):
    def kernel(x_ref, w_in_ref, ss_in_ref, w_res_ref, ss_res_ref,
               w_up_ref, ss_up_ref, se_ref, so_ref, w_out_ref, ss_out_ref,
               o_ref, slab):
        # Zero the whole slab once per grid step.  Load-bearing: the scratch
        # persists across grid steps and every layer relies on the halo
        # columns (and all never-yet-written columns) reading as zero.
        slab[...] = jnp.zeros(slab.shape, slab.dtype)

        def conv_same(T, K, dil, pad, w_cat, scale, shift,
                      residual=None):
            """Stride-1 'same' dilated conv + folded BN (+res) + LeakyReLU.
            Taps are static Ref slices of the zero-padded slab; the K taps are
            stacked along sublanes (a free re-tiling) so the conv is ONE
            matmul against the prepacked (C_buf, K*C_buf) weight."""
            xs = [slab[:, PAD_L - pad + k * dil: PAD_L - pad + k * dil + T]
                  for k in range(K)]
            xcat = jnp.concatenate(xs, axis=0) if K > 1 else xs[0]
            y = jnp.dot(w_cat, xcat, preferred_element_type=jnp.float32)
            y = y * scale + shift
            if residual is not None:
                y = y + residual
            y = _leaky(y)
            slab[:, PAD_L:PAD_L + T] = y        # lane-aligned store
            return y

        # ---- write input (C_buf, T0) at the aligned slab origin ------------
        T = T0
        slab[:, PAD_L:PAD_L + T] = x_ref[0].astype(jnp.float32)

        # ---- conv_in: Conv1d(k=3, p=1) + BN + LeakyReLU ---------------------
        y = conv_same(T, 3, 1, 1, w_in_ref[...], ss_in_ref[0], ss_in_ref[1])

        # ---- residual blocks (dilation 2**i, padding = dilation) -----------
        for i, d in enumerate(dils):
            res = y
            y = conv_same(T, 3, d, d, w_res_ref[2 * i],
                          ss_res_ref[4 * i], ss_res_ref[4 * i + 1])
            y = conv_same(T, 3, d, d, w_res_ref[2 * i + 1],
                          ss_res_ref[4 * i + 2], ss_res_ref[4 * i + 3],
                          residual=res)

        # ---- 4x ConvTranspose1d(k=4, s=2, p=1) + BN + LeakyReLU -------------
        # Polyphase form: y[2t] = W1 x[t] + W3 x[t-1]; y[2t+1] = W2 x[t] + W0 x[t+1].
        # Each phase is ONE matmul on [x(t); x(shifted)] (sublane-stacked); the
        # even/odd interleave uses prepacked constant 0/1 selector matrices.
        for i in range(N_UP):
            x0 = slab[:, PAD_L:PAD_L + T]
            xm1 = slab[:, PAD_L - 1:PAD_L - 1 + T]        # zero at t=0
            xp1 = slab[:, PAD_L + 1:PAD_L + 1 + T]        # zero at t=T-1
            ye = jnp.dot(w_up_ref[2 * i],
                         jnp.concatenate([x0, xm1], axis=0),
                         preferred_element_type=jnp.float32)
            yo = jnp.dot(w_up_ref[2 * i + 1],
                         jnp.concatenate([x0, xp1], axis=0),
                         preferred_element_type=jnp.float32)
            y = (jnp.dot(ye, se_ref[0:T, 0:2 * T],
                         preferred_element_type=jnp.float32)
                 + jnp.dot(yo, so_ref[0:T, 0:2 * T],
                           preferred_element_type=jnp.float32))
            T = 2 * T
            y = _leaky(y * ss_up_ref[2 * i] + ss_up_ref[2 * i + 1])
            slab[:, PAD_L:PAD_L + T] = y

        # ---- conv_out: Conv1d(k=7, p=3) + bias + tanh -----------------------
        # Per-tap accumulation (keeps vreg pressure low at T = T_out).
        acc = jnp.zeros((Cout_pad, T), jnp.float32)
        for k in range(OUT_K):
            lo = PAD_L - 3 + k
            acc = acc + jnp.dot(w_out_ref[k], slab[:, lo:lo + T],
                                preferred_element_type=jnp.float32)
        y = jnp.tanh(acc * ss_out_ref[0] + ss_out_ref[1])
        o_ref[0] = y[0:Cout, :].astype(o_ref.dtype)       # lane-dense NCW store

    return kernel


# ----------------------------------------------------------------------------
# One-time parameter prepacking (BN folding, transposed/per-tap weight layout).
# ----------------------------------------------------------------------------
def fold_bn(bias, bn):
    gamma, beta, mean, var = bn
    s = gamma / jnp.sqrt(var + BN_EPS)
    return s, beta + (bias - mean) * s


def _pad2(m, rows, cols):
    r, c = m.shape
    return jnp.pad(m, ((0, rows - r), (0, cols - c)))


def _ss(scale, shift, rows):
    s = jnp.pad(scale, (0, rows - scale.shape[0]))[:, None]
    t = jnp.pad(shift, (0, rows - shift.shape[0]))[:, None]
    return jnp.stack([s, t]).astype(jnp.float32)              # (2, rows, 1)


def _conv_cat(w, c_buf):
    # Conv1d weight (Cout, Cin, K) -> (c_buf, K*c_buf): column block k holds
    # the tap-k (Cout, Cin) matrix, zero-padded to (c_buf, c_buf).
    K = w.shape[2]
    taps = [_pad2(w[:, :, k], c_buf, c_buf) for k in range(K)]
    return jnp.concatenate(taps, axis=1).astype(jnp.float32)


def _conv_taps(w, rows, cols):
    # Conv1d weight (Cout, Cin, K) -> (K, rows, cols) per-tap matrices.
    K = w.shape[2]
    return jnp.stack([_pad2(w[:, :, k], rows, cols)
                      for k in range(K)]).astype(jnp.float32)


def _up_pair(w, c_buf):
    # ConvTranspose1d weight (Cin, Cout, 4): tap-k matrix (Cout, Cin) = W[:,:,k].T
    tm = [_pad2(w[:, :, k].T, c_buf, c_buf) for k in range(UP_K)]
    we = jnp.concatenate([tm[1], tm[3]], axis=1)   # even phase: [x(t); x(t-1)]
    wo = jnp.concatenate([tm[2], tm[0]], axis=1)   # odd phase:  [x(t); x(t+1)]
    return jnp.stack([we, wo]).astype(jnp.float32)  # (2, c_buf, 2*c_buf)


def prepack_params(P):
    """Call ONCE outside the forward pass."""
    C, Cin, _ = P["conv_in"]["w"].shape
    Cout = P["conv_out"]["w"].shape[0]
    C_buf = _round8(max(Cin, C))
    Cout_pad = _round8(Cout)

    s, t = fold_bn(P["conv_in"]["b"], P["conv_in"]["bn"])
    w_in = _conv_cat(P["conv_in"]["w"], C_buf)                # (C_buf, 3*C_buf)
    ss_in = _ss(s, t, C_buf)                                  # (2, C_buf, 1)

    w_res, ss_res, dils = [], [], []
    for rb in P["res"]:
        dils.append(int(rb["d"]))
        for wk, bk, bnk in ((rb["w1"], rb["b1"], rb["bn1"]),
                            (rb["w2"], rb["b2"], rb["bn2"])):
            w_res.append(_conv_cat(wk, C_buf))
            s, t = fold_bn(bk, bnk)
            ss_res.append(_ss(s, t, C_buf))
    w_res = jnp.stack(w_res)                                  # (2*n, C_buf, 3*C_buf)
    ss_res = jnp.concatenate(ss_res, axis=0)                  # (4*n, C_buf, 1)

    w_up, ss_up = [], []
    for up in P["ups"]:
        w_up.append(_up_pair(up["w"], C_buf))
        s, t = fold_bn(up["b"], up["bn"])
        ss_up.append(_ss(s, t, C_buf))
    w_up = jnp.concatenate(w_up, axis=0)                      # (2*N_UP, C_buf, 2*C_buf)
    ss_up = jnp.concatenate(ss_up, axis=0)                    # (2*N_UP, C_buf, 1)

    w_out = _conv_taps(P["conv_out"]["w"], Cout_pad, C_buf)   # (7, Cout_pad, C_buf)
    ss_out = _ss(jnp.ones((Cout,), jnp.float32),
                 P["conv_out"]["b"].astype(jnp.float32), Cout_pad)

    cfg = dict(Cin=Cin, C=C, Cout=Cout, C_buf=C_buf, Cout_pad=Cout_pad,
               dils=tuple(dils))
    return dict(cfg=cfg, w_in=w_in, ss_in=ss_in, w_res=w_res, ss_res=ss_res,
                w_up=w_up, ss_up=ss_up, w_out=w_out, ss_out=ss_out)


def _const_index_map(nd):
    return lambda b: (0,) * nd


# ----------------------------------------------------------------------------
# Full Decoder forward (single fused pallas_call). NCW in, NCW out.
# ----------------------------------------------------------------------------
def decoder_pallas(x_nct, pk):
    cfg = pk["cfg"]
    B, Cin, T0 = x_nct.shape
    assert Cin == cfg["Cin"]
    C_buf, Cout, Cout_pad = cfg["C_buf"], cfg["Cout"], cfg["Cout_pad"]
    dils = cfg["dils"]
    assert max(dils + (3, 1)) <= PAD_L
    T_out = T0 * (2 ** N_UP)
    t_up = T0 * (2 ** (N_UP - 1))       # largest upsample-stage *input* length

    # NCW already matches the kernel's (channels, time) layout; just pad the
    # channel (sublane) dim to the buffer width.
    x = x_nct.astype(jnp.float32)
    if C_buf > Cin:
        x = jnp.pad(x, ((0, 0), (0, C_buf - Cin), (0, 0)))

    # Constant 0/1 even/odd interleave selectors (built once per static shape,
    # constant-folded under jit; sliced per upsample stage inside the kernel).
    r = jnp.arange(t_up, dtype=jnp.int32)[:, None]
    c = jnp.arange(2 * t_up, dtype=jnp.int32)[None, :]
    se = (c == 2 * r).astype(jnp.float32)                     # (t_up, 2*t_up)
    so = (c == 2 * r + 1).astype(jnp.float32)

    kernel = _build_decoder_kernel(dils=dils, C_buf=C_buf, Cout=Cout,
                                   Cout_pad=Cout_pad, T0=T0)
    pad_r = max(dils + (3, 1))
    n_cols = PAD_L + T_out + pad_r

    consts = (pk["w_in"], pk["ss_in"], pk["w_res"], pk["ss_res"], pk["w_up"],
              pk["ss_up"], se, so, pk["w_out"], pk["ss_out"])

    # Advisory cost estimate (the kernel is tiny & latency bound).
    flops = 0
    T = T0
    flops += 2 * C_buf * (3 * C_buf) * T                      # conv_in
    flops += len(dils) * 2 * 2 * C_buf * (3 * C_buf) * T      # residual blocks
    for _ in range(N_UP):
        flops += 2 * 2 * C_buf * (2 * C_buf) * T              # polyphase pair
        flops += 2 * 2 * C_buf * T * (2 * T)                  # interleave dots
        T *= 2
    flops += 2 * Cout_pad * (OUT_K * C_buf) * T               # conv_out
    flops *= B
    bytes_accessed = 4 * (x.size + B * Cout * T_out + sum(a.size for a in consts))

    out = pl.pallas_call(
        kernel,
        out_shape=jax.ShapeDtypeStruct((B, Cout, T_out), jnp.float32),
        grid=(B,),
        in_specs=[pl.BlockSpec((1, C_buf, T0), lambda b: (b, 0, 0))]
                 + [pl.BlockSpec(a.shape, _const_index_map(a.ndim)) for a in consts],
        out_specs=pl.BlockSpec((1, Cout, T_out), lambda b: (b, 0, 0)),
        scratch_shapes=[pltpu.VMEM((C_buf, n_cols), jnp.float32)],
        compiler_params=pltpu.CompilerParams(
            dimension_semantics=("parallel",)),
        cost_estimate=pl.CostEstimate(flops=int(flops),
                                      transcendentals=int(B * Cout * T_out),
                                      bytes_accessed=int(bytes_accessed)),
    )(x, *consts)
    return out                                                # (B, Cout, T_out) NCW


# ----------------------------------------------------------------------------
# Pure-JAX reference (lax.conv_general_dilated, NCW) for verification.
# ----------------------------------------------------------------------------
def _ref_bn(x, bn):
    gamma, beta, mean, var = bn
    inv = gamma / jnp.sqrt(var + BN_EPS)
    return (x - mean[None, :, None]) * inv[None, :, None] + beta[None, :, None]


def _ref_conv(x, w, b, pad, dilation=1, lhs_dilation=1):
    y = jax.lax.conv_general_dilated(
        x, w, window_strides=(1,), padding=[(pad, pad)],
        lhs_dilation=(lhs_dilation,), rhs_dilation=(dilation,),
        dimension_numbers=("NCH", "OIH", "NCH"),
        precision=jax.lax.Precision.HIGHEST)
    return y + b[None, :, None]


def decoder_ref(x, P):
    y = _ref_conv(x, P["conv_in"]["w"], P["conv_in"]["b"], pad=1)
    y = _leaky(_ref_bn(y, P["conv_in"]["bn"]))
    for rb in P["res"]:
        r = y
        d = rb["d"]
        z = _ref_conv(y, rb["w1"], rb["b1"], pad=d, dilation=d)
        z = _leaky(_ref_bn(z, rb["bn1"]))
        z = _ref_conv(z, rb["w2"], rb["b2"], pad=d, dilation=d)
        z = _ref_bn(z, rb["bn2"])
        y = _leaky(z + r)
    for up in P["ups"]:
        w_eq = jnp.transpose(jnp.flip(up["w"], axis=2), (1, 0, 2))  # (Cout,Cin,K)
        y = _ref_conv(y, w_eq, up["b"], pad=2, lhs_dilation=2)
        y = _leaky(_ref_bn(y, up["bn"]))
    y = _ref_conv(y, P["conv_out"]["w"], P["conv_out"]["b"], pad=3)
    return jnp.tanh(y)


# ----------------------------------------------------------------------------
# Deterministic parameter initialization (shapes from Decoder.__init__).
# BatchNorm uses eval-mode running statistics (synthetic, nontrivial values).
# ----------------------------------------------------------------------------
def init_params(key, out_channels, channels, latent_dim, n_res):
    ks = iter(jax.random.split(key, 128))

    def nrm(shape, s):
        return s * jax.random.normal(next(ks), shape, jnp.float32)

    def bn(c):
        return (1.0 + 0.1 * jax.random.normal(next(ks), (c,), jnp.float32),
                0.1 * jax.random.normal(next(ks), (c,), jnp.float32),
                0.1 * jax.random.normal(next(ks), (c,), jnp.float32),
                1.0 + 0.1 * jax.random.uniform(next(ks), (c,), jnp.float32))

    P = {}
    P["conv_in"] = {"w": nrm((channels, latent_dim, 3), 0.1),
                    "b": nrm((channels,), 0.05), "bn": bn(channels)}
    P["res"] = []
    for i in range(n_res):
        P["res"].append({
            "d": 2 ** i,
            "w1": nrm((channels, channels, 3), 0.1), "b1": nrm((channels,), 0.05),
            "bn1": bn(channels),
            "w2": nrm((channels, channels, 3), 0.1), "b2": nrm((channels,), 0.05),
            "bn2": bn(channels),
        })
    P["ups"] = []
    for _ in range(4):
        P["ups"].append({"w": nrm((channels, channels, 4), 0.1),  # (Cin, Cout, K)
                         "b": nrm((channels,), 0.05), "bn": bn(channels)})
    P["conv_out"] = {"w": nrm((out_channels, channels, 7), 0.1),
                     "b": nrm((out_channels,), 0.05)}
    return P


if __name__ == "__main__":
    B, out_channels, channels, latent_dim, T, n_res = 2, 1, 32, 16, 16, 4

    key = jax.random.PRNGKey(0)
    kp, kx = jax.random.split(key)
    P = init_params(kp, out_channels, channels, latent_dim, n_res)
    x = jax.random.normal(kx, (B, latent_dim, T), jnp.float32)  # PyTorch (B, C, T)

    packed = prepack_params(P)          # one-time weight repack / BN fold
    out = decoder_pallas(x, packed)
    out = jax.block_until_ready(out)

    assert out.shape == (B, out_channels, T * 16), out.shape

    ref = decoder_ref(x, P)
    err = float(jnp.max(jnp.abs(out - ref)))
    assert err < 2e-3, f"max abs error {err}"

    print("KERNEL_OK")
</pallas_src>

<mosaic_0001>
module attributes {stable_mosaic.version = 11 : i64} {
  func.func @kernel(%arg0: i32, %arg1: memref<1x32x16xf32, #tpu.memory_space<vmem>>, %arg2: memref<32x96xf32, #tpu.memory_space<vmem>>, %arg3: memref<2x32x1xf32, #tpu.memory_space<vmem>>, %arg4: memref<8x32x96xf32, #tpu.memory_space<vmem>>, %arg5: memref<16x32x1xf32, #tpu.memory_space<vmem>>, %arg6: memref<8x32x64xf32, #tpu.memory_space<vmem>>, %arg7: memref<8x32x1xf32, #tpu.memory_space<vmem>>, %arg8: memref<128x256xf32, #tpu.memory_space<vmem>>, %arg9: memref<128x256xf32, #tpu.memory_space<vmem>>, %arg10: memref<7x8x32xf32, #tpu.memory_space<vmem>>, %arg11: memref<2x8x1xf32, #tpu.memory_space<vmem>>, %arg12: memref<1x1x256xf32, #tpu.memory_space<vmem>>, %arg13: memref<32x392xf32, #tpu.memory_space<vmem>>) attributes {dimension_semantics = [#tpu.dimension_semantics<parallel>], iteration_bounds = array<i64: 2>, scalar_prefetch = 0 : i64, scratch_operands = 1 : i64, tpu.core_type = #tpu.core_type<tc>, window_params = [{transform_indices = @transform_0, window_bounds = array<i64: 1, 32, 16>}, {pipeline_mode = #tpu.pipeline_mode<synchronous>, transform_indices = @transform_1, window_bounds = array<i64: 32, 96>}, {pipeline_mode = #tpu.pipeline_mode<synchronous>, transform_indices = @transform_2, window_bounds = array<i64: 2, 32, 1>}, {pipeline_mode = #tpu.pipeline_mode<synchronous>, transform_indices = @transform_3, window_bounds = array<i64: 8, 32, 96>}, {pipeline_mode = #tpu.pipeline_mode<synchronous>, transform_indices = @transform_4, window_bounds = array<i64: 16, 32, 1>}, {pipeline_mode = #tpu.pipeline_mode<synchronous>, transform_indices = @transform_5, window_bounds = array<i64: 8, 32, 64>}, {pipeline_mode = #tpu.pipeline_mode<synchronous>, transform_indices = @transform_6, window_bounds = array<i64: 8, 32, 1>}, {pipeline_mode = #tpu.pipeline_mode<synchronous>, transform_indices = @transform_7, window_bounds = array<i64: 128, 256>}, {pipeline_mode = #tpu.pipeline_mode<synchronous>, transform_indices = @transform_8, window_bounds = array<i64: 128, 256>}, {pipeline_mode = #tpu.pipeline_mode<synchronous>, transform_indices = @transform_9, window_bounds = array<i64: 7, 8, 32>}, {pipeline_mode = #tpu.pipeline_mode<synchronous>, transform_indices = @transform_10, window_bounds = array<i64: 2, 8, 1>}, {transform_indices = @transform_11, window_bounds = array<i64: 1, 1, 256>}]} {
    %cst = arith.constant 0.000000e+00 : f32
    %0 = vector.broadcast %cst : f32 to vector<32x392xf32>
    %c0 = arith.constant 0 : index
    %c0_0 = arith.constant 0 : index
    %1 = vector.load %arg13[%c0, %c0_0] : memref<32x392xf32, #tpu.memory_space<vmem>>, vector<32x392xf32>
    tpu.vector_store %arg13[%c0, %c0_0], %0 {strides = array<i32>} : memref<32x392xf32, #tpu.memory_space<vmem>>, vector<32x392xf32>,
    %c0_1 = arith.constant 0 : index
    %c0_2 = arith.constant 0 : index
    %c0_3 = arith.constant 0 : index
    %2 = vector.load %arg1[%c0_1, %c0_2, %c0_3] : memref<1x32x16xf32, #tpu.memory_space<vmem>>, vector<1x32x16xf32>
    %3 = vector.shape_cast %2 : vector<1x32x16xf32> to vector<32x16xf32>
    %c0_4 = arith.constant 0 : index
    %c128 = arith.constant 128 : index
    %4 = vector.load %arg13[%c0_4, %c128] : memref<32x392xf32, #tpu.memory_space<vmem>>, vector<32x16xf32>
    tpu.vector_store %arg13[%c0_4, %c128], %3 {strides = array<i32>} : memref<32x392xf32, #tpu.memory_space<vmem>>, vector<32x16xf32>,
    %c0_5 = arith.constant 0 : index
    %c0_6 = arith.constant 0 : index
    %5 = vector.load %arg2[%c0_5, %c0_6] : memref<32x96xf32, #tpu.memory_space<vmem>>, vector<32x96xf32>
    %c0_7 = arith.constant 0 : index
    %c0_8 = arith.constant 0 : index
    %c0_9 = arith.constant 0 : index
    %6 = vector.load %arg3[%c0_7, %c0_8, %c0_9] : memref<2x32x1xf32, #tpu.memory_space<vmem>>, vector<1x32x1xf32>
    %7 = vector.shape_cast %6 : vector<1x32x1xf32> to vector<32x1xf32>
    %c1 = arith.constant 1 : index
    %c0_10 = arith.constant 0 : index
    %c0_11 = arith.constant 0 : index
    %8 = vector.load %arg3[%c1, %c0_10, %c0_11] : memref<2x32x1xf32, #tpu.memory_space<vmem>>, vector<1x32x1xf32>
    %9 = vector.shape_cast %8 : vector<1x32x1xf32> to vector<32x1xf32>
    %c0_12 = arith.constant 0 : index
    %c127 = arith.constant 127 : index
    %10 = vector.load %arg13[%c0_12, %c127] : memref<32x392xf32, #tpu.memory_space<vmem>>, vector<32x16xf32>
    %c0_13 = arith.constant 0 : index
    %c128_14 = arith.constant 128 : index
    %11 = vector.load %arg13[%c0_13, %c128_14] : memref<32x392xf32, #tpu.memory_space<vmem>>, vector<32x16xf32>
    %c0_15 = arith.constant 0 : index
    %c129 = arith.constant 129 : index
    %12 = vector.load %arg13[%c0_15, %c129] : memref<32x392xf32, #tpu.memory_space<vmem>>, vector<32x16xf32>
    %13 = tpu.concatenate %10, %11, %12 in 0 : vector<32x16xf32>, vector<32x16xf32>, vector<32x16xf32> -> vector<96x16xf32>
    %cst_16 = arith.constant dense<0.000000e+00> : vector<32x16xf32>
    %14 = tpu.matmul %5, %13, %cst_16 {dimension_numbers = #tpu.dot_dimension_numbers<[1], [0], [0], [1], [0, 0, 1, 1], [], []>} : vector<32x96xf32>, vector<96x16xf32>, vector<32x16xf32> -> vector<32x16xf32>
    %15 = vector.broadcast %7 : vector<32x1xf32> to vector<32x16xf32>
    %16 = arith.mulf %14, %15 : vector<32x16xf32>
    %17 = vector.broadcast %9 : vector<32x1xf32> to vector<32x16xf32>
    %18 = arith.addf %16, %17 : vector<32x16xf32>
    %cst_17 = arith.constant 0.000000e+00 : f32
    %19 = vector.broadcast %cst_17 : f32 to vector<32x16xf32>
    %20 = arith.cmpf oge, %18, %19 : vector<32x16xf32>
    %cst_18 = arith.constant 2.000000e-01 : f32
    %21 = vector.broadcast %cst_18 : f32 to vector<32x16xf32>
    %22 = arith.mulf %21, %18 : vector<32x16xf32>
    %23 = arith.select %20, %18, %22 : vector<32x16xi1>, vector<32x16xf32>
    %c0_19 = arith.constant 0 : index
    %c128_20 = arith.constant 128 : index
    %24 = vector.load %arg13[%c0_19, %c128_20] : memref<32x392xf32, #tpu.memory_space<vmem>>, vector<32x16xf32>
    tpu.vector_store %arg13[%c0_19, %c128_20], %23 {strides = array<i32>} : memref<32x392xf32, #tpu.memory_space<vmem>>, vector<32x16xf32>,
    %c0_21 = arith.constant 0 : index
    %c0_22 = arith.constant 0 : index
    %c0_23 = arith.constant 0 : index
    %25 = vector.load %arg4[%c0_21, %c0_22, %c0_23] : memref<8x32x96xf32, #tpu.memory_space<vmem>>, vector<1x32x96xf32>
    %26 = vector.shape_cast %25 : vector<1x32x96xf32> to vector<32x96xf32>
    %c0_24 = arith.constant 0 : index
    %c0_25 = arith.constant 0 : index
    %c0_26 = arith.constant 0 : index
    %27 = vector.load %arg5[%c0_24, %c0_25, %c0_26] : memref<16x32x1xf32, #tpu.memory_space<vmem>>, vector<1x32x1xf32>
    %28 = vector.shape_cast %27 : vector<1x32x1xf32> to vector<32x1xf32>
    %c1_27 = arith.constant 1 : index
    %c0_28 = arith.constant 0 : index
    %c0_29 = arith.constant 0 : index
    %29 = vector.load %arg5[%c1_27, %c0_28, %c0_29] : memref<16x32x1xf32, #tpu.memory_space<vmem>>, vector<1x32x1xf32>
    %30 = vector.shape_cast %29 : vector<1x32x1xf32> to vector<32x1xf32>
    %c0_30 = arith.constant 0 : index
    %c127_31 = arith.constant 127 : index
    %31 = vector.load %arg13[%c0_30, %c127_31] : memref<32x392xf32, #tpu.memory_space<vmem>>, vector<32x16xf32>
    %c0_32 = arith.constant 0 : index
    %c128_33 = arith.constant 128 : index
    %32 = vector.load %arg13[%c0_32, %c128_33] : memref<32x392xf32, #tpu.memory_space<vmem>>, vector<32x16xf32>
    %c0_34 = arith.constant 0 : index
    %c129_35 = arith.constant 129 : index
    %33 = vector.load %arg13[%c0_34, %c129_35] : memref<32x392xf32, #tpu.memory_space<vmem>>, vector<32x16xf32>
    %34 = tpu.concatenate %31, %32, %33 in 0 : vector<32x16xf32>, vector<32x16xf32>, vector<32x16xf32> -> vector<96x16xf32>
    %cst_36 = arith.constant dense<0.000000e+00> : vector<32x16xf32>
    %35 = tpu.matmul %26, %34, %cst_36 {dimension_numbers = #tpu.dot_dimension_numbers<[1], [0], [0], [1], [0, 0, 1, 1], [], []>} : vector<32x96xf32>, vector<96x16xf32>, vector<32x16xf32> -> vector<32x16xf32>
    %36 = vector.broadcast %28 : vector<32x1xf32> to vector<32x16xf32>
    %37 = arith.mulf %35, %36 : vector<32x16xf32>
    %38 = vector.broadcast %30 : vector<32x1xf32> to vector<32x16xf32>
    %39 = arith.addf %37, %38 : vector<32x16xf32>
    %cst_37 = arith.constant 0.000000e+00 : f32
    %40 = vector.broadcast %cst_37 : f32 to vector<32x16xf32>
    %41 = arith.cmpf oge, %39, %40 : vector<32x16xf32>
    %cst_38 = arith.constant 2.000000e-01 : f32
    %42 = vector.broadcast %cst_38 : f32 to vector<32x16xf32>
    %43 = arith.mulf %42, %39 : vector<32x16xf32>
    %44 = arith.select %41, %39, %43 : vector<32x16xi1>, vector<32x16xf32>
    %c0_39 = arith.constant 0 : index
    %c128_40 = arith.constant 128 : index
    %45 = vector.load %arg13[%c0_39, %c128_40] : memref<32x392xf32, #tpu.memory_space<vmem>>, vector<32x16xf32>
    tpu.vector_store %arg13[%c0_39, %c128_40], %44 {strides = array<i32>} : memref<32x392xf32, #tpu.memory_space<vmem>>, vector<32x16xf32>,
    %c1_41 = arith.constant 1 : index
    %c0_42 = arith.constant 0 : index
    %c0_43 = arith.constant 0 : index
    %46 = vector.load %arg4[%c1_41, %c0_42, %c0_43] : memref<8x32x96xf32, #tpu.memory_space<vmem>>, vector<1x32x96xf32>
    %47 = vector.shape_cast %46 : vector<1x32x96xf32> to vector<32x96xf32>
    %c2 = arith.constant 2 : index
    %c0_44 = arith.constant 0 : index
    %c0_45 = arith.constant 0 : index
    %48 = vector.load %arg5[%c2, %c0_44, %c0_45] : memref<16x32x1xf32, #tpu.memory_space<vmem>>, vector<1x32x1xf32>
    %49 = vector.shape_cast %48 : vector<1x32x1xf32> to vector<32x1xf32>
    %c3 = arith.constant 3 : index
    %c0_46 = arith.constant 0 : index
    %c0_47 = arith.constant 0 : index
    %50 = vector.load %arg5[%c3, %c0_46, %c0_47] : memref<16x32x1xf32, #tpu.memory_space<vmem>>, vector<1x32x1xf32>
    %51 = vector.shape_cast %50 : vector<1x32x1xf32> to vector<32x1xf32>
    %c0_48 = arith.constant 0 : index
    %c127_49 = arith.constant 127 : index
    %52 = vector.load %arg13[%c0_48, %c127_49] : memref<32x392xf32, #tpu.memory_space<vmem>>, vector<32x16xf32>
    %c0_50 = arith.constant 0 : index
    %c128_51 = arith.constant 128 : index
    %53 = vector.load %arg13[%c0_50, %c128_51] : memref<32x392xf32, #tpu.memory_space<vmem>>, vector<32x16xf32>
    %c0_52 = arith.constant 0 : index
    %c129_53 = arith.constant 129 : index
    %54 = vector.load %arg13[%c0_52, %c129_53] : memref<32x392xf32, #tpu.memory_space<vmem>>, vector<32x16xf32>
    %55 = tpu.concatenate %52, %53, %54 in 0 : vector<32x16xf32>, vector<32x16xf32>, vector<32x16xf32> -> vector<96x16xf32>
    %cst_54 = arith.constant dense<0.000000e+00> : vector<32x16xf32>
    %56 = tpu.matmul %47, %55, %cst_54 {dimension_numbers = #tpu.dot_dimension_numbers<[1], [0], [0], [1], [0, 0, 1, 1], [], []>} : vector<32x96xf32>, vector<96x16xf32>, vector<32x16xf32> -> vector<32x16xf32>
    %57 = vector.broadcast %49 : vector<32x1xf32> to vector<32x16xf32>
    %58 = arith.mulf %56, %57 : vector<32x16xf32>
    %59 = vector.broadcast %51 : vector<32x1xf32> to vector<32x16xf32>
    %60 = arith.addf %58, %59 : vector<32x16xf32>
    %61 = arith.addf %60, %23 : vector<32x16xf32>
    %cst_55 = arith.constant 0.000000e+00 : f32
    %62 = vector.broadcast %cst_55 : f32 to vector<32x16xf32>
    %63 = arith.cmpf oge, %61, %62 : vector<32x16xf32>
    %cst_56 = arith.constant 2.000000e-01 : f32
    %64 = vector.broadcast %cst_56 : f32 to vector<32x16xf32>
    %65 = arith.mulf %64, %61 : vector<32x16xf32>
    %66 = arith.select %63, %61, %65 : vector<32x16xi1>, vector<32x16xf32>
    %c0_57 = arith.constant 0 : index
    %c128_58 = arith.constant 128 : index
    %67 = vector.load %arg13[%c0_57, %c128_58] : memref<32x392xf32, #tpu.memory_space<vmem>>, vector<32x16xf32>
    tpu.vector_store %arg13[%c0_57, %c128_58], %66 {strides = array<i32>} : memref<32x392xf32, #tpu.memory_space<vmem>>, vector<32x16xf32>,
    %c2_59 = arith.constant 2 : index
    %c0_60 = arith.constant 0 : index
    %c0_61 = arith.constant 0 : index
    %68 = vector.load %arg4[%c2_59, %c0_60, %c0_61] : memref<8x32x96xf32, #tpu.memory_space<vmem>>, vector<1x32x96xf32>
    %69 = vector.shape_cast %68 : vector<1x32x96xf32> to vector<32x96xf32>
    %c4 = arith.constant 4 : index
    %c0_62 = arith.constant 0 : index
    %c0_63 = arith.constant 0 : index
    %70 = vector.load %arg5[%c4, %c0_62, %c0_63] : memref<16x32x1xf32, #tpu.memory_space<vmem>>, vector<1x32x1xf32>
    %71 = vector.shape_cast %70 : vector<1x32x1xf32> to vector<32x1xf32>
    %c5 = arith.constant 5 : index
    %c0_64 = arith.constant 0 : index
    %c0_65 = arith.constant 0 : index
    %72 = vector.load %arg5[%c5, %c0_64, %c0_65] : memref<16x32x1xf32, #tpu.memory_space<vmem>>, vector<1x32x1xf32>
    %73 = vector.shape_cast %72 : vector<1x32x1xf32> to vector<32x1xf32>
    %c0_66 = arith.constant 0 : index
    %c126 = arith.constant 126 : index
    %74 = vector.load %arg13[%c0_66, %c126] : memref<32x392xf32, #tpu.memory_space<vmem>>, vector<32x16xf32>
    %c0_67 = arith.constant 0 : index
    %c128_68 = arith.constant 128 : index
    %75 = vector.load %arg13[%c0_67, %c128_68] : memref<32x392xf32, #tpu.memory_space<vmem>>, vector<32x16xf32>
    %c0_69 = arith.constant 0 : index
    %c130 = arith.constant 130 : index
    %76 = vector.load %arg13[%c0_69, %c130] : memref<32x392xf32, #tpu.memory_space<vmem>>, vector<32x16xf32>
    %77 = tpu.concatenate %74, %75, %76 in 0 : vector<32x16xf32>, vector<32x16xf32>, vector<32x16xf32> -> vector<96x16xf32>
    %cst_70 = arith.constant dense<0.000000e+00> : vector<32x16xf32>
    %78 = tpu.matmul %69, %77, %cst_70 {dimension_numbers = #tpu.dot_dimension_numbers<[1], [0], [0], [1], [0, 0, 1, 1], [], []>} : vector<32x96xf32>, vector<96x16xf32>, vector<32x16xf32> -> vector<32x16xf32>
    %79 = vector.broadcast %71 : vector<32x1xf32> to vector<32x16xf32>
    %80 = arith.mulf %78, %79 : vector<32x16xf32>
    %81 = vector.broadcast %73 : vector<32x1xf32> to vector<32x16xf32>
    %82 = arith.addf %80, %81 : vector<32x16xf32>
    %cst_71 = arith.constant 0.000000e+00 : f32
    %83 = vector.broadcast %cst_71 : f32 to vector<32x16xf32>
    %84 = arith.cmpf oge, %82, %83 : vector<32x16xf32>
    %cst_72 = arith.constant 2.000000e-01 : f32
    %85 = vector.broadcast %cst_72 : f32 to vector<32x16xf32>
    %86 = arith.mulf %85, %82 : vector<32x16xf32>
    %87 = arith.select %84, %82, %86 : vector<32x16xi1>, vector<32x16xf32>
    %c0_73 = arith.constant 0 : index
    %c128_74 = arith.constant 128 : index
    %88 = vector.load %arg13[%c0_73, %c128_74] : memref<32x392xf32, #tpu.memory_space<vmem>>, vector<32x16xf32>
    tpu.vector_store %arg13[%c0_73, %c128_74], %87 {strides = array<i32>} : memref<32x392xf32, #tpu.memory_space<vmem>>, vector<32x16xf32>,
    %c3_75 = arith.constant 3 : index
    %c0_76 = arith.constant 0 : index
    %c0_77 = arith.constant 0 : index
    %89 = vector.load %arg4[%c3_75, %c0_76, %c0_77] : memref<8x32x96xf32, #tpu.memory_space<vmem>>, vector<1x32x96xf32>
    %90 = vector.shape_cast %89 : vector<1x32x96xf32> to vector<32x96xf32>
    %c6 = arith.constant 6 : index
    %c0_78 = arith.constant 0 : index
    %c0_79 = arith.constant 0 : index
    %91 = vector.load %arg5[%c6, %c0_78, %c0_79] : memref<16x32x1xf32, #tpu.memory_space<vmem>>, vector<1x32x1xf32>
    %92 = vector.shape_cast %91 : vector<1x32x1xf32> to vector<32x1xf32>
    %c7 = arith.constant 7 : index
    %c0_80 = arith.constant 0 : index
    %c0_81 = arith.constant 0 : index
    %93 = vector.load %arg5[%c7, %c0_80, %c0_81] : memref<16x32x1xf32, #tpu.memory_space<vmem>>, vector<1x32x1xf32>
    %94 = vector.shape_cast %93 : vector<1x32x1xf32> to vector<32x1xf32>
    %c0_82 = arith.constant 0 : index
    %c126_83 = arith.constant 126 : index
    %95 = vector.load %arg13[%c0_82, %c126_83] : memref<32x392xf32, #tpu.memory_space<vmem>>, vector<32x16xf32>
    %c0_84 = arith.constant 0 : index
    %c128_85 = arith.constant 128 : index
    %96 = vector.load %arg13[%c0_84, %c128_85] : memref<32x392xf32, #tpu.memory_space<vmem>>, vector<32x16xf32>
    %c0_86 = arith.constant 0 : index
    %c130_87 = arith.constant 130 : index
    %97 = vector.load %arg13[%c0_86, %c130_87] : memref<32x392xf32, #tpu.memory_space<vmem>>, vector<32x16xf32>
    %98 = tpu.concatenate %95, %96, %97 in 0 : vector<32x16xf32>, vector<32x16xf32>, vector<32x16xf32> -> vector<96x16xf32>
    %cst_88 = arith.constant dense<0.000000e+00> : vector<32x16xf32>
    %99 = tpu.matmul %90, %98, %cst_88 {dimension_numbers = #tpu.dot_dimension_numbers<[1], [0], [0], [1], [0, 0, 1, 1], [], []>} : vector<32x96xf32>, vector<96x16xf32>, vector<32x16xf32> -> vector<32x16xf32>
    %100 = vector.broadcast %92 : vector<32x1xf32> to vector<32x16xf32>
    %101 = arith.mulf %99, %100 : vector<32x16xf32>
    %102 = vector.broadcast %94 : vector<32x1xf32> to vector<32x16xf32>
    %103 = arith.addf %101, %102 : vector<32x16xf32>
    %104 = arith.addf %103, %66 : vector<32x16xf32>
    %cst_89 = arith.constant 0.000000e+00 : f32
    %105 = vector.broadcast %cst_89 : f32 to vector<32x16xf32>
    %106 = arith.cmpf oge, %104, %105 : vector<32x16xf32>
    %cst_90 = arith.constant 2.000000e-01 : f32
    %107 = vector.broadcast %cst_90 : f32 to vector<32x16xf32>
    %108 = arith.mulf %107, %104 : vector<32x16xf32>
    %109 = arith.select %106, %104, %108 : vector<32x16xi1>, vector<32x16xf32>
    %c0_91 = arith.constant 0 : index
    %c128_92 = arith.constant 128 : index
    %110 = vector.load %arg13[%c0_91, %c128_92] : memref<32x392xf32, #tpu.memory_space<vmem>>, vector<32x16xf32>
    tpu.vector_store %arg13[%c0_91, %c128_92], %109 {strides = array<i32>} : memref<32x392xf32, #tpu.memory_space<vmem>>, vector<32x16xf32>,
    %c4_93 = arith.constant 4 : index
    %c0_94 = arith.constant 0 : index
    %c0_95 = arith.constant 0 : index
    %111 = vector.load %arg4[%c4_93, %c0_94, %c0_95] : memref<8x32x96xf32, #tpu.memory_space<vmem>>, vector<1x32x96xf32>
    %112 = vector.shape_cast %111 : vector<1x32x96xf32> to vector<32x96xf32>
    %c8 = arith.constant 8 : index
    %c0_96 = arith.constant 0 : index
    %c0_97 = arith.constant 0 : index
    %113 = vector.load %arg5[%c8, %c0_96, %c0_97] : memref<16x32x1xf32, #tpu.memory_space<vmem>>, vector<1x32x1xf32>
    %114 = vector.shape_cast %113 : vector<1x32x1xf32> to vector<32x1xf32>
    %c9 = arith.constant 9 : index
    %c0_98 = arith.constant 0 : index
    %c0_99 = arith.constant 0 : index
    %115 = vector.load %arg5[%c9, %c0_98, %c0_99] : memref<16x32x1xf32, #tpu.memory_space<vmem>>, vector<1x32x1xf32>
    %116 = vector.shape_cast %115 : vector<1x32x1xf32> to vector<32x1xf32>
    %c0_100 = arith.constant 0 : index
    %c124 = arith.constant 124 : index
    %117 = vector.load %arg13[%c0_100, %c124] : memref<32x392xf32, #tpu.memory_space<vmem>>, vector<32x16xf32>
    %c0_101 = arith.constant 0 : index
    %c128_102 = arith.constant 128 : index
    %118 = vector.load %arg13[%c0_101, %c128_102] : memref<32x392xf32, #tpu.memory_space<vmem>>, vector<32x16xf32>
    %c0_103 = arith.constant 0 : index
    %c132 = arith.constant 132 : index
    %119 = vector.load %arg13[%c0_103, %c132] : memref<32x392xf32, #tpu.memory_space<vmem>>, vector<32x16xf32>
    %120 = tpu.concatenate %117, %118, %119 in 0 : vector<32x16xf32>, vector<32x16xf32>, vector<32x16xf32> -> vector<96x16xf32>
    %cst_104 = arith.constant dense<0.000000e+00> : vector<32x16xf32>
    %121 = tpu.matmul %112, %120, %cst_104 {dimension_numbers = #tpu.dot_dimension_numbers<[1], [0], [0], [1], [0, 0, 1, 1], [], []>} : vector<32x96xf32>, vector<96x16xf32>, vector<32x16xf32> -> vector<32x16xf32>
    %122 = vector.broadcast %114 : vector<32x1xf32> to vector<32x16xf32>
    %123 = arith.mulf %121, %122 : vector<32x16xf32>
    %124 = vector.broadcast %116 : vector<32x1xf32> to vector<32x16xf32>
    %125 = arith.addf %123, %124 : vector<32x16xf32>
    %cst_105 = arith.constant 0.000000e+00 : f32
    %126 = vector.broadcast %cst_105 : f32 to vector<32x16xf32>
    %127 = arith.cmpf oge, %125, %126 : vector<32x16xf32>
    %cst_106 = arith.constant 2.000000e-01 : f32
    %128 = vector.broadcast %cst_106 : f32 to vector<32x16xf32>
    %129 = arith.mulf %128, %125 : vector<32x16xf32>
    %130 = arith.select %127, %125, %129 : vector<32x16xi1>, vector<32x16xf32>
    %c0_107 = arith.constant 0 : index
    %c128_108 = arith.constant 128 : index
    %131 = vector.load %arg13[%c0_107, %c128_108] : memref<32x392xf32, #tpu.memory_space<vmem>>, vector<32x16xf32>
    tpu.vector_store %arg13[%c0_107, %c128_108], %130 {strides = array<i32>} : memref<32x392xf32, #tpu.memory_space<vmem>>, vector<32x16xf32>,
    %c5_109 = arith.constant 5 : index
    %c0_110 = arith.constant 0 : index
    %c0_111 = arith.constant 0 : index
    %132 = vector.load %arg4[%c5_109, %c0_110, %c0_111] : memref<8x32x96xf32, #tpu.memory_space<vmem>>, vector<1x32x96xf32>
    %133 = vector.shape_cast %132 : vector<1x32x96xf32> to vector<32x96xf32>
    %c10 = arith.constant 10 : index
    %c0_112 = arith.constant 0 : index
    %c0_113 = arith.constant 0 : index
    %134 = vector.load %arg5[%c10, %c0_112, %c0_113] : memref<16x32x1xf32, #tpu.memory_space<vmem>>, vector<1x32x1xf32>
    %135 = vector.shape_cast %134 : vector<1x32x1xf32> to vector<32x1xf32>
    %c11 = arith.constant 11 : index
    %c0_114 = arith.constant 0 : index
    %c0_115 = arith.constant 0 : index
    %136 = vector.load %arg5[%c11, %c0_114, %c0_115] : memref<16x32x1xf32, #tpu.memory_space<vmem>>, vector<1x32x1xf32>
    %137 = vector.shape_cast %136 : vector<1x32x1xf32> to vector<32x1xf32>
    %c0_116 = arith.constant 0 : index
    %c124_117 = arith.constant 124 : index
    %138 = vector.load %arg13[%c0_116, %c124_117] : memref<32x392xf32, #tpu.memory_space<vmem>>, vector<32x16xf32>
    %c0_118 = arith.constant 0 : index
    %c128_119 = arith.constant 128 : index
    %139 = vector.load %arg13[%c0_118, %c128_119] : memref<32x392xf32, #tpu.memory_space<vmem>>, vector<32x16xf32>
    %c0_120 = arith.constant 0 : index
    %c132_121 = arith.constant 132 : index
    %140 = vector.load %arg13[%c0_120, %c132_121] : memref<32x392xf32, #tpu.memory_space<vmem>>, vector<32x16xf32>
    %141 = tpu.concatenate %138, %139, %140 in 0 : vector<32x16xf32>, vector<32x16xf32>, vector<32x16xf32> -> vector<96x16xf32>
    %cst_122 = arith.constant dense<0.000000e+00> : vector<32x16xf32>
    %142 = tpu.matmul %133, %141, %cst_122 {dimension_numbers = #tpu.dot_dimension_numbers<[1], [0], [0], [1], [0, 0, 1, 1], [], []>} : vector<32x96xf32>, vector<96x16xf32>, vector<32x16xf32> -> vector<32x16xf32>
    %143 = vector.broadcast %135 : vector<32x1xf32> to vector<32x16xf32>
    %144 = arith.mulf %142, %143 : vector<32x16xf32>
    %145 = vector.broadcast %137 : vector<32x1xf32> to vector<32x16xf32>
    %146 = arith.addf %144, %145 : vector<32x16xf32>
    %147 = arith.addf %146, %109 : vector<32x16xf32>
    %cst_123 = arith.constant 0.000000e+00 : f32
    %148 = vector.broadcast %cst_123 : f32 to vector<32x16xf32>
    %149 = arith.cmpf oge, %147, %148 : vector<32x16xf32>
    %cst_124 = arith.constant 2.000000e-01 : f32
    %150 = vector.broadcast %cst_124 : f32 to vector<32x16xf32>
    %151 = arith.mulf %150, %147 : vector<32x16xf32>
    %152 = arith.select %149, %147, %151 : vector<32x16xi1>, vector<32x16xf32>
    %c0_125 = arith.constant 0 : index
    %c128_126 = arith.constant 128 : index
    %153 = vector.load %arg13[%c0_125, %c128_126] : memref<32x392xf32, #tpu.memory_space<vmem>>, vector<32x16xf32>
    tpu.vector_store %arg13[%c0_125, %c128_126], %152 {strides = array<i32>} : memref<32x392xf32, #tpu.memory_space<vmem>>, vector<32x16xf32>,
    %c6_127 = arith.constant 6 : index
    %c0_128 = arith.constant 0 : index
    %c0_129 = arith.constant 0 : index
    %154 = vector.load %arg4[%c6_127, %c0_128, %c0_129] : memref<8x32x96xf32, #tpu.memory_space<vmem>>, vector<1x32x96xf32>
    %155 = vector.shape_cast %154 : vector<1x32x96xf32> to vector<32x96xf32>
    %c12 = arith.constant 12 : index
    %c0_130 = arith.constant 0 : index
    %c0_131 = arith.constant 0 : index
    %156 = vector.load %arg5[%c12, %c0_130, %c0_131] : memref<16x32x1xf32, #tpu.memory_space<vmem>>, vector<1x32x1xf32>
    %157 = vector.shape_cast %156 : vector<1x32x1xf32> to vector<32x1xf32>
    %c13 = arith.constant 13 : index
    %c0_132 = arith.constant 0 : index
    %c0_133 = arith.constant 0 : index
    %158 = vector.load %arg5[%c13, %c0_132, %c0_133] : memref<16x32x1xf32, #tpu.memory_space<vmem>>, vector<1x32x1xf32>
    %159 = vector.shape_cast %158 : vector<1x32x1xf32> to vector<32x1xf32>
    %c0_134 = arith.constant 0 : index
    %c120 = arith.constant 120 : index
    %160 = vector.load %arg13[%c0_134, %c120] : memref<32x392xf32, #tpu.memory_space<vmem>>, vector<32x16xf32>
    %c0_135 = arith.constant 0 : index
    %c128_136 = arith.constant 128 : index
    %161 = vector.load %arg13[%c0_135, %c128_136] : memref<32x392xf32, #tpu.memory_space<vmem>>, vector<32x16xf32>
    %c0_137 = arith.constant 0 : index
    %c136 = arith.constant 136 : index
    %162 = vector.load %arg13[%c0_137, %c136] : memref<32x392xf32, #tpu.memory_space<vmem>>, vector<32x16xf32>
    %163 = tpu.concatenate %160, %161, %162 in 0 : vector<32x16xf32>, vector<32x16xf32>, vector<32x16xf32> -> vector<96x16xf32>
    %cst_138 = arith.constant dense<0.000000e+00> : vector<32x16xf32>
    %164 = tpu.matmul %155, %163, %cst_138 {dimension_numbers = #tpu.dot_dimension_numbers<[1], [0], [0], [1], [0, 0, 1, 1], [], []>} : vector<32x96xf32>, vector<96x16xf32>, vector<32x16xf32> -> vector<32x16xf32>
    %165 = vector.broadcast %157 : vector<32x1xf32> to vector<32x16xf32>
    %166 = arith.mulf %164, %165 : vector<32x16xf32>
    %167 = vector.broadcast %159 : vector<32x1xf32> to vector<32x16xf32>
    %168 = arith.addf %166, %167 : vector<32x16xf32>
    %cst_139 = arith.constant 0.000000e+00 : f32
    %169 = vector.broadcast %cst_139 : f32 to vector<32x16xf32>
    %170 = arith.cmpf oge, %168, %169 : vector<32x16xf32>
    %cst_140 = arith.constant 2.000000e-01 : f32
    %171 = vector.broadcast %cst_140 : f32 to vector<32x16xf32>
    %172 = arith.mulf %171, %168 : vector<32x16xf32>
    %173 = arith.select %170, %168, %172 : vector<32x16xi1>, vector<32x16xf32>
    %c0_141 = arith.constant 0 : index
    %c128_142 = arith.constant 128 : index
    %174 = vector.load %arg13[%c0_141, %c128_142] : memref<32x392xf32, #tpu.memory_space<vmem>>, vector<32x16xf32>
    tpu.vector_store %arg13[%c0_141, %c128_142], %173 {strides = array<i32>} : memref<32x392xf32, #tpu.memory_space<vmem>>, vector<32x16xf32>,
    %c7_143 = arith.constant 7 : index
    %c0_144 = arith.constant 0 : index
    %c0_145 = arith.constant 0 : index
    %175 = vector.load %arg4[%c7_143, %c0_144, %c0_145] : memref<8x32x96xf32, #tpu.memory_space<vmem>>, vector<1x32x96xf32>
    %176 = vector.shape_cast %175 : vector<1x32x96xf32> to vector<32x96xf32>
    %c14 = arith.constant 14 : index
    %c0_146 = arith.constant 0 : index
    %c0_147 = arith.constant 0 : index
    %177 = vector.load %arg5[%c14, %c0_146, %c0_147] : memref<16x32x1xf32, #tpu.memory_space<vmem>>, vector<1x32x1xf32>
    %178 = vector.shape_cast %177 : vector<1x32x1xf32> to vector<32x1xf32>
    %c15 = arith.constant 15 : index
    %c0_148 = arith.constant 0 : index
    %c0_149 = arith.constant 0 : index
    %179 = vector.load %arg5[%c15, %c0_148, %c0_149] : memref<16x32x1xf32, #tpu.memory_space<vmem>>, vector<1x32x1xf32>
    %180 = vector.shape_cast %179 : vector<1x32x1xf32> to vector<32x1xf32>
    %c0_150 = arith.constant 0 : index
    %c120_151 = arith.constant 120 : index
    %181 = vector.load %arg13[%c0_150, %c120_151] : memref<32x392xf32, #tpu.memory_space<vmem>>, vector<32x16xf32>
    %c0_152 = arith.constant 0 : index
    %c128_153 = arith.constant 128 : index
    %182 = vector.load %arg13[%c0_152, %c128_153] : memref<32x392xf32, #tpu.memory_space<vmem>>, vector<32x16xf32>
    %c0_154 = arith.constant 0 : index
    %c136_155 = arith.constant 136 : index
    %183 = vector.load %arg13[%c0_154, %c136_155] : memref<32x392xf32, #tpu.memory_space<vmem>>, vector<32x16xf32>
    %184 = tpu.concatenate %181, %182, %183 in 0 : vector<32x16xf32>, vector<32x16xf32>, vector<32x16xf32> -> vector<96x16xf32>
    %cst_156 = arith.constant dense<0.000000e+00> : vector<32x16xf32>
    %185 = tpu.matmul %176, %184, %cst_156 {dimension_numbers = #tpu.dot_dimension_numbers<[1], [0], [0], [1], [0, 0, 1, 1], [], []>} : vector<32x96xf32>, vector<96x16xf32>, vector<32x16xf32> -> vector<32x16xf32>
    %186 = vector.broadcast %178 : vector<32x1xf32> to vector<32x16xf32>
    %187 = arith.mulf %185, %186 : vector<32x16xf32>
    %188 = vector.broadcast %180 : vector<32x1xf32> to vector<32x16xf32>
    %189 = arith.addf %187, %188 : vector<32x16xf32>
    %190 = arith.addf %189, %152 : vector<32x16xf32>
    %cst_157 = arith.constant 0.000000e+00 : f32
    %191 = vector.broadcast %cst_157 : f32 to vector<32x16xf32>
    %192 = arith.cmpf oge, %190, %191 : vector<32x16xf32>
    %cst_158 = arith.constant 2.000000e-01 : f32
    %193 = vector.broadcast %cst_158 : f32 to vector<32x16xf32>
    %194 = arith.mulf %193, %190 : vector<32x16xf32>
    %195 = arith.select %192, %190, %194 : vector<32x16xi1>, vector<32x16xf32>
    %c0_159 = arith.constant 0 : index
    %c128_160 = arith.constant 128 : index
    %196 = vector.load %arg13[%c0_159, %c128_160] : memref<32x392xf32, #tpu.memory_space<vmem>>, vector<32x16xf32>
    tpu.vector_store %arg13[%c0_159, %c128_160], %195 {strides = array<i32>} : memref<32x392xf32, #tpu.memory_space<vmem>>, vector<32x16xf32>,
    %c0_161 = arith.constant 0 : index
    %c128_162 = arith.constant 128 : index
    %197 = vector.load %arg13[%c0_161, %c128_162] : memref<32x392xf32, #tpu.memory_space<vmem>>, vector<32x16xf32>
    %c0_163 = arith.constant 0 : index
    %c127_164 = arith.constant 127 : index
    %198 = vector.load %arg13[%c0_163, %c127_164] : memref<32x392xf32, #tpu.memory_space<vmem>>, vector<32x16xf32>
    %c0_165 = arith.constant 0 : index
    %c129_166 = arith.constant 129 : index
    %199 = vector.load %arg13[%c0_165, %c129_166] : memref<32x392xf32, #tpu.memory_space<vmem>>, vector<32x16xf32>
    %c0_167 = arith.constant 0 : index
    %c0_168 = arith.constant 0 : index
    %c0_169 = arith.constant 0 : index
    %200 = vector.load %arg6[%c0_167, %c0_168, %c0_169] : memref<8x32x64xf32, #tpu.memory_space<vmem>>, vector<1x32x64xf32>
    %201 = vector.shape_cast %200 : vector<1x32x64xf32> to vector<32x64xf32>
    %202 = tpu.concatenate %197, %198 in 0 : vector<32x16xf32>, vector<32x16xf32> -> vector<64x16xf32>
    %cst_170 = arith.constant dense<0.000000e+00> : vector<32x16xf32>
    %203 = tpu.matmul %201, %202, %cst_170 {dimension_numbers = #tpu.dot_dimension_numbers<[1], [0], [0], [1], [0, 0, 1, 1], [], []>} : vector<32x64xf32>, vector<64x16xf32>, vector<32x16xf32> -> vector<32x16xf32>
    %c1_171 = arith.constant 1 : index
    %c0_172 = arith.constant 0 : index
    %c0_173 = arith.constant 0 : index
    %204 = vector.load %arg6[%c1_171, %c0_172, %c0_173] : memref<8x32x64xf32, #tpu.memory_space<vmem>>, vector<1x32x64xf32>
    %205 = vector.shape_cast %204 : vector<1x32x64xf32> to vector<32x64xf32>
    %206 = tpu.concatenate %197, %199 in 0 : vector<32x16xf32>, vector<32x16xf32> -> vector<64x16xf32>
    %cst_174 = arith.constant dense<0.000000e+00> : vector<32x16xf32>
    %207 = tpu.matmul %205, %206, %cst_174 {dimension_numbers = #tpu.dot_dimension_numbers<[1], [0], [0], [1], [0, 0, 1, 1], [], []>} : vector<32x64xf32>, vector<64x16xf32>, vector<32x16xf32> -> vector<32x16xf32>
    %c0_175 = arith.constant 0 : index
    %c0_176 = arith.constant 0 : index
    %208 = vector.load %arg8[%c0_175, %c0_176] : memref<128x256xf32, #tpu.memory_space<vmem>>, vector<16x32xf32>
    %cst_177 = arith.constant dense<0.000000e+00> : vector<32x32xf32>
    %209 = tpu.matmul %203, %208, %cst_177 {dimension_numbers = #tpu.dot_dimension_numbers<[1], [0], [0], [1], [0, 0, 1, 1], [], []>} : vector<32x16xf32>, vector<16x32xf32>, vector<32x32xf32> -> vector<32x32xf32>
    %c0_178 = arith.constant 0 : index
    %c0_179 = arith.constant 0 : index
    %210 = vector.load %arg9[%c0_178, %c0_179] : memref<128x256xf32, #tpu.memory_space<vmem>>, vector<16x32xf32>
    %cst_180 = arith.constant dense<0.000000e+00> : vector<32x32xf32>
    %211 = tpu.matmul %207, %210, %cst_180 {dimension_numbers = #tpu.dot_dimension_numbers<[1], [0], [0], [1], [0, 0, 1, 1], [], []>} : vector<32x16xf32>, vector<16x32xf32>, vector<32x32xf32> -> vector<32x32xf32>
    %212 = arith.addf %209, %211 : vector<32x32xf32>
    %c0_181 = arith.constant 0 : index
    %c0_182 = arith.constant 0 : index
    %c0_183 = arith.constant 0 : index
    %213 = vector.load %arg7[%c0_181, %c0_182, %c0_183] : memref<8x32x1xf32, #tpu.memory_space<vmem>>, vector<1x32x1xf32>
    %214 = vector.shape_cast %213 : vector<1x32x1xf32> to vector<32x1xf32>
    %215 = vector.broadcast %214 : vector<32x1xf32> to vector<32x32xf32>
    %216 = arith.mulf %212, %215 : vector<32x32xf32>
    %c1_184 = arith.constant 1 : index
    %c0_185 = arith.constant 0 : index
    %c0_186 = arith.constant 0 : index
    %217 = vector.load %arg7[%c1_184, %c0_185, %c0_186] : memref<8x32x1xf32, #tpu.memory_space<vmem>>, vector<1x32x1xf32>
    %218 = vector.shape_cast %217 : vector<1x32x1xf32> to vector<32x1xf32>
    %219 = vector.broadcast %218 : vector<32x1xf32> to vector<32x32xf32>
    %220 = arith.addf %216, %219 : vector<32x32xf32>
    %cst_187 = arith.constant 0.000000e+00 : f32
    %221 = vector.broadcast %cst_187 : f32 to vector<32x32xf32>
    %222 = arith.cmpf oge, %220, %221 : vector<32x32xf32>
    %cst_188 = arith.constant 2.000000e-01 : f32
    %223 = vector.broadcast %cst_188 : f32 to vector<32x32xf32>
    %224 = arith.mulf %223, %220 : vector<32x32xf32>
    %225 = arith.select %222, %220, %224 : vector<32x32xi1>, vector<32x32xf32>
    %c0_189 = arith.constant 0 : index
    %c128_190 = arith.constant 128 : index
    %226 = vector.load %arg13[%c0_189, %c128_190] : memref<32x392xf32, #tpu.memory_space<vmem>>, vector<32x32xf32>
    tpu.vector_store %arg13[%c0_189, %c128_190], %225 {strides = array<i32>} : memref<32x392xf32, #tpu.memory_space<vmem>>, vector<32x32xf32>,
    %c0_191 = arith.constant 0 : index
    %c128_192 = arith.constant 128 : index
    %227 = vector.load %arg13[%c0_191, %c128_192] : memref<32x392xf32, #tpu.memory_space<vmem>>, vector<32x32xf32>
    %c0_193 = arith.constant 0 : index
    %c127_194 = arith.constant 127 : index
    %228 = vector.load %arg13[%c0_193, %c127_194] : memref<32x392xf32, #tpu.memory_space<vmem>>, vector<32x32xf32>
    %c0_195 = arith.constant 0 : index
    %c129_196 = arith.constant 129 : index
    %229 = vector.load %arg13[%c0_195, %c129_196] : memref<32x392xf32, #tpu.memory_space<vmem>>, vector<32x32xf32>
    %c2_197 = arith.constant 2 : index
    %c0_198 = arith.constant 0 : index
    %c0_199 = arith.constant 0 : index
    %230 = vector.load %arg6[%c2_197, %c0_198, %c0_199] : memref<8x32x64xf32, #tpu.memory_space<vmem>>, vector<1x32x64xf32>
    %231 = vector.shape_cast %230 : vector<1x32x64xf32> to vector<32x64xf32>
    %232 = tpu.concatenate %227, %228 in 0 : vector<32x32xf32>, vector<32x32xf32> -> vector<64x32xf32>
    %cst_200 = arith.constant dense<0.000000e+00> : vector<32x32xf32>
    %233 = tpu.matmul %231, %232, %cst_200 {dimension_numbers = #tpu.dot_dimension_numbers<[1], [0], [0], [1], [0, 0, 1, 1], [], []>} : vector<32x64xf32>, vector<64x32xf32>, vector<32x32xf32> -> vector<32x32xf32>
    %c3_201 = arith.constant 3 : index
    %c0_202 = arith.constant 0 : index
    %c0_203 = arith.constant 0 : index
    %234 = vector.load %arg6[%c3_201, %c0_202, %c0_203] : memref<8x32x64xf32, #tpu.memory_space<vmem>>, vector<1x32x64xf32>
    %235 = vector.shape_cast %234 : vector<1x32x64xf32> to vector<32x64xf32>
    %236 = tpu.concatenate %227, %229 in 0 : vector<32x32xf32>, vector<32x32xf32> -> vector<64x32xf32>
    %cst_204 = arith.constant dense<0.000000e+00> : vector<32x32xf32>
    %237 = tpu.matmul %235, %236, %cst_204 {dimension_numbers = #tpu.dot_dimension_numbers<[1], [0], [0], [1], [0, 0, 1, 1], [], []>} : vector<32x64xf32>, vector<64x32xf32>, vector<32x32xf32> -> vector<32x32xf32>
    %c0_205 = arith.constant 0 : index
    %c0_206 = arith.constant 0 : index
    %238 = vector.load %arg8[%c0_205, %c0_206] : memref<128x256xf32, #tpu.memory_space<vmem>>, vector<32x64xf32>
    %cst_207 = arith.constant dense<0.000000e+00> : vector<32x64xf32>
    %239 = tpu.matmul %233, %238, %cst_207 {dimension_numbers = #tpu.dot_dimension_numbers<[1], [0], [0], [1], [0, 0, 1, 1], [], []>} : vector<32x32xf32>, vector<32x64xf32>, vector<32x64xf32> -> vector<32x64xf32>
    %c0_208 = arith.constant 0 : index
    %c0_209 = arith.constant 0 : index
    %240 = vector.load %arg9[%c0_208, %c0_209] : memref<128x256xf32, #tpu.memory_space<vmem>>, vector<32x64xf32>
    %cst_210 = arith.constant dense<0.000000e+00> : vector<32x64xf32>
    %241 = tpu.matmul %237, %240, %cst_210 {dimension_numbers = #tpu.dot_dimension_numbers<[1], [0], [0], [1], [0, 0, 1, 1], [], []>} : vector<32x32xf32>, vector<32x64xf32>, vector<32x64xf32> -> vector<32x64xf32>
    %242 = arith.addf %239, %241 : vector<32x64xf32>
    %c2_211 = arith.constant 2 : index
    %c0_212 = arith.constant 0 : index
    %c0_213 = arith.constant 0 : index
    %243 = vector.load %arg7[%c2_211, %c0_212, %c0_213] : memref<8x32x1xf32, #tpu.memory_space<vmem>>, vector<1x32x1xf32>
    %244 = vector.shape_cast %243 : vector<1x32x1xf32> to vector<32x1xf32>
    %245 = vector.broadcast %244 : vector<32x1xf32> to vector<32x64xf32>
    %246 = arith.mulf %242, %245 : vector<32x64xf32>
    %c3_214 = arith.constant 3 : index
    %c0_215 = arith.constant 0 : index
    %c0_216 = arith.constant 0 : index
    %247 = vector.load %arg7[%c3_214, %c0_215, %c0_216] : memref<8x32x1xf32, #tpu.memory_space<vmem>>, vector<1x32x1xf32>
    %248 = vector.shape_cast %247 : vector<1x32x1xf32> to vector<32x1xf32>
    %249 = vector.broadcast %248 : vector<32x1xf32> to vector<32x64xf32>
    %250 = arith.addf %246, %249 : vector<32x64xf32>
    %cst_217 = arith.constant 0.000000e+00 : f32
    %251 = vector.broadcast %cst_217 : f32 to vector<32x64xf32>
    %252 = arith.cmpf oge, %250, %251 : vector<32x64xf32>
    %cst_218 = arith.constant 2.000000e-01 : f32
    %253 = vector.broadcast %cst_218 : f32 to vector<32x64xf32>
    %254 = arith.mulf %253, %250 : vector<32x64xf32>
    %255 = arith.select %252, %250, %254 : vector<32x64xi1>, vector<32x64xf32>
    %c0_219 = arith.constant 0 : index
    %c128_220 = arith.constant 128 : index
    %256 = vector.load %arg13[%c0_219, %c128_220] : memref<32x392xf32, #tpu.memory_space<vmem>>, vector<32x64xf32>
    tpu.vector_store %arg13[%c0_219, %c128_220], %255 {strides = array<i32>} : memref<32x392xf32, #tpu.memory_space<vmem>>, vector<32x64xf32>,
    %c0_221 = arith.constant 0 : index
    %c128_222 = arith.constant 128 : index
    %257 = vector.load %arg13[%c0_221, %c128_222] : memref<32x392xf32, #tpu.memory_space<vmem>>, vector<32x64xf32>
    %c0_223 = arith.constant 0 : index
    %c127_224 = arith.constant 127 : index
    %258 = vector.load %arg13[%c0_223, %c127_224] : memref<32x392xf32, #tpu.memory_space<vmem>>, vector<32x64xf32>
    %c0_225 = arith.constant 0 : index
    %c129_226 = arith.constant 129 : index
    %259 = vector.load %arg13[%c0_225, %c129_226] : memref<32x392xf32, #tpu.memory_space<vmem>>, vector<32x64xf32>
    %c4_227 = arith.constant 4 : index
    %c0_228 = arith.constant 0 : index
    %c0_229 = arith.constant 0 : index
    %260 = vector.load %arg6[%c4_227, %c0_228, %c0_229] : memref<8x32x64xf32, #tpu.memory_space<vmem>>, vector<1x32x64xf32>
    %261 = vector.shape_cast %260 : vector<1x32x64xf32> to vector<32x64xf32>
    %262 = tpu.concatenate %257, %258 in 0 : vector<32x64xf32>, vector<32x64xf32> -> vector<64x64xf32>
    %cst_230 = arith.constant dense<0.000000e+00> : vector<32x64xf32>
    %263 = tpu.matmul %261, %262, %cst_230 {dimension_numbers = #tpu.dot_dimension_numbers<[1], [0], [0], [1], [0, 0, 1, 1], [], []>} : vector<32x64xf32>, vector<64x64xf32>, vector<32x64xf32> -> vector<32x64xf32>
    %c5_231 = arith.constant 5 : index
    %c0_232 = arith.constant 0 : index
    %c0_233 = arith.constant 0 : index
    %264 = vector.load %arg6[%c5_231, %c0_232, %c0_233] : memref<8x32x64xf32, #tpu.memory_space<vmem>>, vector<1x32x64xf32>
    %265 = vector.shape_cast %264 : vector<1x32x64xf32> to vector<32x64xf32>
    %266 = tpu.concatenate %257, %259 in 0 : vector<32x64xf32>, vector<32x64xf32> -> vector<64x64xf32>
    %cst_234 = arith.constant dense<0.000000e+00> : vector<32x64xf32>
    %267 = tpu.matmul %265, %266, %cst_234 {dimension_numbers = #tpu.dot_dimension_numbers<[1], [0], [0], [1], [0, 0, 1, 1], [], []>} : vector<32x64xf32>, vector<64x64xf32>, vector<32x64xf32> -> vector<32x64xf32>
    %c0_235 = arith.constant 0 : index
    %c0_236 = arith.constant 0 : index
    %268 = vector.load %arg8[%c0_235, %c0_236] : memref<128x256xf32, #tpu.memory_space<vmem>>, vector<64x128xf32>
    %cst_237 = arith.constant dense<0.000000e+00> : vector<32x128xf32>
    %269 = tpu.matmul %263, %268, %cst_237 {dimension_numbers = #tpu.dot_dimension_numbers<[1], [0], [0], [1], [0, 0, 1, 1], [], []>} : vector<32x64xf32>, vector<64x128xf32>, vector<32x128xf32> -> vector<32x128xf32>
    %c0_238 = arith.constant 0 : index
    %c0_239 = arith.constant 0 : index
    %270 = vector.load %arg9[%c0_238, %c0_239] : memref<128x256xf32, #tpu.memory_space<vmem>>, vector<64x128xf32>
    %cst_240 = arith.constant dense<0.000000e+00> : vector<32x128xf32>
    %271 = tpu.matmul %267, %270, %cst_240 {dimension_numbers = #tpu.dot_dimension_numbers<[1], [0], [0], [1], [0, 0, 1, 1], [], []>} : vector<32x64xf32>, vector<64x128xf32>, vector<32x128xf32> -> vector<32x128xf32>
    %272 = arith.addf %269, %271 : vector<32x128xf32>
    %c4_241 = arith.constant 4 : index
    %c0_242 = arith.constant 0 : index
    %c0_243 = arith.constant 0 : index
    %273 = vector.load %arg7[%c4_241, %c0_242, %c0_243] : memref<8x32x1xf32, #tpu.memory_space<vmem>>, vector<1x32x1xf32>
    %274 = vector.shape_cast %273 : vector<1x32x1xf32> to vector<32x1xf32>
    %275 = vector.broadcast %274 : vector<32x1xf32> to vector<32x128xf32>
    %276 = arith.mulf %272, %275 : vector<32x128xf32>
    %c5_244 = arith.constant 5 : index
    %c0_245 = arith.constant 0 : index
    %c0_246 = arith.constant 0 : index
    %277 = vector.load %arg7[%c5_244, %c0_245, %c0_246] : memref<8x32x1xf32, #tpu.memory_space<vmem>>, vector<1x32x1xf32>
    %278 = vector.shape_cast %277 : vector<1x32x1xf32> to vector<32x1xf32>
    %279 = vector.broadcast %278 : vector<32x1xf32> to vector<32x128xf32>
    %280 = arith.addf %276, %279 : vector<32x128xf32>
    %cst_247 = arith.constant 0.000000e+00 : f32
    %281 = vector.broadcast %cst_247 : f32 to vector<32x128xf32>
    %282 = arith.cmpf oge, %280, %281 : vector<32x128xf32>
    %cst_248 = arith.constant 2.000000e-01 : f32
    %283 = vector.broadcast %cst_248 : f32 to vector<32x128xf32>
    %284 = arith.mulf %283, %280 : vector<32x128xf32>
    %285 = arith.select %282, %280, %284 : vector<32x128xi1>, vector<32x128xf32>
    %c0_249 = arith.constant 0 : index
    %c128_250 = arith.constant 128 : index
    %286 = vector.load %arg13[%c0_249, %c128_250] : memref<32x392xf32, #tpu.memory_space<vmem>>, vector<32x128xf32>
    tpu.vector_store %arg13[%c0_249, %c128_250], %285 {strides = array<i32>} : memref<32x392xf32, #tpu.memory_space<vmem>>, vector<32x128xf32>,
    %c0_251 = arith.constant 0 : index
    %c128_252 = arith.constant 128 : index
    %287 = vector.load %arg13[%c0_251, %c128_252] : memref<32x392xf32, #tpu.memory_space<vmem>>, vector<32x128xf32>
    %c0_253 = arith.constant 0 : index
    %c127_254 = arith.constant 127 : index
    %288 = vector.load %arg13[%c0_253, %c127_254] : memref<32x392xf32, #tpu.memory_space<vmem>>, vector<32x128xf32>
    %c0_255 = arith.constant 0 : index
    %c129_256 = arith.constant 129 : index
    %289 = vector.load %arg13[%c0_255, %c129_256] : memref<32x392xf32, #tpu.memory_space<vmem>>, vector<32x128xf32>
    %c6_257 = arith.constant 6 : index
    %c0_258 = arith.constant 0 : index
    %c0_259 = arith.constant 0 : index
    %290 = vector.load %arg6[%c6_257, %c0_258, %c0_259] : memref<8x32x64xf32, #tpu.memory_space<vmem>>, vector<1x32x64xf32>
    %291 = vector.shape_cast %290 : vector<1x32x64xf32> to vector<32x64xf32>
    %292 = tpu.concatenate %287, %288 in 0 : vector<32x128xf32>, vector<32x128xf32> -> vector<64x128xf32>
    %cst_260 = arith.constant dense<0.000000e+00> : vector<32x128xf32>
    %293 = tpu.matmul %291, %292, %cst_260 {dimension_numbers = #tpu.dot_dimension_numbers<[1], [0], [0], [1], [0, 0, 1, 1], [], []>} : vector<32x64xf32>, vector<64x128xf32>, vector<32x128xf32> -> vector<32x128xf32>
    %c7_261 = arith.constant 7 : index
    %c0_262 = arith.constant 0 : index
    %c0_263 = arith.constant 0 : index
    %294 = vector.load %arg6[%c7_261, %c0_262, %c0_263] : memref<8x32x64xf32, #tpu.memory_space<vmem>>, vector<1x32x64xf32>
    %295 = vector.shape_cast %294 : vector<1x32x64xf32> to vector<32x64xf32>
    %296 = tpu.concatenate %287, %289 in 0 : vector<32x128xf32>, vector<32x128xf32> -> vector<64x128xf32>
    %cst_264 = arith.constant dense<0.000000e+00> : vector<32x128xf32>
    %297 = tpu.matmul %295, %296, %cst_264 {dimension_numbers = #tpu.dot_dimension_numbers<[1], [0], [0], [1], [0, 0, 1, 1], [], []>} : vector<32x64xf32>, vector<64x128xf32>, vector<32x128xf32> -> vector<32x128xf32>
    %c0_265 = arith.constant 0 : index
    %c0_266 = arith.constant 0 : index
    %298 = vector.load %arg8[%c0_265, %c0_266] : memref<128x256xf32, #tpu.memory_space<vmem>>, vector<128x256xf32>
    %cst_267 = arith.constant dense<0.000000e+00> : vector<32x256xf32>
    %299 = tpu.matmul %293, %298, %cst_267 {dimension_numbers = #tpu.dot_dimension_numbers<[1], [0], [0], [1], [0, 0, 1, 1], [], []>} : vector<32x128xf32>, vector<128x256xf32>, vector<32x256xf32> -> vector<32x256xf32>
    %c0_268 = arith.constant 0 : index
    %c0_269 = arith.constant 0 : index
    %300 = vector.load %arg9[%c0_268, %c0_269] : memref<128x256xf32, #tpu.memory_space<vmem>>, vector<128x256xf32>
    %cst_270 = arith.constant dense<0.000000e+00> : vector<32x256xf32>
    %301 = tpu.matmul %297, %300, %cst_270 {dimension_numbers = #tpu.dot_dimension_numbers<[1], [0], [0], [1], [0, 0, 1, 1], [], []>} : vector<32x128xf32>, vector<128x256xf32>, vector<32x256xf32> -> vector<32x256xf32>
    %302 = arith.addf %299, %301 : vector<32x256xf32>
    %c6_271 = arith.constant 6 : index
    %c0_272 = arith.constant 0 : index
    %c0_273 = arith.constant 0 : index
    %303 = vector.load %arg7[%c6_271, %c0_272, %c0_273] : memref<8x32x1xf32, #tpu.memory_space<vmem>>, vector<1x32x1xf32>
    %304 = vector.shape_cast %303 : vector<1x32x1xf32> to vector<32x1xf32>
    %305 = vector.broadcast %304 : vector<32x1xf32> to vector<32x256xf32>
    %306 = arith.mulf %302, %305 : vector<32x256xf32>
    %c7_274 = arith.constant 7 : index
    %c0_275 = arith.constant 0 : index
    %c0_276 = arith.constant 0 : index
    %307 = vector.load %arg7[%c7_274, %c0_275, %c0_276] : memref<8x32x1xf32, #tpu.memory_space<vmem>>, vector<1x32x1xf32>
    %308 = vector.shape_cast %307 : vector<1x32x1xf32> to vector<32x1xf32>
    %309 = vector.broadcast %308 : vector<32x1xf32> to vector<32x256xf32>
    %310 = arith.addf %306, %309 : vector<32x256xf32>
    %cst_277 = arith.constant 0.000000e+00 : f32
    %311 = vector.broadcast %cst_277 : f32 to vector<32x256xf32>
    %312 = arith.cmpf oge, %310, %311 : vector<32x256xf32>
    %cst_278 = arith.constant 2.000000e-01 : f32
    %313 = vector.broadcast %cst_278 : f32 to vector<32x256xf32>
    %314 = arith.mulf %313, %310 : vector<32x256xf32>
    %315 = arith.select %312, %310, %314 : vector<32x256xi1>, vector<32x256xf32>
    %c0_279 = arith.constant 0 : index
    %c128_280 = arith.constant 128 : index
    %316 = vector.load %arg13[%c0_279, %c128_280] : memref<32x392xf32, #tpu.memory_space<vmem>>, vector<32x256xf32>
    tpu.vector_store %arg13[%c0_279, %c128_280], %315 {strides = array<i32>} : memref<32x392xf32, #tpu.memory_space<vmem>>, vector<32x256xf32>,
    %cst_281 = arith.constant 0.000000e+00 : f32
    %317 = vector.broadcast %cst_281 : f32 to vector<8x256xf32>
    %c0_282 = arith.constant 0 : index
    %c0_283 = arith.constant 0 : index
    %c0_284 = arith.constant 0 : index
    %318 = vector.load %arg10[%c0_282, %c0_283, %c0_284] : memref<7x8x32xf32, #tpu.memory_space<vmem>>, vector<1x8x32xf32>
    %319 = vector.shape_cast %318 : vector<1x8x32xf32> to vector<8x32xf32>
    %c0_285 = arith.constant 0 : index
    %c125 = arith.constant 125 : index
    %320 = vector.load %arg13[%c0_285, %c125] : memref<32x392xf32, #tpu.memory_space<vmem>>, vector<32x256xf32>
    %cst_286 = arith.constant dense<0.000000e+00> : vector<8x256xf32>
    %321 = tpu.matmul %319, %320, %cst_286 {dimension_numbers = #tpu.dot_dimension_numbers<[1], [0], [0], [1], [0, 0, 1, 1], [], []>} : vector<8x32xf32>, vector<32x256xf32>, vector<8x256xf32> -> vector<8x256xf32>
    %322 = arith.addf %317, %321 : vector<8x256xf32>
    %c1_287 = arith.constant 1 : index
    %c0_288 = arith.constant 0 : index
    %c0_289 = arith.constant 0 : index
    %323 = vector.load %arg10[%c1_287, %c0_288, %c0_289] : memref<7x8x32xf32, #tpu.memory_space<vmem>>, vector<1x8x32xf32>
    %324 = vector.shape_cast %323 : vector<1x8x32xf32> to vector<8x32xf32>
    %c0_290 = arith.constant 0 : index
    %c126_291 = arith.constant 126 : index
    %325 = vector.load %arg13[%c0_290, %c126_291] : memref<32x392xf32, #tpu.memory_space<vmem>>, vector<32x256xf32>
    %cst_292 = arith.constant dense<0.000000e+00> : vector<8x256xf32>
    %326 = tpu.matmul %324, %325, %cst_292 {dimension_numbers = #tpu.dot_dimension_numbers<[1], [0], [0], [1], [0, 0, 1, 1], [], []>} : vector<8x32xf32>, vector<32x256xf32>, vector<8x256xf32> -> vector<8x256xf32>
    %327 = arith.addf %322, %326 : vector<8x256xf32>
    %c2_293 = arith.constant 2 : index
    %c0_294 = arith.constant 0 : index
    %c0_295 = arith.constant 0 : index
    %328 = vector.load %arg10[%c2_293, %c0_294, %c0_295] : memref<7x8x32xf32, #tpu.memory_space<vmem>>, vector<1x8x32xf32>
    %329 = vector.shape_cast %328 : vector<1x8x32xf32> to vector<8x32xf32>
    %c0_296 = arith.constant 0 : index
    %c127_297 = arith.constant 127 : index
    %330 = vector.load %arg13[%c0_296, %c127_297] : memref<32x392xf32, #tpu.memory_space<vmem>>, vector<32x256xf32>
    %cst_298 = arith.constant dense<0.000000e+00> : vector<8x256xf32>
    %331 = tpu.matmul %329, %330, %cst_298 {dimension_numbers = #tpu.dot_dimension_numbers<[1], [0], [0], [1], [0, 0, 1, 1], [], []>} : vector<8x32xf32>, vector<32x256xf32>, vector<8x256xf32> -> vector<8x256xf32>
    %332 = arith.addf %327, %331 : vector<8x256xf32>
    %c3_299 = arith.constant 3 : index
    %c0_300 = arith.constant 0 : index
    %c0_301 = arith.constant 0 : index
    %333 = vector.load %arg10[%c3_299, %c0_300, %c0_301] : memref<7x8x32xf32, #tpu.memory_space<vmem>>, vector<1x8x32xf32>
    %334 = vector.shape_cast %333 : vector<1x8x32xf32> to vector<8x32xf32>
    %c0_302 = arith.constant 0 : index
    %c128_303 = arith.constant 128 : index
    %335 = vector.load %arg13[%c0_302, %c128_303] : memref<32x392xf32, #tpu.memory_space<vmem>>, vector<32x256xf32>
    %cst_304 = arith.constant dense<0.000000e+00> : vector<8x256xf32>
    %336 = tpu.matmul %334, %335, %cst_304 {dimension_numbers = #tpu.dot_dimension_numbers<[1], [0], [0], [1], [0, 0, 1, 1], [], []>} : vector<8x32xf32>, vector<32x256xf32>, vector<8x256xf32> -> vector<8x256xf32>
    %337 = arith.addf %332, %336 : vector<8x256xf32>
    %c4_305 = arith.constant 4 : index
    %c0_306 = arith.constant 0 : index
    %c0_307 = arith.constant 0 : index
    %338 = vector.load %arg10[%c4_305, %c0_306, %c0_307] : memref<7x8x32xf32, #tpu.memory_space<vmem>>, vector<1x8x32xf32>
    %339 = vector.shape_cast %338 : vector<1x8x32xf32> to vector<8x32xf32>
    %c0_308 = arith.constant 0 : index
    %c129_309 = arith.constant 129 : index
    %340 = vector.load %arg13[%c0_308, %c129_309] : memref<32x392xf32, #tpu.memory_space<vmem>>, vector<32x256xf32>
    %cst_310 = arith.constant dense<0.000000e+00> : vector<8x256xf32>
    %341 = tpu.matmul %339, %340, %cst_310 {dimension_numbers = #tpu.dot_dimension_numbers<[1], [0], [0], [1], [0, 0, 1, 1], [], []>} : vector<8x32xf32>, vector<32x256xf32>, vector<8x256xf32> -> vector<8x256xf32>
    %342 = arith.addf %337, %341 : vector<8x256xf32>
    %c5_311 = arith.constant 5 : index
    %c0_312 = arith.constant 0 : index
    %c0_313 = arith.constant 0 : index
    %343 = vector.load %arg10[%c5_311, %c0_312, %c0_313] : memref<7x8x32xf32, #tpu.memory_space<vmem>>, vector<1x8x32xf32>
    %344 = vector.shape_cast %343 : vector<1x8x32xf32> to vector<8x32xf32>
    %c0_314 = arith.constant 0 : index
    %c130_315 = arith.constant 130 : index
    %345 = vector.load %arg13[%c0_314, %c130_315] : memref<32x392xf32, #tpu.memory_space<vmem>>, vector<32x256xf32>
    %cst_316 = arith.constant dense<0.000000e+00> : vector<8x256xf32>
    %346 = tpu.matmul %344, %345, %cst_316 {dimension_numbers = #tpu.dot_dimension_numbers<[1], [0], [0], [1], [0, 0, 1, 1], [], []>} : vector<8x32xf32>, vector<32x256xf32>, vector<8x256xf32> -> vector<8x256xf32>
    %347 = arith.addf %342, %346 : vector<8x256xf32>
    %c6_317 = arith.constant 6 : index
    %c0_318 = arith.constant 0 : index
    %c0_319 = arith.constant 0 : index
    %348 = vector.load %arg10[%c6_317, %c0_318, %c0_319] : memref<7x8x32xf32, #tpu.memory_space<vmem>>, vector<1x8x32xf32>
    %349 = vector.shape_cast %348 : vector<1x8x32xf32> to vector<8x32xf32>
    %c0_320 = arith.constant 0 : index
    %c131 = arith.constant 131 : index
    %350 = vector.load %arg13[%c0_320, %c131] : memref<32x392xf32, #tpu.memory_space<vmem>>, vector<32x256xf32>
    %cst_321 = arith.constant dense<0.000000e+00> : vector<8x256xf32>
    %351 = tpu.matmul %349, %350, %cst_321 {dimension_numbers = #tpu.dot_dimension_numbers<[1], [0], [0], [1], [0, 0, 1, 1], [], []>} : vector<8x32xf32>, vector<32x256xf32>, vector<8x256xf32> -> vector<8x256xf32>
    %352 = arith.addf %347, %351 : vector<8x256xf32>
    %c0_322 = arith.constant 0 : index
    %c0_323 = arith.constant 0 : index
    %c0_324 = arith.constant 0 : index
    %353 = vector.load %arg11[%c0_322, %c0_323, %c0_324] : memref<2x8x1xf32, #tpu.memory_space<vmem>>, vector<1x8x1xf32>
    %354 = vector.shape_cast %353 : vector<1x8x1xf32> to vector<8x1xf32>
    %355 = vector.broadcast %354 : vector<8x1xf32> to vector<8x256xf32>
    %356 = arith.mulf %352, %355 : vector<8x256xf32>
    %c1_325 = arith.constant 1 : index
    %c0_326 = arith.constant 0 : index
    %c0_327 = arith.constant 0 : index
    %357 = vector.load %arg11[%c1_325, %c0_326, %c0_327] : memref<2x8x1xf32, #tpu.memory_space<vmem>>, vector<1x8x1xf32>
    %358 = vector.shape_cast %357 : vector<1x8x1xf32> to vector<8x1xf32>
    %359 = vector.broadcast %358 : vector<8x1xf32> to vector<8x256xf32>
    %360 = arith.addf %356, %359 : vector<8x256xf32>
    %361 = math.tanh %360 : vector<8x256xf32>
    %362 = vector.extract_strided_slice %361 {offsets = [0, 0], sizes = [1, 256], strides = [1, 1]} : vector<8x256xf32> to vector<1x256xf32>
    %c0_328 = arith.constant 0 : index
    %c0_329 = arith.constant 0 : index
    %c0_330 = arith.constant 0 : index
    %363 = vector.load %arg12[%c0_328, %c0_329, %c0_330] : memref<1x1x256xf32, #tpu.memory_space<vmem>>, vector<1x1x256xf32>
    %364 = vector.shape_cast %363 : vector<1x1x256xf32> to vector<1x256xf32>
    %365 = vector.shape_cast %362 : vector<1x256xf32> to vector<1x1x256xf32>
    tpu.vector_store %arg12[%c0_328, %c0_329, %c0_330], %365 {strides = array<i32>} : memref<1x1x256xf32, #tpu.memory_space<vmem>>, vector<1x1x256xf32>,
    return
  }
  func.func @transform_0(%arg0: i32) -> (i32, i32, i32) {
    %c0_i32 = arith.constant 0 : i32
    %c0_i32_0 = arith.constant 0 : i32
    %c0_i32_1 = arith.constant 0 : i32
    return %arg0, %c0_i32, %c0_i32_0 : i32, i32, i32
  }
  func.func @transform_1(%arg0: i32) -> (i32, i32) {
    %c0_i32 = arith.constant 0 : i32
    %c0_i32_0 = arith.constant 0 : i32
    %c0_i32_1 = arith.constant 0 : i32
    return %c0_i32, %c0_i32_0 : i32, i32
  }
  func.func @transform_2(%arg0: i32) -> (i32, i32, i32) {
    %c0_i32 = arith.constant 0 : i32
    %c0_i32_0 = arith.constant 0 : i32
    %c0_i32_1 = arith.constant 0 : i32
    %c0_i32_2 = arith.constant 0 : i32
    return %c0_i32, %c0_i32_0, %c0_i32_1 : i32, i32, i32
  }
  func.func @transform_3(%arg0: i32) -> (i32, i32, i32) {
    %c0_i32 = arith.constant 0 : i32
    %c0_i32_0 = arith.constant 0 : i32
    %c0_i32_1 = arith.constant 0 : i32
    %c0_i32_2 = arith.constant 0 : i32
    return %c0_i32, %c0_i32_0, %c0_i32_1 : i32, i32, i32
  }
  func.func @transform_4(%arg0: i32) -> (i32, i32, i32) {
    %c0_i32 = arith.constant 0 : i32
    %c0_i32_0 = arith.constant 0 : i32
    %c0_i32_1 = arith.constant 0 : i32
    %c0_i32_2 = arith.constant 0 : i32
    return %c0_i32, %c0_i32_0, %c0_i32_1 : i32, i32, i32
  }
  func.func @transform_5(%arg0: i32) -> (i32, i32, i32) {
    %c0_i32 = arith.constant 0 : i32
    %c0_i32_0 = arith.constant 0 : i32
    %c0_i32_1 = arith.constant 0 : i32
    %c0_i32_2 = arith.constant 0 : i32
    return %c0_i32, %c0_i32_0, %c0_i32_1 : i32, i32, i32
  }
  func.func @transform_6(%arg0: i32) -> (i32, i32, i32) {
    %c0_i32 = arith.constant 0 : i32
    %c0_i32_0 = arith.constant 0 : i32
    %c0_i32_1 = arith.constant 0 : i32
    %c0_i32_2 = arith.constant 0 : i32
    return %c0_i32, %c0_i32_0, %c0_i32_1 : i32, i32, i32
  }
  func.func @transform_7(%arg0: i32) -> (i32, i32) {
    %c0_i32 = arith.constant 0 : i32
    %c0_i32_0 = arith.constant 0 : i32
    %c0_i32_1 = arith.constant 0 : i32
    return %c0_i32, %c0_i32_0 : i32, i32
  }
  func.func @transform_8(%arg0: i32) -> (i32, i32) {
    %c0_i32 = arith.constant 0 : i32
    %c0_i32_0 = arith.constant 0 : i32
    %c0_i32_1 = arith.constant 0 : i32
    return %c0_i32, %c0_i32_0 : i32, i32
  }
  func.func @transform_9(%arg0: i32) -> (i32, i32, i32) {
    %c0_i32 = arith.constant 0 : i32
    %c0_i32_0 = arith.constant 0 : i32
    %c0_i32_1 = arith.constant 0 : i32
    %c0_i32_2 = arith.constant 0 : i32
    return %c0_i32, %c0_i32_0, %c0_i32_1 : i32, i32, i32
  }
  func.func @transform_10(%arg0: i32) -> (i32, i32, i32) {
    %c0_i32 = arith.constant 0 : i32
    %c0_i32_0 = arith.constant 0 : i32
    %c0_i32_1 = arith.constant 0 : i32
    %c0_i32_2 = arith.constant 0 : i32
    return %c0_i32, %c0_i32_0, %c0_i32_1 : i32, i32, i32
  }
  func.func @transform_11(%arg0: i32) -> (i32, i32, i32) {
    %c0_i32 = arith.constant 0 : i32
    %c0_i32_0 = arith.constant 0 : i32
    %c0_i32_1 = arith.constant 0 : i32
    return %arg0, %c0_i32, %c0_i32_0 : i32, i32, i32
  }
}

</mosaic_0001>

<bundles_post_ra>
// kernel: tpu_custom_call.1
= control target key start
LH: loop header
LB: loop body
LE: loop exit
PB: predicated region body
PF: predicated region fallthrough
CT: control target
= control target key end

     0   :  { %s10191_s0 = inlined_call_operand.vmem [shape: f32[2,32,16], index: 0, kind: input, shape index: {}]   ;;  %s10192_s1 = inlined_call_operand.vmem [shape: f32[32,96], index: 1, kind: input, shape index: {}]   ;;  %s10193_s2 = inlined_call_operand.vmem [shape: f32[2,32,1], index: 2, kind: input, shape index: {}]   ;;  %s10194_s3 = inlined_call_operand.vmem [shape: f32[8,32,96], index: 3, kind: input, shape index: {}]   ;;  %s10195_s4 = inlined_call_operand.vmem [shape: f32[16,32,1], index: 4, kind: input, shape index: {}]   ;;  %s10196_s5 = inlined_call_operand.vmem [shape: f32[8,32,64], index: 5, kind: input, shape index: {}]   ;;  %s10197_s6 = inlined_call_operand.vmem [shape: f32[8,32,1], index: 6, kind: input, shape index: {}]   ;;  %s10198_s7 = inlined_call_operand.vmem [shape: f32[128,256], index: 7, kind: input, shape index: {}]   ;;  %s10199_s8 = inlined_call_operand.hbm [shape: f32[128,256], index: 8, kind: input, shape index: {}]   ;;  %s10200_s9 = inlined_call_operand.vmem [shape: f32[7,8,32], index: 9, kind: input, shape index: {}]   ;;  %s10201_s10 = inlined_call_operand.vmem [shape: f32[2,8,1], index: 10, kind: input, shape index: {}]   ;;  %s10202_s11 = inlined_call_operand.hbm [shape: f32[2,1,256], index: 11, kind: output, shape index: {}]  }
   0x1   :  { %10218 = sst [smem:[#allocation10_spill]] %s10191_s0 }
   0x2   :  { %10219 = sst [smem:[#allocation11_spill]] %s10192_s1 }
   0x3   :  { %16 = vsyncpa [#allocation4], 0 }
   0x4   :  { %17 = vsyncpa [#allocation5], 0 }
   0x5   :  { %19 = vsyncpa [#allocation5 + $0x1], 0  ;;  %s8675_s17 = smov 0   ;;  %s8677_s18 = smov 0  }
   0x6   :  { %s8679_s19 = smov 0   ;;  %s8681_s20 = smov 0  }
   0x7 LB: > { %s8696_s21 = sadd.s32 4294967295, %s8595_s20   ;;  %s5923_s22 = sadd.s32 4294967294, %s8595_s20   ;;  %s8595_s20 = sphi %s8681_s20, %s10242_s20   ;;  %s8591_s19 = sphi %s8679_s19, %s10241_s19   ;;  %s8587_s18 = sphi %s8677_s18, %s10240_s18   ;;  %s8583_s17 = sphi %s8675_s17, %s10239_s17  }
   0x8   : > { %s8700_s23 = sadd.s32 1, %s8595_s20   ;;  %s268_s24 = sadd.s32 1, %s8591_s19 }
   0x9   : > { %s265_s25 = ssub.s32 %s8595_s20, %s8700_s23  ;;  %p278_p0 = scmp.ne.s32.totalorder %s8591_s19, %s8587_s18 }
   0xa   : > { %p266_p1 = scmp.eq.s32.totalorder %s265_s25, 0  ;;  %p279_p2 = scmp.eq.s32.totalorder %s8696_s21, 1 }
   0xb   : > { %p284_p3 = scmp.ne.s32.totalorder %s8587_s18, %s8583_s17  ;;  %p285_p4 = scmp.eq.s32.totalorder %s5923_s22, 1 }
   0xc   : > { %s8711_s26 = scalar_select %p266_p1, %s8591_s19, %s268_s24  }
   0xd   : > { %p8713_p5 = por %p279_p2, %p278_p0  ;;  %p8717_p6 = por %p285_p4, %p284_p3 }
   0xe   : > { %10220 = sst [smem:[#allocation9_spill]] %s8711_s26  ;;  %p5924_p7 = scmp.ge.s32.totalorder %s8595_s20, 1 }
   0xf   : > { %s10221_s27 = scalar_select %p8713_p5, 1, 0 }
  0x10   : > { %s10222_s28 = scalar_select %p8717_p6, 1, 0 }
  0x11   : > { %p292_p8 = scmp.lt.s32.totalorder %s8595_s20, 3  ;;  %p10203_p9 = scmp.eq.s32.totalorder %s8696_s21, 0 }
  0x12   : > { %s8597_s30 = smov [#allocation3]   ;;  %s8501_s16 = scalar_lea.hbm %s10199_s8, 4096 }
  0x13   : > { %p8724_p10 = pnand %p5924_p7, %p292_p8  ;;  %s325_s12 = sshll.u32 %s8597_s30, 4  ;;  %s326_s12 = int_to_ptr.vmem [resolvable:$true] %s325_s12 }
  0x14   : > { %p8502_p13 = scmp.ne.s32.totalorder %s10199_s8, %s8501_s16  ;;  %p8508_p3 = scmp.lt.u32.totalorder %s8501_s16, %s10199_s8 }
  0x15   : > { %s10223_s29 = scalar_select %p8724_p10, 1, 0 }
  0x16   : > { %p7581_p11 = pneg %p8724_p10 }
  0x18   : > { %p8732_p12 = pnand %p10203_p9, %p7581_p11 }
  0x1a   : > { %p8503_p0 = pneg %p8732_p12 }
  0x1c   : > { %p8504_p1 = pnand %p8503_p0, %p8502_p13 }
  0x1e   : > { %p8505_p2 = pneg %p8504_p1 }
  0x20   : > { %p8510_p4 = pnand %p8508_p3, %p8505_p2 }
  0x22   : > { %8513 = shalt.err (!%p8510_p4)
}
  0x23   : > { %s8514_s26 = scalar_lea.vmem %s326_s12, 4096  ;;  %p8522_p9 = scmp.lt.s32.totalorder %s326_s12, %s326_s12 }
  0x24   : > { %p8515_p7 = scmp.ne.s32.totalorder %s326_s12, %s8514_s26  ;;  %p8523_p6 = scmp.lt.s32.totalorder %s8514_s26, %s8514_s26 }
  0x26   : > { %p8517_p8 = pnand %p8515_p7, %p8503_p0  ;;  %p8524_p5 = por %p8523_p6, %p8522_p9 }
  0x28   : > { %p8518_p11 = pneg %p8517_p8 }
  0x2a   : > { %p8525_p10 = pnand %p8524_p5, %p8518_p11 }
  0x2c   : > { %8528 = shalt.err (!%p8525_p10)
}
  0x2d   : > { %s8598_s14 = smov 256   ;;  %s8599_s15 = smov 16  }
  0x2e   : > { %7584 = dma.hbm_to_vmem [thread:$0]  (!%p8732_p12), %s10199_s8, 4096, %s326_s12, [#allocation4], %s8598_s14, %s8598_s14, %s8599_s15  }
  0x2f   : > { %p10225_p13 = scmp.ne.s32.totalorder %s10223_s29, 0 }
  0x30   : > { %p10226_p1 = scmp.eq.s32.totalorder (!%p10225_p13), %s8696_s21, 0 }
  0x31   : > { %355 = sbr.rel (%p10225_p13) target bundleno = 7199 (0x1c1f), region = 64 }
  0x38   : > { %8574 = dma.done.wait (%p10226_p1), [#allocation4], 4096   ;;  %p10227_p0 = pmov %p10226_p1 }
  0x39   : > { %p395_p5 = scmp.lt.s32.totalorder %s8696_s21, 1  ;;  %v8600_v0 = vmov 0.0   ;;  %s10228_s0 = sld [smem:[#allocation10_spill]]  ;;  %vm421_vm0 = vcmask 130048   ;;  %vm503_vm1 = vcmask 7168   ;;  %vm520_vm2 = vcmask 785408  }
  0x3a   : > { %8576 = vsyncadd (%p10227_p0), [#allocation4], 4294963200  ;;  %401 = vst [vmem:[#allocation2 + $0x8] sm:$0xff] %v8600_v0  ;;  %s10210_s25 = smov 127   ;;  %s10208_s30 = smov 126   ;;  %v431_v38 = vld [vmem:[%s10193_s2 + $0x8] sm:$0xff] }
  0x3b   : > { %406 = vst [vmem:[#allocation2 + $0x28] sm:$0xff] %v8600_v0  ;;  %400 = vst [vmem:[#allocation2] sm:$0xff] %v8600_v0  ;;  %s396_s26 = scalar_select %p395_p5, %s8696_s21, 1  ;;  %v430_v39 = vld [vmem:[%s10193_s2] sm:$0xff]  ;;  %v8604_v40 = vmov 0   ;;  %v5933_v42 = vld [vmem:[%s10193_s2 + $0x28] sm:$0xff] }
  0x3c   : > { %410 = vst [vmem:[#allocation2 + $0x48] sm:$0xff] %v8600_v0  ;;  %414 = vst [vmem:[#allocation2 + $0x68] sm:$0xff] %v8600_v0  ;;  %s10206_s14 = smov 1   ;;  %s10229_s1 = sld [smem:[#allocation11_spill]]  ;;  %7702 = vset.pattern.permute.xlu1 %v8604_v40  ;;  %7701 = vset.pattern.permute.xlu0 %v8604_v40  ;;  %v5932_v41 = vld [vmem:[%s10193_s2 + $0x20] sm:$0xff]  ;;  %v432_v43 = vld [vmem:[%s10193_s2 + $0x10] sm:$0xff] }
  0x3d   : > { %s6191_s29 = sshll.u32 %s396_s26, 5  ;;  %v433_v44 = vld [vmem:[%s10193_s2 + $0x18] sm:$0xff]  ;;  %v5934_v45 = vld [vmem:[%s10193_s2 + $0x30] sm:$0xff]  ;;  %s10231_s12 = smov 1   ;;  %vm1275_vm15 = vcmask 15360  }
  0x3e   : > { %v5935_v46 = vld [vmem:[%s10193_s2 + $0x38] sm:$0xff]  ;;  %s8605_s13 = smov 124   ;;  %s10235_s26 = smov 2  }
  0x3f   : > { %s399_s16 = scalar_lea.vmem %s10228_s0, %s6191_s29  ;;  %s10230_s29 = smov 126  }
  0x40   : > { %v417_v1 = vld [vmem:[%s399_s16] sm:$0xff]  ;;  %v418_v2 = vld [vmem:[%s399_s16 + $0x8] sm:$0xff]  ;;  %v419_v3 = vld [vmem:[%s399_s16 + $0x10] sm:$0xff]  ;;  %s8611_s15 = smov 3   ;;  %p10236_p9 = scmp.ne.s32.totalorder %s10221_s27, 0 }
  0x41   : > { %422 = vst.msk [vmem:[#allocation2 + $0x8] sm:$0xff] %vm421_vm0, %v417_v1  ;;  %423 = vst.msk [vmem:[#allocation2 + $0x28] sm:$0xff] %vm421_vm0, %v418_v2  ;;  %v420_v4 = vld [vmem:[%s399_s16 + $0x18] sm:$0xff]  ;;  %s10212_s16 = smov 2  }
  0x42   : > { %424 = vst.msk [vmem:[#allocation2 + $0x48] sm:$0xff] %vm421_vm0, %v419_v3  ;;  %425 = vst.msk [vmem:[#allocation2 + $0x68] sm:$0xff] %vm421_vm0, %v420_v4  ;;  %v426_v25 = vld [vmem:[%s10229_s1] sm:$0xff]  ;;  %v427_v63 = vld [vmem:[%s10229_s1 + $0x8] sm:$0xff] }
  0x43   : > { %6509 = vmatprep.mubr.msk.f32.mxu0 %vm520_vm2, %v426_v25  ;;  %v428_v1 = vld [vmem:[%s10229_s1 + $0x10] sm:$0xff]  ;;  %v429_v2 = vld [vmem:[%s10229_s1 + $0x18] sm:$0xff]  ;;  %s392_s1 = sand.u32 1, %s8587_s18  }
  0x44   : > { %s5838_s22 = scalar_lea.sflag [#allocation5], %s392_s1 }
  0x48   : > { %v440_v5 = vld [vmem:[#allocation2 + $0x8] sm:$0xff] }
  0x49   : > { %v442_v6 = vld [vmem:[#allocation2 + $0x28] sm:$0xff]  ;;  %v7661_v12 = vpack.i.bf16 %v440_v5, %v8600_v0 }
  0x4a   : > { %v444_v7 = vld [vmem:[#allocation2 + $0x48] sm:$0xff]  ;;  %v7641_v8 = vpack.i.bf16 %v442_v6, %v440_v5  ;;  %v7666_v11 = vpack.i.bf16 %v442_v6, %v8600_v0 }
  0x4b   : > { %v446_v9 = vld [vmem:[#allocation2 + $0x68] sm:$0xff]  ;;  %v7671_v14 = vpack.i.bf16 %v444_v7, %v8600_v0 }
  0x4c   : > { %7642 = vrot.lane.b32.xlu0 %v7641_v8, %s10210_s25  ;;  %v7646_v10 = vpack.i.bf16 %v446_v9, %v444_v7  ;;  %7652 = vrot.lane.b32.xlu1 %v7641_v8, %s10208_s30  ;;  %v7676_v13 = vpack.i.bf16 %v446_v9, %v8600_v0 }
  0x50   : > { %7647 = vrot.lane.b32.xlu0 %v7646_v10, %s10210_s25  ;;  %7657 = vrot.lane.b32.xlu1 %v7646_v10, %s10208_s30  ;;  %s8607_s30 = smov 120  }
  0x54   : > { %7667 = vrot.lane.b32.xlu1 %v7666_v11, %s10206_s14  ;;  %7662 = vrot.lane.b32.xlu0 %v7661_v12, %s10206_s14 }
  0x58   : > { %7677 = vrot.lane.b32.xlu1 %v7676_v13, %s10206_s14  ;;  %7672 = vrot.lane.b32.xlu0 %v7671_v14, %s10206_s14 }
  0xbe   : > { %v7643_v15 = vpop.permute.xlu0 %7642  ;;  %v7653_v16 = vpop.permute.xlu1 %7652 }
  0xbf   : > { %7682 = vrot.lane.b32.xlu0 %v7643_v15, %s10206_s14 }
  0xc2   : > { %v7648_v17 = vpop.permute.xlu0 %7647  ;;  %v7658_v18 = vpop.permute.xlu1 %7657 }
  0xc3   : > { %7687 = vrot.lane.b32.xlu1 %v7648_v17, %s10206_s14  ;;  %7692 = vrot.lane.b32.xlu0 %v7653_v16, %s10206_s14 }
  0xc6   : > { %v7668_v19 = vpop.permute.xlu1 %7667  ;;  %v7663_v20 = vpop.permute.xlu0 %7662 }
  0xc7   : > { %v7670_v21 = vunpack.i.h.bf16 %v7668_v19  ;;  %v7669_v22 = vunpack.i.l.bf16 %v7668_v19  ;;  %v7665_v23 = vunpack.i.h.bf16 %v7663_v20  ;;  %v7664_v24 = vunpack.i.l.bf16 %v7663_v20  ;;  %7697 = vrot.lane.b32.xlu1 %v7658_v18, %s10206_s14  ;;  %620 = vperm.xlu0 %7701, %v430_v39   ;;  %s10214_s14 = smov 4  }
  0xc9   : > { %v504_v26 = vsel %vm503_vm1, %v7664_v24, %v7665_v23  ;;  %v505_v27 = vsel %vm503_vm1, %v7669_v22, %v7670_v21 }
  0xca   : > { %v7678_v28 = vpop.permute.xlu1 %7677  ;;  %v7673_v29 = vpop.permute.xlu0 %7672  ;;  %v7023_v30 = vpack.c.bf16 %v505_v27, %v504_v26 }
  0xcb   : > { %v7680_v31 = vunpack.i.h.bf16 %v7678_v28  ;;  %v7679_v32 = vunpack.i.l.bf16 %v7678_v28  ;;  %v7675_v33 = vunpack.i.h.bf16 %v7673_v29  ;;  %v7674_v34 = vunpack.i.l.bf16 %v7673_v29  ;;  %625 = vperm.xlu1 %7702, %v431_v38   ;;  %649 = vperm.xlu0 %7701, %v5933_v42  }
  0xcc   : > { %7024 = vmatprep.subr.bf16.mxu0 %v7023_v30 }
  0xcd   : > { %7026 = vmatpush3.bf16.msra.mxu0 %v7023_v30  ;;  %v506_v35 = vsel %vm503_vm1, %v7674_v34, %v7675_v33  ;;  %v507_v36 = vsel %vm503_vm1, %v7679_v32, %v7680_v31 }
  0xce   : > { %v7027_v37 = vpack.c.bf16 %v507_v36, %v506_v35 }
  0xcf   : > { %644 = vperm.xlu1 %7702, %v5932_v41   ;;  %635 = vperm.xlu0 %7701, %v433_v44  }
  0xd0   : > { %7028 = vmatprep.subr.bf16.mxu0 %v7027_v37 }
  0xd1   : > { %7030 = vmatpush3.bf16.msra.mxu0 %v7027_v37 }
  0xd3   : > { %630 = vperm.xlu1 %7702, %v432_v43   ;;  %659 = vperm.xlu0 %7701, %v5935_v46   ;;  %v682_v46 = vld [vmem:[%s10194_s3] sm:$0xff] }
  0xd4   : > { %6539 = vmatprep.mubr.msk.f32.mxu1 %vm520_vm2, %v682_v46 }
  0xd7   : > { %654 = vperm.xlu1 %7702, %v5934_v45  }
 0x131   : > { %v7683_v47 = vpop.permute.xlu0 %7682 }
 0x132   : > { %v7685_v48 = vunpack.i.h.bf16 %v7683_v47  ;;  %v7684_v49 = vunpack.i.l.bf16 %v7683_v47  ;;  %v686_v47 = vld [vmem:[%s10195_s4] sm:$0xff] }
 0x134   : > { %v7031_v50 = vpack.c.bf16 %v7685_v48, %v7684_v49 }
 0x135   : > { %v7688_v51 = vpop.permute.xlu1 %7687  ;;  %v7693_v52 = vpop.permute.xlu0 %7692 }
 0x136   : > { %v7690_v53 = vunpack.i.h.bf16 %v7688_v51  ;;  %v7689_v54 = vunpack.i.l.bf16 %v7688_v51  ;;  %7032 = vmatprep.subr.bf16.mxu0 %v7031_v50  ;;  %v7695_v55 = vunpack.i.h.bf16 %v7693_v52  ;;  %v7694_v56 = vunpack.i.l.bf16 %v7693_v52 }
 0x137   : > { %7034 = vmatpush3.bf16.msra.mxu0 %v7031_v50 }
 0x138   : > { %v7035_v57 = vpack.c.bf16 %v7690_v53, %v7689_v54  ;;  %v7039_v58 = vpack.c.bf16 %v7695_v55, %v7694_v56  ;;  %v5940_v54 = vld [vmem:[%s10195_s4 + $0x20] sm:$0xff]  ;;  %v687_v55 = vld [vmem:[%s10195_s4 + $0x8] sm:$0xff] }
 0x139   : > { %v7698_v59 = vpop.permute.xlu1 %7697 }
 0x13a   : > { %7036 = vmatprep.subr.bf16.mxu0 %v7035_v57  ;;  %v7700_v60 = vunpack.i.h.bf16 %v7698_v59  ;;  %v7699_v61 = vunpack.i.l.bf16 %v7698_v59 }
 0x13b   : > { %7038 = vmatpush3.bf16.msra.mxu0 %v7035_v57 }
 0x13c   : > { %7040 = vmatprep.subr.bf16.mxu0 %v7039_v58  ;;  %v7043_v62 = vpack.c.bf16 %v7700_v60, %v7699_v61 }
 0x13f   : > { %7042 = vmatpush3.bf16.msra.mxu0 %v7039_v58 }
 0x140   : > { %7044 = vmatprep.subr.bf16.mxu0 %v7043_v62 }
 0x143   : > { %7046 = vmatpush3.bf16.msra.mxu0 %v7043_v62 }
 0x146   : > { %6510 = vmatmul.mubr.msk.f32.vlgmr.msra.gmra.mrb[0].mxu0 %vm520_vm2, %v427_v63  ;;  %v621_v3 = vpop.permute.xlu0 %620 }
 0x147   : > { %6512 = vmatprep.mubr.msk.f32.mxu0 %vm520_vm2, %v428_v1  ;;  %v688_v1 = vld [vmem:[%s10195_s4 + $0x10] sm:$0xff] }
 0x14a   : > { %6513 = vmatmul.mubr.msk.f32.gmra.mrb[2].mxu0 %vm520_vm2, %v429_v2  ;;  %v626_v4 = vpop.permute.xlu1 %625  ;;  %v650_v5 = vpop.permute.xlu0 %649  ;;  %v5941_v2 = vld [vmem:[%s10195_s4 + $0x28] sm:$0xff] }
 0x14e   : > { %v645_v6 = vpop.permute.xlu1 %644  ;;  %v636_v7 = vpop.permute.xlu0 %635 }
 0x152   : > { %v631_v9 = vpop.permute.xlu1 %630  ;;  %v660_v19 = vpop.permute.xlu0 %659 }
 0x156   : > { %v655_v22 = vpop.permute.xlu1 %654 }
 0x219   : > { %v6511_v8 = vpop.f32.mrb[0].mxu0 }
 0x21a   : > { %v639_v10 = vmul.f32 %v6511_v8, %v626_v4  ;;  %v599_v11 = vpop.f32.mrb[1].mxu0  ;;  %v5943_v8 = vld [vmem:[%s10195_s4 + $0x38] sm:$0xff] }
 0x21b   : > { %v638_v12 = vmul.f32 %v621_v3, %v599_v11 }
 0x21c   : > { %v663_v13 = vadd.f32 %v650_v5, %v639_v10 }
 0x21d   : > { %v662_v14 = vadd.f32 %v645_v6, %v638_v12  ;;  %v6514_v15 = vpop.f32.mrb[2].mxu0  ;;  %v5942_v6 = vld [vmem:[%s10195_s4 + $0x30] sm:$0xff] }
 0x21e   : > { %vm667_vm3 = vcmp.ge.f32.partialorder %v663_v13, 0.0  ;;  %v671_v16 = vmul.f32 0.2, %v663_v13  ;;  %v641_v17 = vmul.f32 %v6514_v15, %v636_v7  ;;  %v609_v18 = vpop.f32.mrb[3].mxu0  ;;  %v689_v7 = vld [vmem:[%s10195_s4 + $0x18] sm:$0xff] }
 0x21f   : > { %vm666_vm4 = vcmp.ge.f32.partialorder %v662_v14, 0.0  ;;  %v670_v20 = vmul.f32 0.2, %v662_v14  ;;  %v640_v21 = vmul.f32 %v631_v9, %v609_v18 }
 0x220   : > { %v8832_v23 = vsel %vm667_vm3, %v663_v13, %v671_v16  ;;  %v665_v24 = vadd.f32 %v660_v19, %v641_v17 }
 0x221   : > { %679 = vst.msk [vmem:[#allocation2 + $0x28] sm:$0xff] %vm421_vm0, %v8832_v23  ;;  %v8836_v25 = vsel %vm666_vm4, %v662_v14, %v670_v20  ;;  %v664_v26 = vadd.f32 %v655_v22, %v640_v21 }
 0x222   : > { %678 = vst.msk [vmem:[#allocation2 + $0x8] sm:$0xff] %vm421_vm0, %v8836_v25  ;;  %vm669_vm5 = vcmp.ge.f32.partialorder %v665_v24, 0.0  ;;  %v673_v27 = vmul.f32 0.2, %v665_v24 }
 0x223   : > { %vm668_vm6 = vcmp.ge.f32.partialorder %v664_v26, 0.0  ;;  %v672_v28 = vmul.f32 0.2, %v664_v26 }
 0x224   : > { %v8840_v29 = vsel %vm669_vm5, %v665_v24, %v673_v27  ;;  %v683_v27 = vld [vmem:[%s10194_s3 + $0x8] sm:$0xff] }
 0x225   : > { %681 = vst.msk [vmem:[#allocation2 + $0x68] sm:$0xff] %vm421_vm0, %v8840_v29  ;;  %v8844_v30 = vsel %vm668_vm6, %v664_v26, %v672_v28  ;;  %v684_v28 = vld [vmem:[%s10194_s3 + $0x10] sm:$0xff] }
 0x226   : > { %680 = vst.msk [vmem:[#allocation2 + $0x48] sm:$0xff] %vm421_vm0, %v8844_v30 }
 0x228   : > { %v698_v31 = vld [vmem:[#allocation2 + $0x28] sm:$0xff] }
 0x229   : > { %v696_v32 = vld [vmem:[#allocation2 + $0x8] sm:$0xff]  ;;  %v7728_v39 = vpack.i.bf16 %v698_v31, %v8600_v0 }
 0x22a   : > { %v7703_v33 = vpack.i.bf16 %v698_v31, %v696_v32  ;;  %v7723_v37 = vpack.i.bf16 %v696_v32, %v8600_v0  ;;  %v685_v31 = vld [vmem:[%s10194_s3 + $0x18] sm:$0xff] }
 0x22c   : > { %7704 = vrot.lane.b32.xlu1 %v7703_v33, %s10210_s25  ;;  %v702_v34 = vld [vmem:[#allocation2 + $0x68] sm:$0xff] }
 0x22d   : > { %v700_v35 = vld [vmem:[#allocation2 + $0x48] sm:$0xff]  ;;  %v7738_v40 = vpack.i.bf16 %v702_v34, %v8600_v0 }
 0x22e   : > { %v7708_v36 = vpack.i.bf16 %v702_v34, %v700_v35  ;;  %v7733_v38 = vpack.i.bf16 %v700_v35, %v8600_v0 }
 0x230   : > { %7714 = vrot.lane.b32.xlu1 %v7703_v33, %s10230_s29  ;;  %7709 = vrot.lane.b32.xlu0 %v7708_v36, %s10210_s25 }
 0x234   : > { %7724 = vrot.lane.b32.xlu1 %v7723_v37, %s10231_s12  ;;  %7719 = vrot.lane.b32.xlu0 %v7708_v36, %s10230_s29 }
 0x238   : > { %7734 = vrot.lane.b32.xlu1 %v7733_v38, %s10231_s12  ;;  %7729 = vrot.lane.b32.xlu0 %v7728_v39, %s10231_s12 }
 0x23c   : > { %7739 = vrot.lane.b32.xlu0 %v7738_v40, %s10231_s12 }
 0x29e   : > { %v7705_v41 = vpop.permute.xlu1 %7704 }
 0x29f   : > { %7744 = vrot.lane.b32.xlu1 %v7705_v41, %s10231_s12 }
 0x2a2   : > { %v7715_v42 = vpop.permute.xlu1 %7714  ;;  %v7710_v43 = vpop.permute.xlu0 %7709 }
 0x2a3   : > { %7754 = vrot.lane.b32.xlu1 %v7715_v42, %s10231_s12  ;;  %7749 = vrot.lane.b32.xlu0 %v7710_v43, %s10231_s12 }
 0x2a6   : > { %v7725_v44 = vpop.permute.xlu1 %7724  ;;  %v7720_v45 = vpop.permute.xlu0 %7719 }
 0x2a7   : > { %v7727_v48 = vunpack.i.h.bf16 %v7725_v44  ;;  %v7726_v49 = vunpack.i.l.bf16 %v7725_v44  ;;  %874 = vperm.xlu1 %7702, %v686_v47   ;;  %7759 = vrot.lane.b32.xlu0 %v7720_v45, %s10231_s12 }
 0x2a9   : > { %v759_v58 = vsel %vm503_vm1, %v7726_v49, %v7727_v48 }
 0x2aa   : > { %v7735_v50 = vpop.permute.xlu1 %7734  ;;  %v7730_v51 = vpop.permute.xlu0 %7729 }
 0x2ab   : > { %v7732_v52 = vunpack.i.h.bf16 %v7730_v51  ;;  %v7731_v53 = vunpack.i.l.bf16 %v7730_v51  ;;  %v7737_v56 = vunpack.i.h.bf16 %v7735_v50  ;;  %v7736_v57 = vunpack.i.l.bf16 %v7735_v50  ;;  %898 = vperm.xlu1 %7702, %v5940_v54   ;;  %879 = vperm.xlu0 %7701, %v687_v55  }
 0x2ad   : > { %v760_v59 = vsel %vm503_vm1, %v7731_v53, %v7732_v52  ;;  %v761_v3 = vsel %vm503_vm1, %v7736_v57, %v7737_v56 }
 0x2ae   : > { %v7740_v60 = vpop.permute.xlu0 %7739  ;;  %v7047_v61 = vpack.c.bf16 %v760_v59, %v759_v58 }
 0x2af   : > { %v7742_v62 = vunpack.i.h.bf16 %v7740_v60  ;;  %v7741_v63 = vunpack.i.l.bf16 %v7740_v60  ;;  %884 = vperm.xlu1 %7702, %v688_v1   ;;  %903 = vperm.xlu0 %7701, %v5941_v2  }
 0x2b0   : > { %7048 = vmatprep.subr.bf16.mxu1 %v7047_v61 }
 0x2b1   : > { %7050 = vmatpush3.bf16.msra.mxu1 %v7047_v61  ;;  %v762_v4 = vsel %vm503_vm1, %v7741_v63, %v7742_v62 }
 0x2b2   : > { %v7051_v5 = vpack.c.bf16 %v762_v4, %v761_v3 }
 0x2b3   : > { %908 = vperm.xlu1 %7702, %v5942_v6   ;;  %889 = vperm.xlu0 %7701, %v689_v7  }
 0x2b4   : > { %7052 = vmatprep.subr.bf16.mxu1 %v7051_v5 }
 0x2b5   : > { %7054 = vmatpush3.bf16.msra.mxu1 %v7051_v5 }
 0x2b7   : > { %913 = vperm.xlu0 %7701, %v5943_v8  }
 0x311   : > { %v7745_v9 = vpop.permute.xlu1 %7744 }
 0x312   : > { %v7747_v10 = vunpack.i.h.bf16 %v7745_v9  ;;  %v7746_v11 = vunpack.i.l.bf16 %v7745_v9 }
 0x314   : > { %v7055_v12 = vpack.c.bf16 %v7747_v10, %v7746_v11 }
 0x315   : > { %v7755_v13 = vpop.permute.xlu1 %7754  ;;  %v7750_v14 = vpop.permute.xlu0 %7749 }
 0x316   : > { %v7757_v15 = vunpack.i.h.bf16 %v7755_v13  ;;  %v7756_v16 = vunpack.i.l.bf16 %v7755_v13  ;;  %v7752_v17 = vunpack.i.h.bf16 %v7750_v14  ;;  %v7751_v18 = vunpack.i.l.bf16 %v7750_v14  ;;  %7056 = vmatprep.subr.bf16.mxu1 %v7055_v12  ;;  %v5952_v13 = vld [vmem:[%s10195_s4 + $0x40] sm:$0xff] }
 0x317   : > { %7058 = vmatpush3.bf16.msra.mxu1 %v7055_v12  ;;  %v5948_v12 = vld [vmem:[%s10194_s3 + $0x20] sm:$0xff] }
 0x318   : > { %v7059_v19 = vpack.c.bf16 %v7752_v17, %v7751_v18  ;;  %v7063_v24 = vpack.c.bf16 %v7757_v15, %v7756_v16  ;;  %6569 = vmatprep.mubr.msk.f32.mxu0 %vm520_vm2, %v5948_v12 }
 0x319   : > { %v7760_v20 = vpop.permute.xlu0 %7759 }
 0x31a   : > { %v7762_v21 = vunpack.i.h.bf16 %v7760_v20  ;;  %v7761_v22 = vunpack.i.l.bf16 %v7760_v20  ;;  %7060 = vmatprep.subr.bf16.mxu1 %v7059_v19  ;;  %v5956_v20 = vld [vmem:[%s10195_s4 + $0x60] sm:$0xff] }
 0x31b   : > { %7062 = vmatpush3.bf16.msra.mxu1 %v7059_v19 }
 0x31c   : > { %7064 = vmatprep.subr.bf16.mxu1 %v7063_v24  ;;  %v7067_v26 = vpack.c.bf16 %v7762_v21, %v7761_v22  ;;  %v5953_v21 = vld [vmem:[%s10195_s4 + $0x48] sm:$0xff] }
 0x31f   : > { %7066 = vmatpush3.bf16.msra.mxu1 %v7063_v24 }
 0x320   : > { %7068 = vmatprep.subr.bf16.mxu1 %v7067_v26 }
 0x323   : > { %7070 = vmatpush3.bf16.msra.mxu1 %v7067_v26 }
 0x326   : > { %6540 = vmatmul.mubr.msk.f32.vlgmr.msra.gmra.mrb[0].mxu1 %vm520_vm2, %v683_v27  ;;  %v875_v33 = vpop.permute.xlu1 %874 }
 0x327   : > { %6542 = vmatprep.mubr.msk.f32.mxu1 %vm520_vm2, %v684_v28 }
 0x32a   : > { %6543 = vmatmul.mubr.msk.f32.gmra.mrb[2].mxu1 %vm520_vm2, %v685_v31  ;;  %v880_v32 = vpop.permute.xlu0 %879  ;;  %v899_v35 = vpop.permute.xlu1 %898 }
 0x32e   : > { %v904_v34 = vpop.permute.xlu0 %903  ;;  %v885_v38 = vpop.permute.xlu1 %884 }
 0x332   : > { %v890_v36 = vpop.permute.xlu0 %889  ;;  %v909_v51 = vpop.permute.xlu1 %908 }
 0x336   : > { %v914_v48 = vpop.permute.xlu0 %913 }
 0x3f9   : > { %v6541_v37 = vpop.f32.mrb[0].mxu1 }
 0x3fa   : > { %v893_v39 = vmul.f32 %v6541_v37, %v880_v32  ;;  %v853_v40 = vpop.f32.mrb[1].mxu1 }
 0x3fb   : > { %v892_v41 = vmul.f32 %v875_v33, %v853_v40  ;;  %v5955_v40 = vld [vmem:[%s10195_s4 + $0x58] sm:$0xff] }
 0x3fc   : > { %v917_v42 = vadd.f32 %v904_v34, %v893_v39  ;;  %v5954_v34 = vld [vmem:[%s10195_s4 + $0x50] sm:$0xff] }
 0x3fd   : > { %v916_v43 = vadd.f32 %v899_v35, %v892_v41  ;;  %v6544_v44 = vpop.f32.mrb[2].mxu1  ;;  %v5957_v35 = vld [vmem:[%s10195_s4 + $0x68] sm:$0xff]  ;;  %v5958_v39 = vld [vmem:[%s10195_s4 + $0x70] sm:$0xff]  ;;  %v5959_v41 = vld [vmem:[%s10195_s4 + $0x78] sm:$0xff] }
 0x3fe   : > { %vm921_vm7 = vcmp.ge.f32.partialorder %v917_v42, 0.0  ;;  %v925_v45 = vmul.f32 0.2, %v917_v42  ;;  %v895_v46 = vmul.f32 %v6544_v44, %v890_v36  ;;  %v863_v47 = vpop.f32.mrb[3].mxu1 }
 0x3ff   : > { %vm920_vm8 = vcmp.ge.f32.partialorder %v916_v43, 0.0  ;;  %v924_v49 = vmul.f32 0.2, %v916_v43  ;;  %v894_v50 = vmul.f32 %v885_v38, %v863_v47 }
 0x400   : > { %v929_v52 = vsel %vm921_vm7, %v917_v42, %v925_v45  ;;  %v919_v53 = vadd.f32 %v914_v48, %v895_v46 }
 0x401   : > { %933 = vst.msk [vmem:[#allocation2 + $0x28] sm:$0xff] %vm421_vm0, %v929_v52  ;;  %v928_v54 = vsel %vm920_vm8, %v916_v43, %v924_v49  ;;  %v918_v55 = vadd.f32 %v909_v51, %v894_v50 }
 0x402   : > { %932 = vst.msk [vmem:[#allocation2 + $0x8] sm:$0xff] %vm421_vm0, %v928_v54  ;;  %vm923_vm9 = vcmp.ge.f32.partialorder %v919_v53, 0.0  ;;  %v927_v56 = vmul.f32 0.2, %v919_v53 }
 0x403   : > { %vm922_vm10 = vcmp.ge.f32.partialorder %v918_v55, 0.0  ;;  %v926_v57 = vmul.f32 0.2, %v918_v55 }
 0x404   : > { %v931_v58 = vsel %vm923_vm9, %v919_v53, %v927_v56 }
 0x405   : > { %935 = vst.msk [vmem:[#allocation2 + $0x68] sm:$0xff] %vm421_vm0, %v931_v58  ;;  %v930_v59 = vsel %vm922_vm10, %v918_v55, %v926_v57  ;;  %v5949_v58 = vld [vmem:[%s10194_s3 + $0x28] sm:$0xff] }
 0x406   : > { %934 = vst.msk [vmem:[#allocation2 + $0x48] sm:$0xff] %vm421_vm0, %v930_v59  ;;  %v5950_v59 = vld [vmem:[%s10194_s3 + $0x30] sm:$0xff] }
 0x408   : > { %v954_v60 = vld [vmem:[#allocation2 + $0x28] sm:$0xff] }
 0x409   : > { %v952_v61 = vld [vmem:[#allocation2 + $0x8] sm:$0xff]  ;;  %v7788_v5 = vpack.i.bf16 %v954_v60, %v8600_v0 }
 0x40a   : > { %v7763_v62 = vpack.i.bf16 %v954_v60, %v952_v61  ;;  %v7783_v3 = vpack.i.bf16 %v952_v61, %v8600_v0  ;;  %v5951_v60 = vld [vmem:[%s10194_s3 + $0x38] sm:$0xff] }
 0x40c   : > { %7764 = vrot.lane.b32.xlu1 %v7763_v62, %s10210_s25  ;;  %v958_v63 = vld [vmem:[#allocation2 + $0x68] sm:$0xff] }
 0x40d   : > { %v956_v1 = vld [vmem:[#allocation2 + $0x48] sm:$0xff]  ;;  %v7798_v6 = vpack.i.bf16 %v958_v63, %v8600_v0 }
 0x40e   : > { %v7768_v2 = vpack.i.bf16 %v958_v63, %v956_v1  ;;  %v7793_v4 = vpack.i.bf16 %v956_v1, %v8600_v0 }
 0x410   : > { %7774 = vrot.lane.b32.xlu1 %v7763_v62, %s10230_s29  ;;  %7769 = vrot.lane.b32.xlu0 %v7768_v2, %s10210_s25  ;;  %s10232_s25 = smov 4  }
 0x414   : > { %7784 = vrot.lane.b32.xlu1 %v7783_v3, %s10231_s12  ;;  %7779 = vrot.lane.b32.xlu0 %v7768_v2, %s10230_s29 }
 0x418   : > { %7794 = vrot.lane.b32.xlu1 %v7793_v4, %s10231_s12  ;;  %7789 = vrot.lane.b32.xlu0 %v7788_v5, %s10231_s12 }
 0x41c   : > { %7799 = vrot.lane.b32.xlu0 %v7798_v6, %s10231_s12 }
 0x47e   : > { %v7765_v7 = vpop.permute.xlu1 %7764 }
 0x47f   : > { %7804 = vrot.lane.b32.xlu1 %v7765_v7, %s10231_s12 }
 0x482   : > { %v7775_v8 = vpop.permute.xlu1 %7774  ;;  %v7770_v9 = vpop.permute.xlu0 %7769 }
 0x483   : > { %7814 = vrot.lane.b32.xlu1 %v7775_v8, %s10231_s12  ;;  %7809 = vrot.lane.b32.xlu0 %v7770_v9, %s10231_s12 }
 0x486   : > { %v7785_v10 = vpop.permute.xlu1 %7784  ;;  %v7780_v11 = vpop.permute.xlu0 %7779 }
 0x487   : > { %v7787_v14 = vunpack.i.h.bf16 %v7785_v10  ;;  %v7786_v15 = vunpack.i.l.bf16 %v7785_v10  ;;  %1130 = vperm.xlu1 %7702, %v5952_v13   ;;  %7819 = vrot.lane.b32.xlu0 %v7780_v11, %s10231_s12 }
 0x489   : > { %v1015_v26 = vsel %vm503_vm1, %v7786_v15, %v7787_v14 }
 0x48a   : > { %v7795_v16 = vpop.permute.xlu1 %7794  ;;  %v7790_v17 = vpop.permute.xlu0 %7789 }
 0x48b   : > { %v7792_v18 = vunpack.i.h.bf16 %v7790_v17  ;;  %v7791_v19 = vunpack.i.l.bf16 %v7790_v17  ;;  %v7797_v22 = vunpack.i.h.bf16 %v7795_v16  ;;  %v7796_v24 = vunpack.i.l.bf16 %v7795_v16  ;;  %1154 = vperm.xlu1 %7702, %v5956_v20   ;;  %1135 = vperm.xlu0 %7701, %v5953_v21  }
 0x48d   : > { %v1016_v27 = vsel %vm503_vm1, %v7791_v19, %v7792_v18  ;;  %v1017_v36 = vsel %vm503_vm1, %v7796_v24, %v7797_v22 }
 0x48e   : > { %v7800_v28 = vpop.permute.xlu0 %7799  ;;  %v7071_v31 = vpack.c.bf16 %v1016_v27, %v1015_v26 }
 0x48f   : > { %v7802_v32 = vunpack.i.h.bf16 %v7800_v28  ;;  %v7801_v33 = vunpack.i.l.bf16 %v7800_v28  ;;  %1140 = vperm.xlu1 %7702, %v5954_v34   ;;  %1159 = vperm.xlu0 %7701, %v5957_v35  }
 0x490   : > { %7072 = vmatprep.subr.bf16.mxu0 %v7071_v31 }
 0x491   : > { %7074 = vmatpush3.bf16.msra.mxu0 %v7071_v31  ;;  %v1018_v37 = vsel %vm503_vm1, %v7801_v33, %v7802_v32 }
 0x492   : > { %v7075_v38 = vpack.c.bf16 %v1018_v37, %v1017_v36 }
 0x493   : > { %1164 = vperm.xlu1 %7702, %v5958_v39   ;;  %1145 = vperm.xlu0 %7701, %v5955_v40  }
 0x494   : > { %7076 = vmatprep.subr.bf16.mxu0 %v7075_v38 }
 0x495   : > { %7078 = vmatpush3.bf16.msra.mxu0 %v7075_v38 }
 0x497   : > { %1169 = vperm.xlu0 %7701, %v5959_v41  }
 0x4f1   : > { %v7805_v42 = vpop.permute.xlu1 %7804 }
 0x4f2   : > { %v7807_v43 = vunpack.i.h.bf16 %v7805_v42  ;;  %v7806_v44 = vunpack.i.l.bf16 %v7805_v42 }
 0x4f4   : > { %v7079_v45 = vpack.c.bf16 %v7807_v43, %v7806_v44 }
 0x4f5   : > { %v7815_v46 = vpop.permute.xlu1 %7814  ;;  %v7810_v47 = vpop.permute.xlu0 %7809 }
 0x4f6   : > { %v7817_v48 = vunpack.i.h.bf16 %v7815_v46  ;;  %v7816_v49 = vunpack.i.l.bf16 %v7815_v46  ;;  %v7812_v50 = vunpack.i.h.bf16 %v7810_v47  ;;  %v7811_v51 = vunpack.i.l.bf16 %v7810_v47  ;;  %7080 = vmatprep.subr.bf16.mxu0 %v7079_v45 }
 0x4f7   : > { %7082 = vmatpush3.bf16.msra.mxu0 %v7079_v45  ;;  %v5964_v45 = vld [vmem:[%s10194_s3 + $0x40] sm:$0xff] }
 0x4f8   : > { %v7083_v52 = vpack.c.bf16 %v7812_v50, %v7811_v51  ;;  %v7087_v56 = vpack.c.bf16 %v7817_v48, %v7816_v49  ;;  %6599 = vmatprep.mubr.msk.f32.mxu1 %vm520_vm2, %v5964_v45 }
 0x4f9   : > { %v7820_v53 = vpop.permute.xlu0 %7819 }
 0x4fa   : > { %v7822_v54 = vunpack.i.h.bf16 %v7820_v53  ;;  %v7821_v55 = vunpack.i.l.bf16 %v7820_v53  ;;  %7084 = vmatprep.subr.bf16.mxu0 %v7083_v52  ;;  %v5969_v53 = vld [vmem:[%s10195_s4 + $0x88] sm:$0xff] }
 0x4fb   : > { %7086 = vmatpush3.bf16.msra.mxu0 %v7083_v52  ;;  %v5972_v52 = vld [vmem:[%s10195_s4 + $0xa0] sm:$0xff] }
 0x4fc   : > { %7088 = vmatprep.subr.bf16.mxu0 %v7087_v56  ;;  %v7091_v57 = vpack.c.bf16 %v7822_v54, %v7821_v55 }
 0x4ff   : > { %7090 = vmatpush3.bf16.msra.mxu0 %v7087_v56 }
 0x500   : > { %7092 = vmatprep.subr.bf16.mxu0 %v7091_v57 }
 0x503   : > { %7094 = vmatpush3.bf16.msra.mxu0 %v7091_v57 }
 0x506   : > { %6570 = vmatmul.mubr.msk.f32.vlgmr.msra.gmra.mrb[4].mxu0 %vm520_vm2, %v5949_v58  ;;  %v1131_v62 = vpop.permute.xlu1 %1130 }
 0x507   : > { %6572 = vmatprep.mubr.msk.f32.mxu0 %vm520_vm2, %v5950_v59 }
 0x50a   : > { %6573 = vmatmul.mubr.msk.f32.gmra.mrb[6].mxu0 %vm520_vm2, %v5951_v60  ;;  %v1136_v61 = vpop.permute.xlu0 %1135  ;;  %v1155_v1 = vpop.permute.xlu1 %1154 }
 0x50e   : > { %v1160_v63 = vpop.permute.xlu0 %1159  ;;  %v1141_v4 = vpop.permute.xlu1 %1140 }
 0x512   : > { %v1146_v2 = vpop.permute.xlu0 %1145  ;;  %v1165_v17 = vpop.permute.xlu1 %1164 }
 0x516   : > { %v1170_v14 = vpop.permute.xlu0 %1169 }
 0x5d9   : > { %v6571_v3 = vpop.f32.mrb[4].mxu0 }
 0x5da   : > { %v1149_v5 = vmul.f32 %v6571_v3, %v1136_v61  ;;  %v1109_v6 = vpop.f32.mrb[5].mxu0 }
 0x5db   : > { %v1148_v7 = vmul.f32 %v1131_v62, %v1109_v6  ;;  %v5970_v62 = vld [vmem:[%s10195_s4 + $0x90] sm:$0xff]  ;;  %v5975_v6 = vld [vmem:[%s10195_s4 + $0xb8] sm:$0xff] }
 0x5dc   : > { %v1173_v8 = vadd.f32 %v1160_v63, %v1149_v5  ;;  %v5973_v63 = vld [vmem:[%s10195_s4 + $0xa8] sm:$0xff]  ;;  %v5971_v5 = vld [vmem:[%s10195_s4 + $0x98] sm:$0xff] }
 0x5dd   : > { %v1172_v9 = vadd.f32 %v1155_v1, %v1148_v7  ;;  %v6574_v10 = vpop.f32.mrb[6].mxu0 }
 0x5de   : > { %v1177_v11 = vadd.f32 %v1173_v8, %v8832_v23  ;;  %v1151_v12 = vmul.f32 %v6574_v10, %v1146_v2  ;;  %v1119_v13 = vpop.f32.mrb[7].mxu0 }
 0x5df   : > { %v1176_v15 = vadd.f32 %v1172_v9, %v8836_v25  ;;  %v1150_v16 = vmul.f32 %v1141_v4, %v1119_v13  ;;  %v5974_v4 = vld [vmem:[%s10195_s4 + $0xb0] sm:$0xff] }
 0x5e0   : > { %vm1181_vm11 = vcmp.ge.f32.partialorder %v1177_v11, 0.0  ;;  %v1185_v18 = vmul.f32 0.2, %v1177_v11  ;;  %v1175_v19 = vadd.f32 %v1170_v14, %v1151_v12 }
 0x5e1   : > { %vm1180_vm12 = vcmp.ge.f32.partialorder %v1176_v15, 0.0  ;;  %v1184_v20 = vmul.f32 0.2, %v1176_v15  ;;  %v1174_v21 = vadd.f32 %v1165_v17, %v1150_v16 }
 0x5e2   : > { %v8974_v22 = vsel %vm1181_vm11, %v1177_v11, %v1185_v18  ;;  %v1179_v24 = vadd.f32 %v1175_v19, %v8840_v29  ;;  %vm1792_vm11 = vcmask 31744  }
 0x5e3   : > { %1193 = vst.msk [vmem:[#allocation2 + $0x28] sm:$0xff] %vm421_vm0, %v8974_v22  ;;  %v8979_v23 = vsel %vm1180_vm12, %v1176_v15, %v1184_v20  ;;  %v1178_v26 = vadd.f32 %v1174_v21, %v8844_v30 }
 0x5e4   : > { %1192 = vst.msk [vmem:[#allocation2 + $0x8] sm:$0xff] %vm421_vm0, %v8979_v23  ;;  %vm1183_vm13 = vcmp.ge.f32.partialorder %v1179_v24, 0.0  ;;  %v1187_v25 = vmul.f32 0.2, %v1179_v24 }
 0x5e5   : > { %vm1182_vm14 = vcmp.ge.f32.partialorder %v1178_v26, 0.0  ;;  %v1186_v27 = vmul.f32 0.2, %v1178_v26 }
 0x5e6   : > { %v8984_v28 = vsel %vm1183_vm13, %v1179_v24, %v1187_v25  ;;  %v5966_v25 = vld [vmem:[%s10194_s3 + $0x50] sm:$0xff] }
 0x5e7   : > { %1195 = vst.msk [vmem:[#allocation2 + $0x68] sm:$0xff] %vm421_vm0, %v8984_v28  ;;  %v8988_v29 = vsel %vm1182_vm14, %v1178_v26, %v1186_v27  ;;  %v5965_v26 = vld [vmem:[%s10194_s3 + $0x48] sm:$0xff]  ;;  %v5967_v27 = vld [vmem:[%s10194_s3 + $0x58] sm:$0xff] }
 0x5e8   : > { %1194 = vst.msk [vmem:[#allocation2 + $0x48] sm:$0xff] %vm421_vm0, %v8988_v29 }
 0x5ea   : > { %v1214_v31 = vld [vmem:[#allocation2 + $0x28] sm:$0xff] }
 0x5eb   : > { %v1212_v32 = vld [vmem:[#allocation2 + $0x8] sm:$0xff]  ;;  %v7848_v38 = vpack.i.bf16 %v1214_v31, %v8600_v0 }
 0x5ec   : > { %v7823_v30 = vpack.i.bf16 %v1214_v31, %v1212_v32  ;;  %v7843_v36 = vpack.i.bf16 %v1212_v32, %v8600_v0 }
 0x5ee   : > { %7824 = vrot.lane.b32.xlu1 %v7823_v30, %s10230_s29  ;;  %v1218_v33 = vld [vmem:[#allocation2 + $0x68] sm:$0xff] }
 0x5ef   : > { %v1216_v34 = vld [vmem:[#allocation2 + $0x48] sm:$0xff]  ;;  %v7858_v39 = vpack.i.bf16 %v1218_v33, %v8600_v0 }
 0x5f0   : > { %v7828_v35 = vpack.i.bf16 %v1218_v33, %v1216_v34  ;;  %v7853_v37 = vpack.i.bf16 %v1216_v34, %v8600_v0  ;;  %v5968_v0 = vld [vmem:[%s10195_s4 + $0x80] sm:$0xff] }
 0x5f2   : > { %7834 = vrot.lane.b32.xlu1 %v7823_v30, %s8605_s13  ;;  %7829 = vrot.lane.b32.xlu0 %v7828_v35, %s10230_s29 }
 0x5f6   : > { %7844 = vrot.lane.b32.xlu1 %v7843_v36, %s10212_s16  ;;  %7839 = vrot.lane.b32.xlu0 %v7828_v35, %s8605_s13 }
 0x5fa   : > { %7854 = vrot.lane.b32.xlu1 %v7853_v37, %s10212_s16  ;;  %7849 = vrot.lane.b32.xlu0 %v7848_v38, %s10212_s16 }
 0x5fe   : > { %7859 = vrot.lane.b32.xlu0 %v7858_v39, %s10212_s16 }
 0x660   : > { %v7825_v40 = vpop.permute.xlu1 %7824 }
 0x661   : > { %7864 = vrot.lane.b32.xlu1 %v7825_v40, %s10212_s16 }
 0x664   : > { %v7835_v41 = vpop.permute.xlu1 %7834  ;;  %v7830_v42 = vpop.permute.xlu0 %7829 }
 0x665   : > { %7874 = vrot.lane.b32.xlu1 %v7835_v41, %s10212_s16  ;;  %7869 = vrot.lane.b32.xlu0 %v7830_v42, %s10212_s16 }
 0x668   : > { %v7845_v43 = vpop.permute.xlu1 %7844  ;;  %v7840_v44 = vpop.permute.xlu0 %7839 }
 0x669   : > { %v7847_v46 = vunpack.i.h.bf16 %v7845_v43  ;;  %v7846_v47 = vunpack.i.l.bf16 %v7845_v43  ;;  %1391 = vperm.xlu1 %7702, %v5968_v0   ;;  %7879 = vrot.lane.b32.xlu0 %v7840_v44, %s10212_s16 }
 0x66b   : > { %v1276_v56 = vsel %vm1275_vm15, %v7846_v47, %v7847_v46 }
 0x66c   : > { %v7855_v48 = vpop.permute.xlu1 %7854  ;;  %v7850_v49 = vpop.permute.xlu0 %7849 }
 0x66d   : > { %v7852_v50 = vunpack.i.h.bf16 %v7850_v49  ;;  %v7851_v51 = vunpack.i.l.bf16 %v7850_v49  ;;  %v7857_v54 = vunpack.i.h.bf16 %v7855_v48  ;;  %v7856_v55 = vunpack.i.l.bf16 %v7855_v48  ;;  %1415 = vperm.xlu1 %7702, %v5972_v52   ;;  %1396 = vperm.xlu0 %7701, %v5969_v53  }
 0x66f   : > { %v1277_v57 = vsel %vm1275_vm15, %v7851_v51, %v7852_v50  ;;  %v1278_v1 = vsel %vm1275_vm15, %v7856_v55, %v7857_v54 }
 0x670   : > { %v7860_v58 = vpop.permute.xlu0 %7859  ;;  %v7095_v59 = vpack.c.bf16 %v1277_v57, %v1276_v56 }
 0x671   : > { %v7862_v60 = vunpack.i.h.bf16 %v7860_v58  ;;  %v7861_v61 = vunpack.i.l.bf16 %v7860_v58  ;;  %1401 = vperm.xlu1 %7702, %v5970_v62   ;;  %1420 = vperm.xlu0 %7701, %v5973_v63   ;;  %v9059_v63 = vld [vmem:[#allocation2] sm:$0xff] }
 0x672   : > { %7096 = vmatprep.subr.bf16.mxu1 %v7095_v59 }
 0x673   : > { %7098 = vmatpush3.bf16.msra.mxu1 %v7095_v59  ;;  %v1279_v2 = vsel %vm1275_vm15, %v7861_v61, %v7862_v60 }
 0x674   : > { %v7099_v3 = vpack.c.bf16 %v1279_v2, %v1278_v1 }
 0x675   : > { %1425 = vperm.xlu1 %7702, %v5974_v4   ;;  %1406 = vperm.xlu0 %7701, %v5971_v5  }
 0x676   : > { %7100 = vmatprep.subr.bf16.mxu1 %v7099_v3 }
 0x677   : > { %7102 = vmatpush3.bf16.msra.mxu1 %v7099_v3 }
 0x679   : > { %1430 = vperm.xlu0 %7701, %v5975_v6  }
 0x6d3   : > { %v7865_v7 = vpop.permute.xlu1 %7864 }
 0x6d4   : > { %v7867_v8 = vunpack.i.h.bf16 %v7865_v7  ;;  %v7866_v9 = vunpack.i.l.bf16 %v7865_v7 }
 0x6d6   : > { %v7103_v10 = vpack.c.bf16 %v7867_v8, %v7866_v9 }
 0x6d7   : > { %v7875_v11 = vpop.permute.xlu1 %7874  ;;  %v7870_v12 = vpop.permute.xlu0 %7869 }
 0x6d8   : > { %v7877_v13 = vunpack.i.h.bf16 %v7875_v11  ;;  %v7876_v14 = vunpack.i.l.bf16 %v7875_v11  ;;  %v7872_v15 = vunpack.i.h.bf16 %v7870_v12  ;;  %v7871_v16 = vunpack.i.l.bf16 %v7870_v12  ;;  %7104 = vmatprep.subr.bf16.mxu1 %v7103_v10  ;;  %v5984_v11 = vld [vmem:[%s10195_s4 + $0xc0] sm:$0xff] }
 0x6d9   : > { %7106 = vmatpush3.bf16.msra.mxu1 %v7103_v10  ;;  %v5980_v10 = vld [vmem:[%s10194_s3 + $0x60] sm:$0xff] }
 0x6da   : > { %v7107_v17 = vpack.c.bf16 %v7872_v15, %v7871_v16  ;;  %v7111_v21 = vpack.c.bf16 %v7877_v13, %v7876_v14  ;;  %6629 = vmatprep.mubr.msk.f32.mxu0 %vm520_vm2, %v5980_v10 }
 0x6db   : > { %v7880_v18 = vpop.permute.xlu0 %7879 }
 0x6dc   : > { %v7882_v19 = vunpack.i.h.bf16 %v7880_v18  ;;  %v7881_v20 = vunpack.i.l.bf16 %v7880_v18  ;;  %7108 = vmatprep.subr.bf16.mxu1 %v7107_v17  ;;  %v5988_v18 = vld [vmem:[%s10195_s4 + $0xe0] sm:$0xff] }
 0x6dd   : > { %7110 = vmatpush3.bf16.msra.mxu1 %v7107_v17 }
 0x6de   : > { %7112 = vmatprep.subr.bf16.mxu1 %v7111_v21  ;;  %v7115_v24 = vpack.c.bf16 %v7882_v19, %v7881_v20  ;;  %v5985_v19 = vld [vmem:[%s10195_s4 + $0xc8] sm:$0xff] }
 0x6e1   : > { %7114 = vmatpush3.bf16.msra.mxu1 %v7111_v21 }
 0x6e2   : > { %7116 = vmatprep.subr.bf16.mxu1 %v7115_v24 }
 0x6e5   : > { %7118 = vmatpush3.bf16.msra.mxu1 %v7115_v24 }
 0x6e8   : > { %6600 = vmatmul.mubr.msk.f32.vlgmr.msra.gmra.mrb[4].mxu1 %vm520_vm2, %v5965_v26  ;;  %v1392_v32 = vpop.permute.xlu1 %1391 }
 0x6e9   : > { %6602 = vmatprep.mubr.msk.f32.mxu1 %vm520_vm2, %v5966_v25 }
 0x6ec   : > { %6603 = vmatmul.mubr.msk.f32.gmra.mrb[6].mxu1 %vm520_vm2, %v5967_v27  ;;  %v1397_v31 = vpop.permute.xlu0 %1396  ;;  %v1416_v33 = vpop.permute.xlu1 %1415 }
 0x6f0   : > { %v1421_v30 = vpop.permute.xlu0 %1420  ;;  %v1402_v36 = vpop.permute.xlu1 %1401 }
 0x6f4   : > { %v1407_v34 = vpop.permute.xlu0 %1406  ;;  %v1426_v48 = vpop.permute.xlu1 %1425 }
 0x6f8   : > { %v1431_v0 = vpop.permute.xlu0 %1430 }
 0x7bb   : > { %v6601_v35 = vpop.f32.mrb[4].mxu1 }
 0x7bc   : > { %v1410_v37 = vmul.f32 %v6601_v35, %v1397_v31  ;;  %v1370_v38 = vpop.f32.mrb[5].mxu1 }
 0x7bd   : > { %v1409_v39 = vmul.f32 %v1392_v32, %v1370_v38  ;;  %v5987_v38 = vld [vmem:[%s10195_s4 + $0xd8] sm:$0xff] }
 0x7be   : > { %v1434_v40 = vadd.f32 %v1421_v30, %v1410_v37  ;;  %v5986_v30 = vld [vmem:[%s10195_s4 + $0xd0] sm:$0xff] }
 0x7bf   : > { %v1433_v41 = vadd.f32 %v1416_v33, %v1409_v39  ;;  %v6604_v42 = vpop.f32.mrb[6].mxu1  ;;  %v5989_v33 = vld [vmem:[%s10195_s4 + $0xe8] sm:$0xff]  ;;  %v5990_v37 = vld [vmem:[%s10195_s4 + $0xf0] sm:$0xff]  ;;  %v5991_v39 = vld [vmem:[%s10195_s4 + $0xf8] sm:$0xff] }
 0x7c0   : > { %vm1438_vm3 = vcmp.ge.f32.partialorder %v1434_v40, 0.0  ;;  %v1442_v43 = vmul.f32 0.2, %v1434_v40  ;;  %v1412_v44 = vmul.f32 %v6604_v42, %v1407_v34  ;;  %v1380_v45 = vpop.f32.mrb[7].mxu1 }
 0x7c1   : > { %vm1437_vm4 = vcmp.ge.f32.partialorder %v1433_v41, 0.0  ;;  %v1441_v46 = vmul.f32 0.2, %v1433_v41  ;;  %v1411_v47 = vmul.f32 %v1402_v36, %v1380_v45 }
 0x7c2   : > { %v1446_v49 = vsel %vm1438_vm3, %v1434_v40, %v1442_v43  ;;  %v1436_v50 = vadd.f32 %v1431_v0, %v1412_v44 }
 0x7c3   : > { %1450 = vst.msk [vmem:[#allocation2 + $0x28] sm:$0xff] %vm421_vm0, %v1446_v49  ;;  %v1445_v51 = vsel %vm1437_vm4, %v1433_v41, %v1441_v46  ;;  %v1435_v52 = vadd.f32 %v1426_v48, %v1411_v47 }
 0x7c4   : > { %1449 = vst.msk [vmem:[#allocation2 + $0x8] sm:$0xff] %vm421_vm0, %v1445_v51  ;;  %vm1440_vm5 = vcmp.ge.f32.partialorder %v1436_v50, 0.0  ;;  %v1444_v53 = vmul.f32 0.2, %v1436_v50 }
 0x7c5   : > { %vm1439_vm6 = vcmp.ge.f32.partialorder %v1435_v52, 0.0  ;;  %v1443_v54 = vmul.f32 0.2, %v1435_v52 }
 0x7c6   : > { %v1448_v55 = vsel %vm1440_vm5, %v1436_v50, %v1444_v53 }
 0x7c7   : > { %1452 = vst.msk [vmem:[#allocation2 + $0x68] sm:$0xff] %vm421_vm0, %v1448_v55  ;;  %v1447_v56 = vsel %vm1439_vm6, %v1435_v52, %v1443_v54  ;;  %v5981_v55 = vld [vmem:[%s10194_s3 + $0x68] sm:$0xff] }
 0x7c8   : > { %1451 = vst.msk [vmem:[#allocation2 + $0x48] sm:$0xff] %vm421_vm0, %v1447_v56  ;;  %v5982_v56 = vld [vmem:[%s10194_s3 + $0x70] sm:$0xff] }
 0x7ca   : > { %v1471_v57 = vld [vmem:[#allocation2 + $0x28] sm:$0xff] }
 0x7cb   : > { %v1469_v58 = vld [vmem:[#allocation2 + $0x8] sm:$0xff]  ;;  %v7908_v3 = vpack.i.bf16 %v1471_v57, %v9059_v63 }
 0x7cc   : > { %v7883_v59 = vpack.i.bf16 %v1471_v57, %v1469_v58  ;;  %v7903_v1 = vpack.i.bf16 %v1469_v58, %v9059_v63  ;;  %v5983_v57 = vld [vmem:[%s10194_s3 + $0x78] sm:$0xff] }
 0x7ce   : > { %7884 = vrot.lane.b32.xlu1 %v7883_v59, %s10230_s29  ;;  %v1475_v60 = vld [vmem:[#allocation2 + $0x68] sm:$0xff] }
 0x7cf   : > { %v1473_v61 = vld [vmem:[#allocation2 + $0x48] sm:$0xff]  ;;  %v7918_v4 = vpack.i.bf16 %v1475_v60, %v9059_v63 }
 0x7d0   : > { %v7888_v62 = vpack.i.bf16 %v1475_v60, %v1473_v61  ;;  %v7913_v2 = vpack.i.bf16 %v1473_v61, %v9059_v63 }
 0x7d2   : > { %7894 = vrot.lane.b32.xlu1 %v7883_v59, %s8605_s13  ;;  %7889 = vrot.lane.b32.xlu0 %v7888_v62, %s10230_s29 }
 0x7d6   : > { %7904 = vrot.lane.b32.xlu1 %v7903_v1, %s10212_s16  ;;  %7899 = vrot.lane.b32.xlu0 %v7888_v62, %s8605_s13 }
 0x7da   : > { %7914 = vrot.lane.b32.xlu1 %v7913_v2, %s10212_s16  ;;  %7909 = vrot.lane.b32.xlu0 %v7908_v3, %s10212_s16 }
 0x7de   : > { %7919 = vrot.lane.b32.xlu0 %v7918_v4, %s10212_s16 }
 0x840   : > { %v7885_v5 = vpop.permute.xlu1 %7884 }
 0x841   : > { %7924 = vrot.lane.b32.xlu1 %v7885_v5, %s10212_s16 }
 0x844   : > { %v7895_v6 = vpop.permute.xlu1 %7894  ;;  %v7890_v7 = vpop.permute.xlu0 %7889 }
 0x845   : > { %7934 = vrot.lane.b32.xlu1 %v7895_v6, %s10212_s16  ;;  %7929 = vrot.lane.b32.xlu0 %v7890_v7, %s10212_s16 }
 0x848   : > { %v7905_v8 = vpop.permute.xlu1 %7904  ;;  %v7900_v9 = vpop.permute.xlu0 %7899 }
 0x849   : > { %v7907_v12 = vunpack.i.h.bf16 %v7905_v8  ;;  %v7906_v13 = vunpack.i.l.bf16 %v7905_v8  ;;  %1647 = vperm.xlu1 %7702, %v5984_v11   ;;  %7939 = vrot.lane.b32.xlu0 %v7900_v9, %s10212_s16  ;;  %s10233_s16 = smov 8  }
 0x84b   : > { %v1532_v24 = vsel %vm1275_vm15, %v7906_v13, %v7907_v12 }
 0x84c   : > { %v7915_v14 = vpop.permute.xlu1 %7914  ;;  %v7910_v15 = vpop.permute.xlu0 %7909 }
 0x84d   : > { %v7912_v16 = vunpack.i.h.bf16 %v7910_v15  ;;  %v7911_v17 = vunpack.i.l.bf16 %v7910_v15  ;;  %v7917_v20 = vunpack.i.h.bf16 %v7915_v14  ;;  %v7916_v21 = vunpack.i.l.bf16 %v7915_v14  ;;  %1671 = vperm.xlu1 %7702, %v5988_v18   ;;  %1652 = vperm.xlu0 %7701, %v5985_v19  }
 0x84f   : > { %v1533_v26 = vsel %vm1275_vm15, %v7911_v17, %v7912_v16  ;;  %v1534_v34 = vsel %vm1275_vm15, %v7916_v21, %v7917_v20 }
 0x850   : > { %v7920_v25 = vpop.permute.xlu0 %7919  ;;  %v7119_v27 = vpack.c.bf16 %v1533_v26, %v1532_v24 }
 0x851   : > { %v7922_v31 = vunpack.i.h.bf16 %v7920_v25  ;;  %v7921_v32 = vunpack.i.l.bf16 %v7920_v25  ;;  %1657 = vperm.xlu1 %7702, %v5986_v30   ;;  %1676 = vperm.xlu0 %7701, %v5989_v33  }
 0x852   : > { %7120 = vmatprep.subr.bf16.mxu0 %v7119_v27 }
 0x853   : > { %7122 = vmatpush3.bf16.msra.mxu0 %v7119_v27  ;;  %v1535_v35 = vsel %vm1275_vm15, %v7921_v32, %v7922_v31 }
 0x854   : > { %v7123_v36 = vpack.c.bf16 %v1535_v35, %v1534_v34 }
 0x855   : > { %1681 = vperm.xlu1 %7702, %v5990_v37   ;;  %1662 = vperm.xlu0 %7701, %v5987_v38  }
 0x856   : > { %7124 = vmatprep.subr.bf16.mxu0 %v7123_v36 }
 0x857   : > { %7126 = vmatpush3.bf16.msra.mxu0 %v7123_v36 }
 0x859   : > { %1686 = vperm.xlu0 %7701, %v5991_v39  }
 0x8b3   : > { %v7925_v40 = vpop.permute.xlu1 %7924 }
 0x8b4   : > { %v7927_v41 = vunpack.i.h.bf16 %v7925_v40  ;;  %v7926_v42 = vunpack.i.l.bf16 %v7925_v40 }
 0x8b6   : > { %v7127_v43 = vpack.c.bf16 %v7927_v41, %v7926_v42 }
 0x8b7   : > { %v7935_v44 = vpop.permute.xlu1 %7934  ;;  %v7930_v45 = vpop.permute.xlu0 %7929 }
 0x8b8   : > { %v7937_v0 = vunpack.i.h.bf16 %v7935_v44  ;;  %v7936_v46 = vunpack.i.l.bf16 %v7935_v44  ;;  %v7932_v47 = vunpack.i.h.bf16 %v7930_v45  ;;  %v7931_v48 = vunpack.i.l.bf16 %v7930_v45  ;;  %7128 = vmatprep.subr.bf16.mxu0 %v7127_v43  ;;  %v6000_v44 = vld [vmem:[%s10195_s4 + $0x100] sm:$0xff] }
 0x8b9   : > { %7130 = vmatpush3.bf16.msra.mxu0 %v7127_v43  ;;  %v5996_v43 = vld [vmem:[%s10194_s3 + $0x80] sm:$0xff] }
 0x8ba   : > { %v7131_v49 = vpack.c.bf16 %v7932_v47, %v7931_v48  ;;  %v7135_v53 = vpack.c.bf16 %v7937_v0, %v7936_v46  ;;  %6659 = vmatprep.mubr.msk.f32.mxu1 %vm520_vm2, %v5996_v43 }
 0x8bb   : > { %v7940_v50 = vpop.permute.xlu0 %7939 }
 0x8bc   : > { %v7942_v51 = vunpack.i.h.bf16 %v7940_v50  ;;  %v7941_v52 = vunpack.i.l.bf16 %v7940_v50  ;;  %7132 = vmatprep.subr.bf16.mxu0 %v7131_v49  ;;  %v6004_v50 = vld [vmem:[%s10195_s4 + $0x120] sm:$0xff] }
 0x8bd   : > { %7134 = vmatpush3.bf16.msra.mxu0 %v7131_v49 }
 0x8be   : > { %7136 = vmatprep.subr.bf16.mxu0 %v7135_v53  ;;  %v7139_v54 = vpack.c.bf16 %v7942_v51, %v7941_v52  ;;  %v6001_v51 = vld [vmem:[%s10195_s4 + $0x108] sm:$0xff] }
 0x8c1   : > { %7138 = vmatpush3.bf16.msra.mxu0 %v7135_v53 }
 0x8c2   : > { %7140 = vmatprep.subr.bf16.mxu0 %v7139_v54 }
 0x8c5   : > { %7142 = vmatpush3.bf16.msra.mxu0 %v7139_v54 }
 0x8c8   : > { %6630 = vmatmul.mubr.msk.f32.vlgmr.msra.gmra.mrb[8].mxu0 %vm520_vm2, %v5981_v55  ;;  %v1648_v59 = vpop.permute.xlu1 %1647 }
 0x8c9   : > { %6632 = vmatprep.mubr.msk.f32.mxu0 %vm520_vm2, %v5982_v56 }
 0x8cc   : > { %6633 = vmatmul.mubr.msk.f32.gmra.mrb[10].mxu0 %vm520_vm2, %v5983_v57  ;;  %v1653_v58 = vpop.permute.xlu0 %1652  ;;  %v1672_v61 = vpop.permute.xlu1 %1671 }
 0x8d0   : > { %v1677_v60 = vpop.permute.xlu0 %1676  ;;  %v1658_v2 = vpop.permute.xlu1 %1657 }
 0x8d4   : > { %v1663_v62 = vpop.permute.xlu0 %1662  ;;  %v1682_v15 = vpop.permute.xlu1 %1681 }
 0x8d8   : > { %v1687_v12 = vpop.permute.xlu0 %1686 }
 0x99b   : > { %v6631_v1 = vpop.f32.mrb[8].mxu0 }
 0x99c   : > { %v1666_v3 = vmul.f32 %v6631_v1, %v1653_v58  ;;  %v1626_v4 = vpop.f32.mrb[9].mxu0 }
 0x99d   : > { %v1665_v5 = vmul.f32 %v1648_v59, %v1626_v4  ;;  %v6003_v4 = vld [vmem:[%s10195_s4 + $0x118] sm:$0xff] }
 0x99e   : > { %v1690_v6 = vadd.f32 %v1677_v60, %v1666_v3  ;;  %v6002_v60 = vld [vmem:[%s10195_s4 + $0x110] sm:$0xff] }
 0x99f   : > { %v1689_v7 = vadd.f32 %v1672_v61, %v1665_v5  ;;  %v6634_v8 = vpop.f32.mrb[10].mxu0  ;;  %v6005_v61 = vld [vmem:[%s10195_s4 + $0x128] sm:$0xff]  ;;  %v6006_v3 = vld [vmem:[%s10195_s4 + $0x130] sm:$0xff]  ;;  %v6007_v5 = vld [vmem:[%s10195_s4 + $0x138] sm:$0xff] }
 0x9a0   : > { %v1694_v9 = vadd.f32 %v1690_v6, %v8974_v22  ;;  %v1668_v10 = vmul.f32 %v6634_v8, %v1663_v62  ;;  %v1636_v11 = vpop.f32.mrb[11].mxu0 }
 0x9a1   : > { %v1693_v13 = vadd.f32 %v1689_v7, %v8979_v23  ;;  %v1667_v14 = vmul.f32 %v1658_v2, %v1636_v11 }
 0x9a2   : > { %vm1698_vm7 = vcmp.ge.f32.partialorder %v1694_v9, 0.0  ;;  %v1702_v16 = vmul.f32 0.2, %v1694_v9  ;;  %v1692_v17 = vadd.f32 %v1687_v12, %v1668_v10 }
 0x9a3   : > { %vm1697_vm8 = vcmp.ge.f32.partialorder %v1693_v13, 0.0  ;;  %v1701_v18 = vmul.f32 0.2, %v1693_v13  ;;  %v1691_v19 = vadd.f32 %v1682_v15, %v1667_v14 }
 0x9a4   : > { %v9120_v20 = vsel %vm1698_vm7, %v1694_v9, %v1702_v16  ;;  %v1696_v21 = vadd.f32 %v1692_v17, %v8984_v28 }
 0x9a5   : > { %1710 = vst.msk [vmem:[#allocation2 + $0x28] sm:$0xff] %vm421_vm0, %v9120_v20  ;;  %v9125_v22 = vsel %vm1697_vm8, %v1693_v13, %v1701_v18  ;;  %v1695_v24 = vadd.f32 %v1691_v19, %v8988_v29  ;;  %vm403_vm8 = vcmask 64512  }
 0x9a6   : > { %1709 = vst.msk [vmem:[#allocation2 + $0x8] sm:$0xff] %vm421_vm0, %v9125_v22  ;;  %vm1700_vm9 = vcmp.ge.f32.partialorder %v1696_v21, 0.0  ;;  %v1704_v23 = vmul.f32 0.2, %v1696_v21 }
 0x9a7   : > { %vm1699_vm10 = vcmp.ge.f32.partialorder %v1695_v24, 0.0  ;;  %v1703_v26 = vmul.f32 0.2, %v1695_v24  ;;  %404 = vst.msk [vmem:[#allocation2 + $0x18] sm:$0xff] %vm403_vm8, %v9059_v63  ;;  %408 = vst.msk [vmem:[#allocation2 + $0x38] sm:$0xff] %vm403_vm8, %v9059_v63 }
 0x9a8   : > { %v9130_v25 = vsel %vm1700_vm9, %v1696_v21, %v1704_v23  ;;  %v5997_v23 = vld [vmem:[%s10194_s3 + $0x88] sm:$0xff]  ;;  %412 = vst.msk [vmem:[#allocation2 + $0x58] sm:$0xff] %vm403_vm8, %v9059_v63  ;;  %416 = vst.msk [vmem:[#allocation2 + $0x78] sm:$0xff] %vm403_vm8, %v9059_v63 }
 0x9a9   : > { %1712 = vst.msk [vmem:[#allocation2 + $0x68] sm:$0xff] %vm421_vm0, %v9130_v25  ;;  %v9134_v28 = vsel %vm1699_vm10, %v1695_v24, %v1703_v26  ;;  %v5998_v26 = vld [vmem:[%s10194_s3 + $0x90] sm:$0xff] }
 0x9aa   : > { %1711 = vst.msk [vmem:[#allocation2 + $0x48] sm:$0xff] %vm421_vm0, %v9134_v28 }
 0x9ac   : > { %v1731_v27 = vld [vmem:[#allocation2 + $0x28] sm:$0xff] }
 0x9ad   : > { %v1729_v31 = vld [vmem:[#allocation2 + $0x8] sm:$0xff]  ;;  %v7968_v36 = vpack.i.bf16 %v1731_v27, %v9059_v63 }
 0x9ae   : > { %v7943_v29 = vpack.i.bf16 %v1731_v27, %v1729_v31  ;;  %v7963_v34 = vpack.i.bf16 %v1729_v31, %v9059_v63  ;;  %v5999_v27 = vld [vmem:[%s10194_s3 + $0x98] sm:$0xff] }
 0x9b0   : > { %7944 = vrot.lane.b32.xlu1 %v7943_v29, %s8605_s13  ;;  %v1735_v32 = vld [vmem:[#allocation2 + $0x68] sm:$0xff] }
 0x9b1   : > { %v1733_v30 = vld [vmem:[#allocation2 + $0x48] sm:$0xff]  ;;  %v7978_v37 = vpack.i.bf16 %v1735_v32, %v9059_v63 }
 0x9b2   : > { %v7948_v33 = vpack.i.bf16 %v1735_v32, %v1733_v30  ;;  %v7973_v35 = vpack.i.bf16 %v1733_v30, %v9059_v63 }
 0x9b4   : > { %7954 = vrot.lane.b32.xlu1 %v7943_v29, %s8607_s30  ;;  %7949 = vrot.lane.b32.xlu0 %v7948_v33, %s8605_s13 }
 0x9b8   : > { %7964 = vrot.lane.b32.xlu1 %v7963_v34, %s10214_s14  ;;  %7959 = vrot.lane.b32.xlu0 %v7948_v33, %s8607_s30 }
 0x9bc   : > { %7974 = vrot.lane.b32.xlu1 %v7973_v35, %s10214_s14  ;;  %7969 = vrot.lane.b32.xlu0 %v7968_v36, %s10214_s14 }
 0x9c0   : > { %7979 = vrot.lane.b32.xlu0 %v7978_v37, %s10214_s14 }
 0xa22   : > { %v7945_v38 = vpop.permute.xlu1 %7944 }
 0xa23   : > { %7984 = vrot.lane.b32.xlu1 %v7945_v38, %s10214_s14 }
 0xa26   : > { %v7955_v39 = vpop.permute.xlu1 %7954  ;;  %v7950_v40 = vpop.permute.xlu0 %7949 }
 0xa27   : > { %7994 = vrot.lane.b32.xlu1 %v7955_v39, %s10214_s14  ;;  %7989 = vrot.lane.b32.xlu0 %v7950_v40, %s10214_s14 }
 0xa2a   : > { %v7965_v41 = vpop.permute.xlu1 %7964  ;;  %v7960_v42 = vpop.permute.xlu0 %7959 }
 0xa2b   : > { %v7967_v45 = vunpack.i.h.bf16 %v7965_v41  ;;  %v7966_v0 = vunpack.i.l.bf16 %v7965_v41  ;;  %1908 = vperm.xlu1 %7702, %v6000_v44   ;;  %7999 = vrot.lane.b32.xlu0 %v7960_v42, %s10214_s14  ;;  %s10216_s14 = smov 8  }
 0xa2d   : > { %v1793_v54 = vsel %vm1792_vm11, %v7966_v0, %v7967_v45 }
 0xa2e   : > { %v7975_v46 = vpop.permute.xlu1 %7974  ;;  %v7970_v47 = vpop.permute.xlu0 %7969 }
 0xa2f   : > { %v7972_v48 = vunpack.i.h.bf16 %v7970_v47  ;;  %v7971_v49 = vunpack.i.l.bf16 %v7970_v47  ;;  %v7977_v52 = vunpack.i.h.bf16 %v7975_v46  ;;  %v7976_v53 = vunpack.i.l.bf16 %v7975_v46  ;;  %1932 = vperm.xlu1 %7702, %v6004_v50   ;;  %1913 = vperm.xlu0 %7701, %v6001_v51  }
 0xa31   : > { %v1794_v55 = vsel %vm1792_vm11, %v7971_v49, %v7972_v48  ;;  %v1795_v62 = vsel %vm1792_vm11, %v7976_v53, %v7977_v52 }
 0xa32   : > { %v7980_v56 = vpop.permute.xlu0 %7979  ;;  %v7143_v57 = vpack.c.bf16 %v1794_v55, %v1793_v54 }
 0xa33   : > { %v7982_v58 = vunpack.i.h.bf16 %v7980_v56  ;;  %v7981_v59 = vunpack.i.l.bf16 %v7980_v56  ;;  %1918 = vperm.xlu1 %7702, %v6002_v60   ;;  %1937 = vperm.xlu0 %7701, %v6005_v61  }
 0xa34   : > { %7144 = vmatprep.subr.bf16.mxu1 %v7143_v57 }
 0xa35   : > { %7146 = vmatpush3.bf16.msra.mxu1 %v7143_v57  ;;  %v1796_v1 = vsel %vm1792_vm11, %v7981_v59, %v7982_v58 }
 0xa36   : > { %v7147_v2 = vpack.c.bf16 %v1796_v1, %v1795_v62 }
 0xa37   : > { %1942 = vperm.xlu1 %7702, %v6006_v3   ;;  %1923 = vperm.xlu0 %7701, %v6003_v4  }
 0xa38   : > { %7148 = vmatprep.subr.bf16.mxu1 %v7147_v2 }
 0xa39   : > { %7150 = vmatpush3.bf16.msra.mxu1 %v7147_v2 }
 0xa3b   : > { %1947 = vperm.xlu0 %7701, %v6007_v5  }
 0xa95   : > { %v7985_v6 = vpop.permute.xlu1 %7984 }
 0xa96   : > { %v7987_v7 = vunpack.i.h.bf16 %v7985_v6  ;;  %v7986_v8 = vunpack.i.l.bf16 %v7985_v6 }
 0xa98   : > { %v7151_v9 = vpack.c.bf16 %v7987_v7, %v7986_v8 }
 0xa99   : > { %v7995_v10 = vpop.permute.xlu1 %7994  ;;  %v7990_v11 = vpop.permute.xlu0 %7989 }
 0xa9a   : > { %v7997_v12 = vunpack.i.h.bf16 %v7995_v10  ;;  %v7996_v13 = vunpack.i.l.bf16 %v7995_v10  ;;  %v7992_v14 = vunpack.i.h.bf16 %v7990_v11  ;;  %v7991_v15 = vunpack.i.l.bf16 %v7990_v11  ;;  %7152 = vmatprep.subr.bf16.mxu1 %v7151_v9  ;;  %v6016_v10 = vld [vmem:[%s10195_s4 + $0x140] sm:$0xff] }
 0xa9b   : > { %7154 = vmatpush3.bf16.msra.mxu1 %v7151_v9  ;;  %v6012_v9 = vld [vmem:[%s10194_s3 + $0xa0] sm:$0xff] }
 0xa9c   : > { %v7155_v16 = vpack.c.bf16 %v7992_v14, %v7991_v15  ;;  %v7159_v21 = vpack.c.bf16 %v7997_v12, %v7996_v13  ;;  %6689 = vmatprep.mubr.msk.f32.mxu0 %vm520_vm2, %v6012_v9 }
 0xa9d   : > { %v8000_v17 = vpop.permute.xlu0 %7999 }
 0xa9e   : > { %v8002_v18 = vunpack.i.h.bf16 %v8000_v17  ;;  %v8001_v19 = vunpack.i.l.bf16 %v8000_v17  ;;  %7156 = vmatprep.subr.bf16.mxu1 %v7155_v16  ;;  %v6020_v17 = vld [vmem:[%s10195_s4 + $0x160] sm:$0xff] }
 0xa9f   : > { %7158 = vmatpush3.bf16.msra.mxu1 %v7155_v16 }
 0xaa0   : > { %7160 = vmatprep.subr.bf16.mxu1 %v7159_v21  ;;  %v7163_v24 = vpack.c.bf16 %v8002_v18, %v8001_v19  ;;  %v6017_v18 = vld [vmem:[%s10195_s4 + $0x148] sm:$0xff] }
 0xaa3   : > { %7162 = vmatpush3.bf16.msra.mxu1 %v7159_v21 }
 0xaa4   : > { %7164 = vmatprep.subr.bf16.mxu1 %v7163_v24 }
 0xaa7   : > { %7166 = vmatpush3.bf16.msra.mxu1 %v7163_v24 }
 0xaaa   : > { %6660 = vmatmul.mubr.msk.f32.vlgmr.msra.gmra.mrb[8].mxu1 %vm520_vm2, %v5997_v23  ;;  %v1909_v29 = vpop.permute.xlu1 %1908 }
 0xaab   : > { %6662 = vmatprep.mubr.msk.f32.mxu1 %vm520_vm2, %v5998_v26 }
 0xaae   : > { %6663 = vmatmul.mubr.msk.f32.gmra.mrb[10].mxu1 %vm520_vm2, %v5999_v27  ;;  %v1914_v31 = vpop.permute.xlu0 %1913  ;;  %v1933_v30 = vpop.permute.xlu1 %1932 }
 0xab2   : > { %v1938_v32 = vpop.permute.xlu0 %1937  ;;  %v1919_v35 = vpop.permute.xlu1 %1918 }
 0xab6   : > { %v1924_v33 = vpop.permute.xlu0 %1923  ;;  %v1943_v47 = vpop.permute.xlu1 %1942 }
 0xaba   : > { %v1948_v45 = vpop.permute.xlu0 %1947 }
 0xb7d   : > { %v6661_v34 = vpop.f32.mrb[8].mxu1 }
 0xb7e   : > { %v1927_v36 = vmul.f32 %v6661_v34, %v1914_v31  ;;  %v1887_v37 = vpop.f32.mrb[9].mxu1 }
 0xb7f   : > { %v1926_v38 = vmul.f32 %v1909_v29, %v1887_v37  ;;  %v6019_v37 = vld [vmem:[%s10195_s4 + $0x158] sm:$0xff] }
 0xb80   : > { %v1951_v39 = vadd.f32 %v1938_v32, %v1927_v36  ;;  %v6018_v32 = vld [vmem:[%s10195_s4 + $0x150] sm:$0xff] }
 0xb81   : > { %v1950_v40 = vadd.f32 %v1933_v30, %v1926_v38  ;;  %v6664_v41 = vpop.f32.mrb[10].mxu1  ;;  %v6021_v30 = vld [vmem:[%s10195_s4 + $0x168] sm:$0xff]  ;;  %v6022_v36 = vld [vmem:[%s10195_s4 + $0x170] sm:$0xff]  ;;  %v6023_v38 = vld [vmem:[%s10195_s4 + $0x178] sm:$0xff] }
 0xb82   : > { %vm1955_vm12 = vcmp.ge.f32.partialorder %v1951_v39, 0.0  ;;  %v1959_v42 = vmul.f32 0.2, %v1951_v39  ;;  %v1929_v43 = vmul.f32 %v6664_v41, %v1924_v33  ;;  %v1897_v44 = vpop.f32.mrb[11].mxu1 }
 0xb83   : > { %vm1954_vm13 = vcmp.ge.f32.partialorder %v1950_v40, 0.0  ;;  %v1958_v0 = vmul.f32 0.2, %v1950_v40  ;;  %v1928_v46 = vmul.f32 %v1919_v35, %v1897_v44 }
 0xb84   : > { %v1963_v48 = vsel %vm1955_vm12, %v1951_v39, %v1959_v42  ;;  %v1953_v49 = vadd.f32 %v1948_v45, %v1929_v43 }
 0xb85   : > { %1967 = vst.msk [vmem:[#allocation2 + $0x28] sm:$0xff] %vm421_vm0, %v1963_v48  ;;  %v1962_v50 = vsel %vm1954_vm13, %v1950_v40, %v1958_v0  ;;  %v1952_v51 = vadd.f32 %v1943_v47, %v1928_v46 }
 0xb86   : > { %1966 = vst.msk [vmem:[#allocation2 + $0x8] sm:$0xff] %vm421_vm0, %v1962_v50  ;;  %vm1957_vm14 = vcmp.ge.f32.partialorder %v1953_v49, 0.0  ;;  %v1961_v52 = vmul.f32 0.2, %v1953_v49 }
 0xb87   : > { %vm1956_vm3 = vcmp.ge.f32.partialorder %v1952_v51, 0.0  ;;  %v1960_v53 = vmul.f32 0.2, %v1952_v51 }
 0xb88   : > { %v1965_v54 = vsel %vm1957_vm14, %v1953_v49, %v1961_v52 }
 0xb89   : > { %1969 = vst.msk [vmem:[#allocation2 + $0x68] sm:$0xff] %vm421_vm0, %v1965_v54  ;;  %v1964_v55 = vsel %vm1956_vm3, %v1952_v51, %v1960_v53  ;;  %v6013_v54 = vld [vmem:[%s10194_s3 + $0xa8] sm:$0xff] }
 0xb8a   : > { %1968 = vst.msk [vmem:[#allocation2 + $0x48] sm:$0xff] %vm421_vm0, %v1964_v55  ;;  %v6014_v55 = vld [vmem:[%s10194_s3 + $0xb0] sm:$0xff] }
 0xb8c   : > { %v1988_v56 = vld [vmem:[#allocation2 + $0x28] sm:$0xff] }
 0xb8d   : > { %v1986_v57 = vld [vmem:[#allocation2 + $0x8] sm:$0xff]  ;;  %v8028_v2 = vpack.i.bf16 %v1988_v56, %v9059_v63 }
 0xb8e   : > { %v8003_v58 = vpack.i.bf16 %v1988_v56, %v1986_v57  ;;  %v8023_v62 = vpack.i.bf16 %v1986_v57, %v9059_v63  ;;  %v6015_v56 = vld [vmem:[%s10194_s3 + $0xb8] sm:$0xff] }
 0xb90   : > { %8004 = vrot.lane.b32.xlu1 %v8003_v58, %s8605_s13  ;;  %v1992_v59 = vld [vmem:[#allocation2 + $0x68] sm:$0xff] }
 0xb91   : > { %v1990_v60 = vld [vmem:[#allocation2 + $0x48] sm:$0xff]  ;;  %v8038_v3 = vpack.i.bf16 %v1992_v59, %v9059_v63 }
 0xb92   : > { %v8008_v61 = vpack.i.bf16 %v1992_v59, %v1990_v60  ;;  %v8033_v1 = vpack.i.bf16 %v1990_v60, %v9059_v63 }
 0xb94   : > { %8014 = vrot.lane.b32.xlu1 %v8003_v58, %s8607_s30  ;;  %8009 = vrot.lane.b32.xlu0 %v8008_v61, %s8605_s13 }
 0xb98   : > { %8024 = vrot.lane.b32.xlu1 %v8023_v62, %s10232_s25  ;;  %8019 = vrot.lane.b32.xlu0 %v8008_v61, %s8607_s30 }
 0xb9c   : > { %8034 = vrot.lane.b32.xlu1 %v8033_v1, %s10232_s25  ;;  %8029 = vrot.lane.b32.xlu0 %v8028_v2, %s10232_s25 }
 0xba0   : > { %8039 = vrot.lane.b32.xlu0 %v8038_v3, %s10232_s25 }
 0xc02   : > { %v8005_v4 = vpop.permute.xlu1 %8004 }
 0xc03   : > { %8044 = vrot.lane.b32.xlu1 %v8005_v4, %s10232_s25 }
 0xc06   : > { %v8015_v5 = vpop.permute.xlu1 %8014  ;;  %v8010_v6 = vpop.permute.xlu0 %8009 }
 0xc07   : > { %8054 = vrot.lane.b32.xlu1 %v8015_v5, %s10232_s25  ;;  %8049 = vrot.lane.b32.xlu0 %v8010_v6, %s10232_s25 }
 0xc0a   : > { %v8025_v7 = vpop.permute.xlu1 %8024  ;;  %v8020_v8 = vpop.permute.xlu0 %8019 }
 0xc0b   : > { %v8027_v11 = vunpack.i.h.bf16 %v8025_v7  ;;  %v8026_v12 = vunpack.i.l.bf16 %v8025_v7  ;;  %2164 = vperm.xlu1 %7702, %v6016_v10   ;;  %8059 = vrot.lane.b32.xlu0 %v8020_v8, %s10232_s25  ;;  %s8609_s25 = smov 112  }
 0xc0d   : > { %v2049_v24 = vsel %vm1792_vm11, %v8026_v12, %v8027_v11 }
 0xc0e   : > { %v8035_v13 = vpop.permute.xlu1 %8034  ;;  %v8030_v14 = vpop.permute.xlu0 %8029 }
 0xc0f   : > { %v8032_v15 = vunpack.i.h.bf16 %v8030_v14  ;;  %v8031_v16 = vunpack.i.l.bf16 %v8030_v14  ;;  %v8037_v19 = vunpack.i.h.bf16 %v8035_v13  ;;  %v8036_v21 = vunpack.i.l.bf16 %v8035_v13  ;;  %2188 = vperm.xlu1 %7702, %v6020_v17   ;;  %2169 = vperm.xlu0 %7701, %v6017_v18  }
 0xc11   : > { %v2050_v23 = vsel %vm1792_vm11, %v8031_v16, %v8032_v15  ;;  %v2051_v33 = vsel %vm1792_vm11, %v8036_v21, %v8037_v19 }
 0xc12   : > { %v8040_v26 = vpop.permute.xlu0 %8039  ;;  %v7167_v27 = vpack.c.bf16 %v2050_v23, %v2049_v24 }
 0xc13   : > { %v8042_v31 = vunpack.i.h.bf16 %v8040_v26  ;;  %v8041_v29 = vunpack.i.l.bf16 %v8040_v26  ;;  %2174 = vperm.xlu1 %7702, %v6018_v32   ;;  %2193 = vperm.xlu0 %7701, %v6021_v30  }
 0xc14   : > { %7168 = vmatprep.subr.bf16.mxu0 %v7167_v27 }
 0xc15   : > { %7170 = vmatpush3.bf16.msra.mxu0 %v7167_v27  ;;  %v2052_v34 = vsel %vm1792_vm11, %v8041_v29, %v8042_v31 }
 0xc16   : > { %v7171_v35 = vpack.c.bf16 %v2052_v34, %v2051_v33 }
 0xc17   : > { %2198 = vperm.xlu1 %7702, %v6022_v36   ;;  %2179 = vperm.xlu0 %7701, %v6019_v37  }
 0xc18   : > { %7172 = vmatprep.subr.bf16.mxu0 %v7171_v35 }
 0xc19   : > { %7174 = vmatpush3.bf16.msra.mxu0 %v7171_v35 }
 0xc1b   : > { %2203 = vperm.xlu0 %7701, %v6023_v38  }
 0xc75   : > { %v8045_v39 = vpop.permute.xlu1 %8044 }
 0xc76   : > { %v8047_v40 = vunpack.i.h.bf16 %v8045_v39  ;;  %v8046_v41 = vunpack.i.l.bf16 %v8045_v39 }
 0xc78   : > { %v7175_v42 = vpack.c.bf16 %v8047_v40, %v8046_v41 }
 0xc79   : > { %v8055_v43 = vpop.permute.xlu1 %8054  ;;  %v8050_v44 = vpop.permute.xlu0 %8049 }
 0xc7a   : > { %v8057_v45 = vunpack.i.h.bf16 %v8055_v43  ;;  %v8056_v0 = vunpack.i.l.bf16 %v8055_v43  ;;  %v8052_v46 = vunpack.i.h.bf16 %v8050_v44  ;;  %v8051_v47 = vunpack.i.l.bf16 %v8050_v44  ;;  %7176 = vmatprep.subr.bf16.mxu0 %v7175_v42 }
 0xc7b   : > { %7178 = vmatpush3.bf16.msra.mxu0 %v7175_v42  ;;  %v6028_v42 = vld [vmem:[%s10194_s3 + $0xc0] sm:$0xff] }
 0xc7c   : > { %v7179_v48 = vpack.c.bf16 %v8052_v46, %v8051_v47  ;;  %v7183_v52 = vpack.c.bf16 %v8057_v45, %v8056_v0  ;;  %6719 = vmatprep.mubr.msk.f32.mxu1 %vm520_vm2, %v6028_v42 }
 0xc7d   : > { %v8060_v49 = vpop.permute.xlu0 %8059 }
 0xc7e   : > { %v8062_v50 = vunpack.i.h.bf16 %v8060_v49  ;;  %v8061_v51 = vunpack.i.l.bf16 %v8060_v49  ;;  %7180 = vmatprep.subr.bf16.mxu0 %v7179_v48  ;;  %v6033_v49 = vld [vmem:[%s10195_s4 + $0x188] sm:$0xff] }
 0xc7f   : > { %7182 = vmatpush3.bf16.msra.mxu0 %v7179_v48  ;;  %v6036_v48 = vld [vmem:[%s10195_s4 + $0x1a0] sm:$0xff] }
 0xc80   : > { %7184 = vmatprep.subr.bf16.mxu0 %v7183_v52  ;;  %v7187_v53 = vpack.c.bf16 %v8062_v50, %v8061_v51 }
 0xc83   : > { %7186 = vmatpush3.bf16.msra.mxu0 %v7183_v52 }
 0xc84   : > { %7188 = vmatprep.subr.bf16.mxu0 %v7187_v53 }
 0xc87   : > { %7190 = vmatpush3.bf16.msra.mxu0 %v7187_v53 }
 0xc8a   : > { %6690 = vmatmul.mubr.msk.f32.vlgmr.msra.gmra.mrb[12].mxu0 %vm520_vm2, %v6013_v54  ;;  %v2165_v58 = vpop.permute.xlu1 %2164 }
 0xc8b   : > { %6692 = vmatprep.mubr.msk.f32.mxu0 %vm520_vm2, %v6014_v55 }
 0xc8e   : > { %6693 = vmatmul.mubr.msk.f32.gmra.mrb[14].mxu0 %vm520_vm2, %v6015_v56  ;;  %v2170_v57 = vpop.permute.xlu0 %2169  ;;  %v2189_v60 = vpop.permute.xlu1 %2188 }
 0xc92   : > { %v2194_v59 = vpop.permute.xlu0 %2193  ;;  %v2175_v1 = vpop.permute.xlu1 %2174 }
 0xc96   : > { %v2180_v61 = vpop.permute.xlu0 %2179  ;;  %v2199_v14 = vpop.permute.xlu1 %2198 }
 0xc9a   : > { %v2204_v11 = vpop.permute.xlu0 %2203 }
 0xd5d   : > { %v6691_v62 = vpop.f32.mrb[12].mxu0 }
 0xd5e   : > { %v2183_v2 = vmul.f32 %v6691_v62, %v2170_v57  ;;  %v2143_v3 = vpop.f32.mrb[13].mxu0 }
 0xd5f   : > { %v2182_v4 = vmul.f32 %v2165_v58, %v2143_v3  ;;  %v6034_v58 = vld [vmem:[%s10195_s4 + $0x190] sm:$0xff]  ;;  %v6039_v3 = vld [vmem:[%s10195_s4 + $0x1b8] sm:$0xff] }
 0xd60   : > { %v2207_v5 = vadd.f32 %v2194_v59, %v2183_v2  ;;  %v6037_v59 = vld [vmem:[%s10195_s4 + $0x1a8] sm:$0xff]  ;;  %v6035_v2 = vld [vmem:[%s10195_s4 + $0x198] sm:$0xff] }
 0xd61   : > { %v2206_v6 = vadd.f32 %v2189_v60, %v2182_v4  ;;  %v6694_v7 = vpop.f32.mrb[14].mxu0 }
 0xd62   : > { %v2211_v8 = vadd.f32 %v2207_v5, %v9120_v20  ;;  %v2185_v9 = vmul.f32 %v6694_v7, %v2180_v61  ;;  %v2153_v10 = vpop.f32.mrb[15].mxu0 }
 0xd63   : > { %v2210_v12 = vadd.f32 %v2206_v6, %v9125_v22  ;;  %v2184_v13 = vmul.f32 %v2175_v1, %v2153_v10  ;;  %v6038_v1 = vld [vmem:[%s10195_s4 + $0x1b0] sm:$0xff] }
 0xd64   : > { %vm2215_vm4 = vcmp.ge.f32.partialorder %v2211_v8, 0.0  ;;  %v2219_v15 = vmul.f32 0.2, %v2211_v8  ;;  %v2209_v16 = vadd.f32 %v2204_v11, %v2185_v9 }
 0xd65   : > { %vm2214_vm5 = vcmp.ge.f32.partialorder %v2210_v12, 0.0  ;;  %v2218_v17 = vmul.f32 0.2, %v2210_v12  ;;  %v2208_v18 = vadd.f32 %v2199_v14, %v2184_v13 }
 0xd66   : > { %v9264_v19 = vsel %vm2215_vm4, %v2211_v8, %v2219_v15  ;;  %v2213_v21 = vadd.f32 %v2209_v16, %v9130_v25  ;;  %vm2790_vm4 = vcmask 523264  }
 0xd67   : > { %2227 = vst.msk [vmem:[#allocation2 + $0x28] sm:$0xff] %vm421_vm0, %v9264_v19  ;;  %v9269_v20 = vsel %vm2214_vm5, %v2210_v12, %v2218_v17  ;;  %v2212_v24 = vadd.f32 %v2208_v18, %v9134_v28  ;;  %vm3269_vm5 = vcmask 261120  }
 0xd68   : > { %2226 = vst.msk [vmem:[#allocation2 + $0x8] sm:$0xff] %vm421_vm0, %v9269_v20  ;;  %vm2217_vm6 = vcmp.ge.f32.partialorder %v2213_v21, 0.0  ;;  %v2221_v22 = vmul.f32 0.2, %v2213_v21 }
 0xd69   : > { %vm2216_vm7 = vcmp.ge.f32.partialorder %v2212_v24, 0.0  ;;  %v2220_v23 = vmul.f32 0.2, %v2212_v24 }
 0xd6a   : > { %v9274_v26 = vsel %vm2217_vm6, %v2213_v21, %v2221_v22  ;;  %v6030_v22 = vld [vmem:[%s10194_s3 + $0xd0] sm:$0xff] }
 0xd6b   : > { %2229 = vst.msk [vmem:[#allocation2 + $0x68] sm:$0xff] %vm421_vm0, %v9274_v26  ;;  %v9278_v25 = vsel %vm2216_vm7, %v2212_v24, %v2220_v23  ;;  %v6029_v24 = vld [vmem:[%s10194_s3 + $0xc8] sm:$0xff]  ;;  %v6031_v23 = vld [vmem:[%s10194_s3 + $0xd8] sm:$0xff] }
 0xd6c   : > { %2228 = vst.msk [vmem:[#allocation2 + $0x48] sm:$0xff] %vm421_vm0, %v9278_v25 }
 0xd6e   : > { %v2248_v27 = vld [vmem:[#allocation2 + $0x28] sm:$0xff] }
 0xd6f   : > { %v2246_v28 = vld [vmem:[#allocation2 + $0x8] sm:$0xff]  ;;  %v8088_v35 = vpack.i.bf16 %v2248_v27, %v9059_v63 }
 0xd70   : > { %v8063_v31 = vpack.i.bf16 %v2248_v27, %v2246_v28  ;;  %v8083_v33 = vpack.i.bf16 %v2246_v28, %v9059_v63 }
 0xd72   : > { %8064 = vrot.lane.b32.xlu1 %v8063_v31, %s8607_s30  ;;  %v2252_v29 = vld [vmem:[#allocation2 + $0x68] sm:$0xff] }
 0xd73   : > { %v2250_v32 = vld [vmem:[#allocation2 + $0x48] sm:$0xff]  ;;  %v8098_v36 = vpack.i.bf16 %v2252_v29, %v9059_v63 }
 0xd74   : > { %v8068_v30 = vpack.i.bf16 %v2252_v29, %v2250_v32  ;;  %v8093_v34 = vpack.i.bf16 %v2250_v32, %v9059_v63  ;;  %v6032_v63 = vld [vmem:[%s10195_s4 + $0x180] sm:$0xff] }
 0xd76   : > { %8074 = vrot.lane.b32.xlu1 %v8063_v31, %s8609_s25  ;;  %8069 = vrot.lane.b32.xlu0 %v8068_v30, %s8607_s30 }
 0xd7a   : > { %8084 = vrot.lane.b32.xlu1 %v8083_v33, %s10216_s14  ;;  %8079 = vrot.lane.b32.xlu0 %v8068_v30, %s8609_s25 }
 0xd7e   : > { %8094 = vrot.lane.b32.xlu1 %v8093_v34, %s10216_s14  ;;  %8089 = vrot.lane.b32.xlu0 %v8088_v35, %s10216_s14 }
 0xd82   : > { %8099 = vrot.lane.b32.xlu0 %v8098_v36, %s10216_s14 }
 0xde4   : > { %v8065_v37 = vpop.permute.xlu1 %8064 }
 0xde5   : > { %8104 = vrot.lane.b32.xlu1 %v8065_v37, %s10216_s14 }
 0xde8   : > { %v8075_v38 = vpop.permute.xlu1 %8074  ;;  %v8070_v39 = vpop.permute.xlu0 %8069 }
 0xde9   : > { %8114 = vrot.lane.b32.xlu1 %v8075_v38, %s10216_s14  ;;  %8109 = vrot.lane.b32.xlu0 %v8070_v39, %s10216_s14 }
 0xdec   : > { %v8085_v40 = vpop.permute.xlu1 %8084  ;;  %v8080_v41 = vpop.permute.xlu0 %8079 }
 0xded   : > { %v8087_v43 = vunpack.i.h.bf16 %v8085_v40  ;;  %v8086_v44 = vunpack.i.l.bf16 %v8085_v40  ;;  %2424 = vperm.xlu1 %7702, %v6032_v63   ;;  %8119 = vrot.lane.b32.xlu0 %v8080_v41, %s10216_s14 }
 0xdef   : > { %v2309_v52 = vsel %vm403_vm8, %v8086_v44, %v8087_v43 }
 0xdf0   : > { %v8095_v45 = vpop.permute.xlu1 %8094  ;;  %v8090_v0 = vpop.permute.xlu0 %8089 }
 0xdf1   : > { %v8092_v46 = vunpack.i.h.bf16 %v8090_v0  ;;  %v8091_v47 = vunpack.i.l.bf16 %v8090_v0  ;;  %v8097_v50 = vunpack.i.h.bf16 %v8095_v45  ;;  %v8096_v51 = vunpack.i.l.bf16 %v8095_v45  ;;  %2448 = vperm.xlu1 %7702, %v6036_v48   ;;  %2429 = vperm.xlu0 %7701, %v6033_v49  }
 0xdf3   : > { %v2310_v53 = vsel %vm403_vm8, %v8091_v47, %v8092_v46  ;;  %v2311_v60 = vsel %vm403_vm8, %v8096_v51, %v8097_v50 }
 0xdf4   : > { %v8100_v54 = vpop.permute.xlu0 %8099  ;;  %v7191_v55 = vpack.c.bf16 %v2310_v53, %v2309_v52 }
 0xdf5   : > { %v8102_v56 = vunpack.i.h.bf16 %v8100_v54  ;;  %v8101_v57 = vunpack.i.l.bf16 %v8100_v54  ;;  %2434 = vperm.xlu1 %7702, %v6034_v58   ;;  %2453 = vperm.xlu0 %7701, %v6037_v59   ;;  %v9357_v59 = vld [vmem:[#allocation2] sm:$0xff] }
 0xdf6   : > { %7192 = vmatprep.subr.bf16.mxu1 %v7191_v55 }
 0xdf7   : > { %7194 = vmatpush3.bf16.msra.mxu1 %v7191_v55  ;;  %v2312_v61 = vsel %vm403_vm8, %v8101_v57, %v8102_v56 }
 0xdf8   : > { %v7195_v62 = vpack.c.bf16 %v2312_v61, %v2311_v60 }
 0xdf9   : > { %2458 = vperm.xlu1 %7702, %v6038_v1   ;;  %2439 = vperm.xlu0 %7701, %v6035_v2  }
 0xdfa   : > { %7196 = vmatprep.subr.bf16.mxu1 %v7195_v62 }
 0xdfb   : > { %7198 = vmatpush3.bf16.msra.mxu1 %v7195_v62 }
 0xdfd   : > { %2463 = vperm.xlu0 %7701, %v6039_v3  }
 0xe57   : > { %v8105_v4 = vpop.permute.xlu1 %8104 }
 0xe58   : > { %v8107_v5 = vunpack.i.h.bf16 %v8105_v4  ;;  %v8106_v6 = vunpack.i.l.bf16 %v8105_v4 }
 0xe5a   : > { %v7199_v7 = vpack.c.bf16 %v8107_v5, %v8106_v6 }
 0xe5b   : > { %v8115_v8 = vpop.permute.xlu1 %8114  ;;  %v8110_v9 = vpop.permute.xlu0 %8109 }
 0xe5c   : > { %v8117_v10 = vunpack.i.h.bf16 %v8115_v8  ;;  %v8116_v11 = vunpack.i.l.bf16 %v8115_v8  ;;  %v8112_v12 = vunpack.i.h.bf16 %v8110_v9  ;;  %v8111_v13 = vunpack.i.l.bf16 %v8110_v9  ;;  %7200 = vmatprep.subr.bf16.mxu1 %v7199_v7  ;;  %v6048_v8 = vld [vmem:[%s10195_s4 + $0x1c0] sm:$0xff] }
 0xe5d   : > { %7202 = vmatpush3.bf16.msra.mxu1 %v7199_v7  ;;  %v6044_v7 = vld [vmem:[%s10194_s3 + $0xe0] sm:$0xff] }
 0xe5e   : > { %v7203_v14 = vpack.c.bf16 %v8112_v12, %v8111_v13  ;;  %v7207_v18 = vpack.c.bf16 %v8117_v10, %v8116_v11  ;;  %6749 = vmatprep.mubr.msk.f32.mxu0 %vm520_vm2, %v6044_v7 }
 0xe5f   : > { %v8120_v15 = vpop.permute.xlu0 %8119 }
 0xe60   : > { %v8122_v16 = vunpack.i.h.bf16 %v8120_v15  ;;  %v8121_v17 = vunpack.i.l.bf16 %v8120_v15  ;;  %7204 = vmatprep.subr.bf16.mxu1 %v7203_v14  ;;  %v6052_v15 = vld [vmem:[%s10195_s4 + $0x1e0] sm:$0xff] }
 0xe61   : > { %7206 = vmatpush3.bf16.msra.mxu1 %v7203_v14 }
 0xe62   : > { %7208 = vmatprep.subr.bf16.mxu1 %v7207_v18  ;;  %v7211_v21 = vpack.c.bf16 %v8122_v16, %v8121_v17  ;;  %v6049_v16 = vld [vmem:[%s10195_s4 + $0x1c8] sm:$0xff] }
 0xe65   : > { %7210 = vmatpush3.bf16.msra.mxu1 %v7207_v18 }
 0xe66   : > { %7212 = vmatprep.subr.bf16.mxu1 %v7211_v21 }
 0xe69   : > { %7214 = vmatpush3.bf16.msra.mxu1 %v7211_v21 }
 0xe6c   : > { %6720 = vmatmul.mubr.msk.f32.vlgmr.msra.gmra.mrb[12].mxu1 %vm520_vm2, %v6029_v24  ;;  %v2425_v28 = vpop.permute.xlu1 %2424 }
 0xe6d   : > { %6722 = vmatprep.mubr.msk.f32.mxu1 %vm520_vm2, %v6030_v22 }
 0xe70   : > { %6723 = vmatmul.mubr.msk.f32.gmra.mrb[14].mxu1 %vm520_vm2, %v6031_v23  ;;  %v2430_v27 = vpop.permute.xlu0 %2429  ;;  %v2449_v29 = vpop.permute.xlu1 %2448 }
 0xe74   : > { %v2454_v31 = vpop.permute.xlu0 %2453  ;;  %v2435_v33 = vpop.permute.xlu1 %2434 }
 0xe78   : > { %v2440_v32 = vpop.permute.xlu0 %2439  ;;  %v2459_v45 = vpop.permute.xlu1 %2458 }
 0xe7c   : > { %v2464_v63 = vpop.permute.xlu0 %2463 }
 0xf3f   : > { %v6721_v30 = vpop.f32.mrb[12].mxu1 }
 0xf40   : > { %v2443_v34 = vmul.f32 %v6721_v30, %v2430_v27  ;;  %v2403_v35 = vpop.f32.mrb[13].mxu1 }
 0xf41   : > { %v2442_v36 = vmul.f32 %v2425_v28, %v2403_v35  ;;  %v6051_v35 = vld [vmem:[%s10195_s4 + $0x1d8] sm:$0xff] }
 0xf42   : > { %v2467_v37 = vadd.f32 %v2454_v31, %v2443_v34  ;;  %v6050_v31 = vld [vmem:[%s10195_s4 + $0x1d0] sm:$0xff] }
 0xf43   : > { %v2466_v38 = vadd.f32 %v2449_v29, %v2442_v36  ;;  %v6724_v39 = vpop.f32.mrb[14].mxu1  ;;  %v6053_v29 = vld [vmem:[%s10195_s4 + $0x1e8] sm:$0xff]  ;;  %v6054_v34 = vld [vmem:[%s10195_s4 + $0x1f0] sm:$0xff]  ;;  %v6055_v36 = vld [vmem:[%s10195_s4 + $0x1f8] sm:$0xff] }
 0xf44   : > { %vm2471_vm9 = vcmp.ge.f32.partialorder %v2467_v37, 0.0  ;;  %v2475_v40 = vmul.f32 0.2, %v2467_v37  ;;  %v2445_v41 = vmul.f32 %v6724_v39, %v2440_v32  ;;  %v2413_v42 = vpop.f32.mrb[15].mxu1 }
 0xf45   : > { %vm2470_vm10 = vcmp.ge.f32.partialorder %v2466_v38, 0.0  ;;  %v2474_v43 = vmul.f32 0.2, %v2466_v38  ;;  %v2444_v44 = vmul.f32 %v2435_v33, %v2413_v42 }
 0xf46   : > { %v2479_v0 = vsel %vm2471_vm9, %v2467_v37, %v2475_v40  ;;  %v2469_v46 = vadd.f32 %v2464_v63, %v2445_v41 }
 0xf47   : > { %2483 = vst.msk [vmem:[#allocation2 + $0x28] sm:$0xff] %vm421_vm0, %v2479_v0  ;;  %v2478_v47 = vsel %vm2470_vm10, %v2466_v38, %v2474_v43  ;;  %v2468_v48 = vadd.f32 %v2459_v45, %v2444_v44 }
 0xf48   : > { %2482 = vst.msk [vmem:[#allocation2 + $0x8] sm:$0xff] %vm421_vm0, %v2478_v47  ;;  %vm2473_vm11 = vcmp.ge.f32.partialorder %v2469_v46, 0.0  ;;  %v2477_v49 = vmul.f32 0.2, %v2469_v46 }
 0xf49   : > { %vm2472_vm12 = vcmp.ge.f32.partialorder %v2468_v48, 0.0  ;;  %v2476_v50 = vmul.f32 0.2, %v2468_v48 }
 0xf4a   : > { %v2481_v51 = vsel %vm2473_vm11, %v2469_v46, %v2477_v49 }
 0xf4b   : > { %2485 = vst.msk [vmem:[#allocation2 + $0x68] sm:$0xff] %vm421_vm0, %v2481_v51  ;;  %v2480_v52 = vsel %vm2472_vm12, %v2468_v48, %v2476_v50  ;;  %v6045_v51 = vld [vmem:[%s10194_s3 + $0xe8] sm:$0xff] }
 0xf4c   : > { %2484 = vst.msk [vmem:[#allocation2 + $0x48] sm:$0xff] %vm421_vm0, %v2480_v52  ;;  %v6046_v52 = vld [vmem:[%s10194_s3 + $0xf0] sm:$0xff] }
 0xf4e   : > { %v2504_v53 = vld [vmem:[#allocation2 + $0x28] sm:$0xff] }
 0xf4f   : > { %v2502_v54 = vld [vmem:[#allocation2 + $0x8] sm:$0xff]  ;;  %v8148_v62 = vpack.i.bf16 %v2504_v53, %v9357_v59 }
 0xf50   : > { %v8123_v55 = vpack.i.bf16 %v2504_v53, %v2502_v54  ;;  %v8143_v60 = vpack.i.bf16 %v2502_v54, %v9357_v59  ;;  %v6047_v53 = vld [vmem:[%s10194_s3 + $0xf8] sm:$0xff] }
 0xf52   : > { %8124 = vrot.lane.b32.xlu1 %v8123_v55, %s8607_s30  ;;  %v2508_v56 = vld [vmem:[#allocation2 + $0x68] sm:$0xff] }
 0xf53   : > { %v2506_v57 = vld [vmem:[#allocation2 + $0x48] sm:$0xff]  ;;  %v8158_v1 = vpack.i.bf16 %v2508_v56, %v9357_v59 }
 0xf54   : > { %v8128_v58 = vpack.i.bf16 %v2508_v56, %v2506_v57  ;;  %v8153_v61 = vpack.i.bf16 %v2506_v57, %v9357_v59 }
 0xf56   : > { %8134 = vrot.lane.b32.xlu1 %v8123_v55, %s8609_s25  ;;  %8129 = vrot.lane.b32.xlu0 %v8128_v58, %s8607_s30  ;;  %s5929_s30 = sshll.u32 %s392_s1, 1 }
 0xf57   : > { %s394_s14 = scalar_lea.vmem [#allocation6], %s5929_s30 }
 0xf58   : > { %s5852_s13 = sshll.u32 %s394_s14, 4  ;;  %s10151_s13 = int_to_ptr.vmem [resolvable:$true] %s5852_s13 }
 0xf59   : > { %s8529_s24 = scalar_lea.vmem %s10151_s13, 32 }
 0xf5a   : > { %8144 = vrot.lane.b32.xlu1 %v8143_v60, %s10233_s16  ;;  %8139 = vrot.lane.b32.xlu0 %v8128_v58, %s8609_s25  ;;  %s6192_s25 = sshll.u32 %s8696_s21, 5  ;;  %p8530_p6 = scmp.ne.s32.totalorder %s10151_s13, %s8529_s24 }
 0xf5b   : > { %s8614_s21 = smov [#allocation6]  }
 0xf5c   : > { %p8531_p10 = pnand %p8530_p6, %p10236_p9 }
 0xf5e   : > { %8154 = vrot.lane.b32.xlu1 %v8153_v61, %s10233_s16  ;;  %8149 = vrot.lane.b32.xlu0 %v8148_v62, %s10233_s16  ;;  %p8532_p12 = pneg %p8531_p10 }
 0xf62   : > { %8159 = vrot.lane.b32.xlu0 %v8158_v1, %s10233_s16 }
 0xfc4   : > { %v8125_v2 = vpop.permute.xlu1 %8124 }
 0xfc5   : > { %8164 = vrot.lane.b32.xlu1 %v8125_v2, %s10233_s16 }
 0xfc8   : > { %v8135_v3 = vpop.permute.xlu1 %8134  ;;  %v8130_v4 = vpop.permute.xlu0 %8129 }
 0xfc9   : > { %8174 = vrot.lane.b32.xlu1 %v8135_v3, %s10233_s16  ;;  %8169 = vrot.lane.b32.xlu0 %v8130_v4, %s10233_s16 }
 0xfcc   : > { %v8145_v5 = vpop.permute.xlu1 %8144  ;;  %v8140_v6 = vpop.permute.xlu0 %8139 }
 0xfcd   : > { %v8147_v9 = vunpack.i.h.bf16 %v8145_v5  ;;  %v8146_v10 = vunpack.i.l.bf16 %v8145_v5  ;;  %2680 = vperm.xlu1 %7702, %v6048_v8   ;;  %8179 = vrot.lane.b32.xlu0 %v8140_v6, %s10233_s16  ;;  %s10234_s16 = smov 127  }
 0xfcf   : > { %v2565_v21 = vsel %vm403_vm8, %v8146_v10, %v8147_v9 }
 0xfd0   : > { %v8155_v11 = vpop.permute.xlu1 %8154  ;;  %v8150_v12 = vpop.permute.xlu0 %8149 }
 0xfd1   : > { %v8152_v13 = vunpack.i.h.bf16 %v8150_v12  ;;  %v8151_v14 = vunpack.i.l.bf16 %v8150_v12  ;;  %v8157_v17 = vunpack.i.h.bf16 %v8155_v11  ;;  %v8156_v18 = vunpack.i.l.bf16 %v8155_v11  ;;  %2704 = vperm.xlu1 %7702, %v6052_v15   ;;  %2685 = vperm.xlu0 %7701, %v6049_v16  }
 0xfd3   : > { %v2566_v24 = vsel %vm403_vm8, %v8151_v14, %v8152_v13  ;;  %v2567_v32 = vsel %vm403_vm8, %v8156_v18, %v8157_v17 }
 0xfd4   : > { %v8160_v22 = vpop.permute.xlu0 %8159  ;;  %v7215_v23 = vpack.c.bf16 %v2566_v24, %v2565_v21 }
 0xfd5   : > { %v8162_v27 = vunpack.i.h.bf16 %v8160_v22  ;;  %v8161_v28 = vunpack.i.l.bf16 %v8160_v22  ;;  %2690 = vperm.xlu1 %7702, %v6050_v31   ;;  %2709 = vperm.xlu0 %7701, %v6053_v29  }
 0xfd6   : > { %7216 = vmatprep.subr.bf16.mxu0 %v7215_v23 }
 0xfd7   : > { %7218 = vmatpush3.bf16.msra.mxu0 %v7215_v23  ;;  %v2568_v30 = vsel %vm403_vm8, %v8161_v28, %v8162_v27 }
 0xfd8   : > { %v7219_v33 = vpack.c.bf16 %v2568_v30, %v2567_v32 }
 0xfd9   : > { %2714 = vperm.xlu1 %7702, %v6054_v34   ;;  %2695 = vperm.xlu0 %7701, %v6051_v35  }
 0xfda   : > { %7220 = vmatprep.subr.bf16.mxu0 %v7219_v33 }
 0xfdb   : > { %7222 = vmatpush3.bf16.msra.mxu0 %v7219_v33 }
 0xfdd   : > { %2719 = vperm.xlu0 %7701, %v6055_v36  }
0x1037   : > { %v8165_v37 = vpop.permute.xlu1 %8164 }
0x1038   : > { %v8167_v38 = vunpack.i.h.bf16 %v8165_v37  ;;  %v8166_v39 = vunpack.i.l.bf16 %v8165_v37 }
0x103a   : > { %v7223_v40 = vpack.c.bf16 %v8167_v38, %v8166_v39  ;;  %v3201_v38 = vld [vmem:[%s10197_s6 + $0x8] sm:$0xff]  ;;  %v3200_v39 = vld [vmem:[%s10197_s6] sm:$0xff] }
0x103b   : > { %v8175_v41 = vpop.permute.xlu1 %8174  ;;  %v8170_v42 = vpop.permute.xlu0 %8169 }
0x103c   : > { %v8177_v63 = vunpack.i.h.bf16 %v8175_v41  ;;  %v8176_v43 = vunpack.i.l.bf16 %v8175_v41  ;;  %v8172_v44 = vunpack.i.h.bf16 %v8170_v42  ;;  %v8171_v45 = vunpack.i.l.bf16 %v8170_v42  ;;  %7224 = vmatprep.subr.bf16.mxu0 %v7223_v40  ;;  %v6080_v41 = vld [vmem:[%s10197_s6 + $0x20] sm:$0xff]  ;;  %v3203_v42 = vld [vmem:[%s10197_s6 + $0x18] sm:$0xff] }
0x103d   : > { %7226 = vmatpush3.bf16.msra.mxu0 %v7223_v40  ;;  %v6081_v40 = vld [vmem:[%s10197_s6 + $0x28] sm:$0xff] }
0x103e   : > { %v7227_v0 = vpack.c.bf16 %v8172_v44, %v8171_v45  ;;  %v7231_v49 = vpack.c.bf16 %v8177_v63, %v8176_v43  ;;  %v3202_v63 = vld [vmem:[%s10197_s6 + $0x10] sm:$0xff]  ;;  %v6083_v43 = vld [vmem:[%s10197_s6 + $0x38] sm:$0xff]  ;;  %v3002_v45 = vld [vmem:[%s10198_s7] sm:$0xff] }
0x103f   : > { %v8180_v46 = vpop.permute.xlu0 %8179  ;;  %v6082_v44 = vld [vmem:[%s10197_s6 + $0x30] sm:$0xff] }
0x1040   : > { %v8182_v47 = vunpack.i.h.bf16 %v8180_v46  ;;  %v8181_v48 = vunpack.i.l.bf16 %v8180_v46  ;;  %7228 = vmatprep.subr.bf16.mxu0 %v7227_v0 }
0x1041   : > { %7230 = vmatpush3.bf16.msra.mxu0 %v7227_v0  ;;  %v3003_v0 = vld [vmem:[%s10198_s7 + $0x10] sm:$0xff] }
0x1042   : > { %7232 = vmatprep.subr.bf16.mxu0 %v7231_v49  ;;  %v7235_v50 = vpack.c.bf16 %v8182_v47, %v8181_v48  ;;  %v9476_v46 = vpack.c.bf16 %v3003_v0, %v3002_v45 }
0x1045   : > { %7234 = vmatpush3.bf16.msra.mxu0 %v7231_v49 }
0x1046   : > { %7236 = vmatprep.subr.bf16.mxu0 %v7235_v50 }
0x1049   : > { %7238 = vmatpush3.bf16.msra.mxu0 %v7235_v50 }
0x104a   : > { %7276 = vmatprep.subr.bf16.mxu0 %v9476_v46 }
0x104c   : > { %6750 = vmatmul.mubr.msk.f32.vlgmr.msra.gmra.mrb[16].mxu0 %vm520_vm2, %v6045_v51  ;;  %v2681_v55 = vpop.permute.xlu1 %2680 }
0x104d   : > { %6752 = vmatprep.mubr.msk.f32.mxu0 %vm520_vm2, %v6046_v52  ;;  %7278 = vmatpush3.bf16.msra.mxu0 %v9476_v46 }
0x1050   : > { %6753 = vmatmul.mubr.msk.f32.gmra.mrb[18].mxu0 %vm520_vm2, %v6047_v53  ;;  %v2686_v54 = vpop.permute.xlu0 %2685  ;;  %v2705_v57 = vpop.permute.xlu1 %2704 }
0x1054   : > { %v2710_v56 = vpop.permute.xlu0 %2709  ;;  %v2691_v61 = vpop.permute.xlu1 %2690 }
0x1058   : > { %v2696_v58 = vpop.permute.xlu0 %2695  ;;  %v2715_v12 = vpop.permute.xlu1 %2714 }
0x105c   : > { %v2720_v9 = vpop.permute.xlu0 %2719 }
0x111f   : > { %v6751_v60 = vpop.f32.mrb[16].mxu0 }
0x1120   : > { %v2699_v62 = vmul.f32 %v6751_v60, %v2686_v54  ;;  %v2659_v1 = vpop.f32.mrb[17].mxu0 }
0x1121   : > { %v2698_v2 = vmul.f32 %v2681_v55, %v2659_v1 }
0x1122   : > { %v2723_v3 = vadd.f32 %v2710_v56, %v2699_v62 }
0x1123   : > { %v2722_v4 = vadd.f32 %v2705_v57, %v2698_v2  ;;  %v6754_v5 = vpop.f32.mrb[18].mxu0 }
0x1124   : > { %v2727_v6 = vadd.f32 %v2723_v3, %v9264_v19  ;;  %v2701_v7 = vmul.f32 %v6754_v5, %v2696_v58  ;;  %v2669_v8 = vpop.f32.mrb[19].mxu0  ;;  %v2755_v5 = vld [vmem:[%s10196_s5 + $0x8] sm:$0xff] }
0x1125   : > { %v2726_v10 = vadd.f32 %v2722_v4, %v9269_v20  ;;  %v2700_v11 = vmul.f32 %v2691_v61, %v2669_v8 }
0x1126   : > { %vm2731_vm2 = vcmp.ge.f32.partialorder %v2727_v6, 0.0  ;;  %v2735_v13 = vmul.f32 0.2, %v2727_v6  ;;  %v2725_v14 = vadd.f32 %v2720_v9, %v2701_v7 }
0x1127   : > { %vm2730_vm13 = vcmp.ge.f32.partialorder %v2726_v10, 0.0  ;;  %v2734_v15 = vmul.f32 0.2, %v2726_v10  ;;  %v2724_v16 = vadd.f32 %v2715_v12, %v2700_v11  ;;  %v6064_v11 = vld [vmem:[%s10196_s5 + $0x20] sm:$0xff] }
0x1128   : > { %v2739_v17 = vsel %vm2731_vm2, %v2727_v6, %v2735_v13  ;;  %v2729_v18 = vadd.f32 %v2725_v14, %v9274_v26  ;;  %v2756_v6 = vld [vmem:[%s10196_s5 + $0x10] sm:$0xff] }
0x1129   : > { %2743 = vst.msk [vmem:[#allocation2 + $0x28] sm:$0xff] %vm421_vm0, %v2739_v17  ;;  %v2738_v21 = vsel %vm2730_vm13, %v2726_v10, %v2734_v15  ;;  %v2728_v19 = vadd.f32 %v2724_v16, %v9278_v25  ;;  %v2754_v25 = vld [vmem:[%s10196_s5] sm:$0xff]  ;;  %v2757_v10 = vld [vmem:[%s10196_s5 + $0x18] sm:$0xff]  ;;  %v6065_v16 = vld [vmem:[%s10196_s5 + $0x28] sm:$0xff] }
0x112a   : > { %2742 = vst.msk [vmem:[#allocation2 + $0x8] sm:$0xff] %vm421_vm0, %v2738_v21  ;;  %vm2733_vm14 = vcmp.ge.f32.partialorder %v2729_v18, 0.0  ;;  %v2737_v20 = vmul.f32 0.2, %v2729_v18  ;;  %6771 = vmatprep.mubr.msk.f32.mxu1 %vm2790_vm4, %v2754_v25  ;;  %v6066_v17 = vld [vmem:[%s10196_s5 + $0x30] sm:$0xff]  ;;  %v3004_v21 = vld [vmem:[#allocation3] sm:$0xff] }
0x112b   : > { %vm2732_vm3 = vcmp.ge.f32.partialorder %v2728_v19, 0.0  ;;  %v2736_v24 = vmul.f32 0.2, %v2728_v19 }
0x112c   : > { %v2741_v22 = vsel %vm2733_vm14, %v2729_v18, %v2737_v20  ;;  %v6067_v18 = vld [vmem:[%s10196_s5 + $0x38] sm:$0xff] }
0x112d   : > { %2745 = vst.msk [vmem:[#allocation2 + $0x68] sm:$0xff] %vm421_vm0, %v2741_v22  ;;  %v2740_v23 = vsel %vm2732_vm3, %v2728_v19, %v2736_v24  ;;  %v3005_v19 = vld [vmem:[#allocation3 + $0x10] sm:$0xff] }
0x112e   : > { %2744 = vst.msk [vmem:[#allocation2 + $0x48] sm:$0xff] %vm421_vm0, %v2740_v23  ;;  %v9516_v20 = vpack.c.bf16 %v3005_v19, %v3004_v21  ;;  %v6112_v21 = vld [vmem:[%s10197_s6 + $0x60] sm:$0xff]  ;;  %v6109_v19 = vld [vmem:[%s10197_s6 + $0x48] sm:$0xff] }
0x1130   : > { %v2747_v27 = vld [vmem:[#allocation2 + $0x28] sm:$0xff] }
0x1131   : > { %v8183_v26 = vpack.i.bf16 %v2747_v27, %v9357_v59  ;;  %v2746_v28 = vld [vmem:[#allocation2 + $0x8] sm:$0xff] }
0x1132   : > { %v8188_v31 = vpack.i.bf16 %v2746_v28, %v9357_v59  ;;  %v9426_v29 = vpack.c.bf16 %v2747_v27, %v2746_v28  ;;  %v8203_v37 = vpack.i.bf16 %v2747_v27, %v2746_v28 }
0x1133   : > { %8184 = vrot.lane.b32.xlu0 %v8183_v26, %s10231_s12 }
0x1134   : > { %8189 = vrot.lane.b32.xlu1 %v8188_v31, %s10231_s12  ;;  %7240 = vmatprep.subr.bf16.mxu1 %v9426_v29  ;;  %v2749_v32 = vld [vmem:[#allocation2 + $0x68] sm:$0xff] }
0x1135   : > { %7242 = vmatpush3.bf16.msra.mxu1 %v9426_v29  ;;  %v8198_v30 = vpack.i.bf16 %v2749_v32, %v9357_v59  ;;  %v2748_v33 = vld [vmem:[#allocation2 + $0x48] sm:$0xff] }
0x1136   : > { %v8193_v34 = vpack.i.bf16 %v2748_v33, %v9357_v59  ;;  %v9438_v35 = vpack.c.bf16 %v2749_v32, %v2748_v33  ;;  %v8208_v36 = vpack.i.bf16 %v2749_v32, %v2748_v33 }
0x1137   : > { %8199 = vrot.lane.b32.xlu0 %v8198_v30, %s10231_s12 }
0x1138   : > { %8194 = vrot.lane.b32.xlu1 %v8193_v34, %s10231_s12  ;;  %7244 = vmatprep.subr.bf16.mxu1 %v9438_v35 }
0x1139   : > { %7246 = vmatpush3.bf16.msra.mxu1 %v9438_v35 }
0x113b   : > { %8209 = vrot.lane.b32.xlu0 %v8208_v36, %s10234_s16 }
0x113c   : > { %8204 = vrot.lane.b32.xlu1 %v8203_v37, %s10234_s16 }
0x113f   : > { %3211 = vperm.xlu0 %7701, %v3201_v38  }
0x1140   : > { %3206 = vperm.xlu1 %7702, %v3200_v39  }
0x1143   : > { %3240 = vperm.xlu0 %7701, %v6081_v40  }
0x1144   : > { %3235 = vperm.xlu1 %7702, %v6080_v41  }
0x1147   : > { %3221 = vperm.xlu0 %7701, %v3203_v42  }
0x1148   : > { %3216 = vperm.xlu1 %7702, %v3202_v63  }
0x114b   : > { %3250 = vperm.xlu0 %7701, %v6083_v43  }
0x114c   : > { %3245 = vperm.xlu1 %7702, %v6082_v44  }
0x11a5   : > { %v8185_v47 = vpop.permute.xlu0 %8184 }
0x11a6   : > { %v8187_v48 = vunpack.i.h.bf16 %v8185_v47  ;;  %v8186_v49 = vunpack.i.l.bf16 %v8185_v47  ;;  %v8190_v50 = vpop.permute.xlu1 %8189 }
0x11a7   : > { %v8192_v51 = vunpack.i.h.bf16 %v8190_v50  ;;  %v8191_v52 = vunpack.i.l.bf16 %v8190_v50 }
0x11a8   : > { %v2783_v53 = vsel %vm503_vm1, %v8186_v49, %v8187_v48 }
0x11a9   : > { %v8200_v54 = vpop.permute.xlu0 %8199  ;;  %v2782_v55 = vsel %vm503_vm1, %v8191_v52, %v8192_v51 }
0x11aa   : > { %v8202_v56 = vunpack.i.h.bf16 %v8200_v54  ;;  %v8201_v57 = vunpack.i.l.bf16 %v8200_v54  ;;  %v8195_v58 = vpop.permute.xlu1 %8194  ;;  %v7247_v60 = vpack.c.bf16 %v2783_v53, %v2782_v55 }
0x11ab   : > { %v8197_v61 = vunpack.i.h.bf16 %v8195_v58  ;;  %v8196_v62 = vunpack.i.l.bf16 %v8195_v58 }
0x11ac   : > { %7248 = vmatprep.subr.bf16.mxu1 %v7247_v60  ;;  %v2785_v1 = vsel %vm503_vm1, %v8201_v57, %v8202_v56 }
0x11ad   : > { %7250 = vmatpush3.bf16.msra.mxu1 %v7247_v60  ;;  %v2784_v2 = vsel %vm503_vm1, %v8196_v62, %v8197_v61  ;;  %v8210_v9 = vpop.permute.xlu0 %8209 }
0x11ae   : > { %v7251_v3 = vpack.c.bf16 %v2785_v1, %v2784_v2  ;;  %v8205_v4 = vpop.permute.xlu1 %8204  ;;  %v8212_v12 = vunpack.i.h.bf16 %v8210_v9  ;;  %v8211_v13 = vunpack.i.l.bf16 %v8210_v9 }
0x11af   : > { %v8207_v7 = vunpack.i.h.bf16 %v8205_v4  ;;  %v8206_v8 = vunpack.i.l.bf16 %v8205_v4 }
0x11b0   : > { %7252 = vmatprep.subr.bf16.mxu1 %v7251_v3  ;;  %v7267_v15 = vpack.c.bf16 %v8212_v12, %v8211_v13 }
0x11b1   : > { %7254 = vmatpush3.bf16.msra.mxu1 %v7251_v3  ;;  %v7263_v14 = vpack.c.bf16 %v8207_v7, %v8206_v8 }
0x11b2   : > { %7256 = vmatprep.subr.bf16.mxu1 %v9426_v29 }
0x11b4   : > { %6772 = vmatmul.mubr.msk.f32.vlgmr.msra.gmra.mrb[16].mxu1 %vm2790_vm4, %v2755_v5  ;;  %v6092_v5 = vld [vmem:[%s10196_s5 + $0x60] sm:$0xff] }
0x11b5   : > { %7258 = vmatpush3.bf16.msra.mxu1 %v9426_v29  ;;  %6774 = vmatprep.mubr.msk.f32.mxu1 %vm2790_vm4, %v2756_v6 }
0x11b6   : > { %7260 = vmatprep.subr.bf16.mxu1 %v9438_v35 }
0x11b8   : > { %6775 = vmatmul.mubr.msk.f32.gmra.mrb[18].mxu1 %vm2790_vm4, %v2757_v10 }
0x11b9   : > { %7262 = vmatpush3.bf16.msra.mxu1 %v9438_v35  ;;  %6793 = vmatprep.mubr.msk.f32.mxu1 %vm2790_vm4, %v6064_v11 }
0x11ba   : > { %7264 = vmatprep.subr.bf16.mxu1 %v7263_v14 }
0x11bd   : > { %7266 = vmatpush3.bf16.msra.mxu1 %v7263_v14  ;;  %v6084_v14 = vld [vmem:[%s10196_s5 + $0x40] sm:$0xff] }
0x11be   : > { %7268 = vmatprep.subr.bf16.mxu1 %v7267_v15  ;;  %v3212_v34 = vpop.permute.xlu0 %3211 }
0x11bf   : > { %v3207_v35 = vpop.permute.xlu1 %3206 }
0x11c1   : > { %7270 = vmatpush3.bf16.msra.mxu1 %v7267_v15 }
0x11c2   : > { %7272 = vmatprep.subr.bf16.mxu1 %v9516_v20  ;;  %v3241_v36 = vpop.permute.xlu0 %3240 }
0x11c3   : > { %v3236_v37 = vpop.permute.xlu1 %3235 }
0x11c4   : > { %6794 = vmatmul.mubr.msk.f32.vlgmr.msra.gmra.mrb[20].mxu1 %vm2790_vm4, %v6065_v16 }
0x11c5   : > { %6796 = vmatprep.mubr.msk.f32.mxu1 %vm2790_vm4, %v6066_v17  ;;  %7274 = vmatpush3.bf16.msra.mxu1 %v9516_v20  ;;  %v6108_v17 = vld [vmem:[%s10197_s6 + $0x40] sm:$0xff] }
0x11c6   : > { %v3222_v41 = vpop.permute.xlu0 %3221 }
0x11c7   : > { %v3217_v63 = vpop.permute.xlu1 %3216 }
0x11c8   : > { %6797 = vmatmul.mubr.msk.f32.gmra.mrb[22].mxu1 %vm2790_vm4, %v6067_v18 }
0x11ca   : > { %v3251_v53 = vpop.permute.xlu0 %3250 }
0x11cb   : > { %v3246_v56 = vpop.permute.xlu1 %3245 }
0x1287   : > { %v6773_v24 = vpop.f32.mrb[16].mxu1 }
0x1288   : > { %v2869_v22 = vpop.f32.mrb[17].mxu1 }
0x1289   : > { %6813 = vmatprep.mubr.msk.f32.mxu0 %vm421_vm0, %v2869_v22  ;;  %v6113_v22 = vld [vmem:[%s10197_s6 + $0x68] sm:$0xff] }
0x128a   : > { %6814 = vmatmul.mubr.msk.f32.vlgmr.msra.gmra.mrb[20].mxu0 %vm421_vm0, %v6773_v24  ;;  %v6110_v24 = vld [vmem:[%s10197_s6 + $0x50] sm:$0xff] }
0x128b   : > { %v6776_v23 = vpop.f32.mrb[18].mxu1 }
0x128c   : > { %v2879_v27 = vpop.f32.mrb[19].mxu1 }
0x128d   : > { %6816 = vmatprep.mubr.msk.f32.mxu0 %vm421_vm0, %v2879_v27  ;;  %v6111_v27 = vld [vmem:[%s10197_s6 + $0x58] sm:$0xff] }
0x128e   : > { %6817 = vmatmul.mubr.msk.f32.gmra.mrb[22].mxu0 %vm421_vm0, %v6776_v23  ;;  %v6114_v23 = vld [vmem:[%s10197_s6 + $0x70] sm:$0xff] }
0x128f   : > { %6857 = vmatprep.mubr.msk.f32.mxu0 %vm2790_vm4, %v6092_v5 }
0x1297   : > { %v6795_v26 = vpop.f32.mrb[20].mxu1 }
0x1298   : > { %v2983_v28 = vpop.f32.mrb[21].mxu1 }
0x1299   : > { %6803 = vmatprep.mubr.msk.f32.mxu1 %vm421_vm0, %v2983_v28 }
0x129a   : > { %6804 = vmatmul.mubr.msk.f32.vlgmr.msra.gmra.mrb[24].mxu1 %vm421_vm0, %v6795_v26  ;;  %v6115_v26 = vld [vmem:[%s10197_s6 + $0x78] sm:$0xff] }
0x129b   : > { %v6798_v31 = vpop.f32.mrb[22].mxu1 }
0x129c   : > { %v2993_v29 = vpop.f32.mrb[23].mxu1 }
0x129d   : > { %6806 = vmatprep.mubr.msk.f32.mxu1 %vm421_vm0, %v2993_v29 }
0x129e   : > { %6807 = vmatmul.mubr.msk.f32.gmra.mrb[26].mxu1 %vm421_vm0, %v6798_v31 }
0x129f   : > { %6835 = vmatprep.mubr.msk.f32.mxu1 %vm2790_vm4, %v6084_v14 }
0x135d   : > { %v6815_v25 = vpop.f32.mrb[20].mxu0 }
0x135e   : > { %v3181_v32 = vpop.f32.mrb[21].mxu0 }
0x1361   : > { %v6818_v30 = vpop.f32.mrb[22].mxu0 }
0x1362   : > { %v3191_v33 = vpop.f32.mrb[23].mxu0 }
0x136d   : > { %v6805_v38 = vpop.f32.mrb[24].mxu1 }
0x136e   : > { %v3187_v39 = vadd.f32 %v6815_v25, %v6805_v38  ;;  %v3084_v40 = vpop.f32.mrb[25].mxu1 }
0x136f   : > { %v3182_v42 = vadd.f32 %v3181_v32, %v3084_v40 }
0x1370   : > { %v3225_v43 = vmul.f32 %v3212_v34, %v3187_v39 }
0x1371   : > { %v3224_v44 = vmul.f32 %v3207_v35, %v3182_v42  ;;  %v6808_v45 = vpop.f32.mrb[26].mxu1  ;;  %v6093_v42 = vld [vmem:[%s10196_s5 + $0x68] sm:$0xff] }
0x1372   : > { %v3254_v0 = vadd.f32 %v3241_v36, %v3225_v43  ;;  %v3197_v47 = vadd.f32 %v6818_v30, %v6808_v45  ;;  %v3094_v48 = vpop.f32.mrb[27].mxu1 }
0x1373   : > { %v3253_v49 = vadd.f32 %v3236_v37, %v3224_v44  ;;  %v3192_v50 = vadd.f32 %v3191_v33, %v3094_v48 }
0x1374   : > { %vm3258_vm0 = vcmp.ge.f32.partialorder %v3254_v0, 0.0  ;;  %v3262_v51 = vmul.f32 0.2, %v3254_v0  ;;  %v3227_v52 = vmul.f32 %v3222_v41, %v3197_v47 }
0x1375   : > { %vm3257_vm6 = vcmp.ge.f32.partialorder %v3253_v49, 0.0  ;;  %v3261_v54 = vmul.f32 0.2, %v3253_v49  ;;  %v3226_v55 = vmul.f32 %v3217_v63, %v3192_v50 }
0x1376   : > { %v3266_v57 = vsel %vm3258_vm0, %v3254_v0, %v3262_v51  ;;  %v3256_v58 = vadd.f32 %v3251_v53, %v3227_v52  ;;  %v6094_v0 = vld [vmem:[%s10196_s5 + $0x70] sm:$0xff]  ;;  %v6095_v51 = vld [vmem:[%s10196_s5 + $0x78] sm:$0xff]  ;;  %vm4517_vm0 = vcmask 1039360  }
0x1377   : > { %3271 = vst.msk [vmem:[#allocation2 + $0x28] sm:$0xff] %vm3269_vm5, %v3266_v57  ;;  %v3265_v60 = vsel %vm3257_vm6, %v3253_v49, %v3261_v54  ;;  %v3255_v61 = vadd.f32 %v3246_v56, %v3226_v55  ;;  %v3536_v55 = vld [vmem:[#allocation3 + $0x20] sm:$0xff]  ;;  %v3537_v56 = vld [vmem:[#allocation3 + $0x30] sm:$0xff]  ;;  %v6085_v57 = vld [vmem:[%s10196_s5 + $0x48] sm:$0xff] }
0x1378   : > { %3270 = vst.msk [vmem:[#allocation2 + $0x8] sm:$0xff] %vm3269_vm5, %v3265_v60  ;;  %vm3260_vm7 = vcmp.ge.f32.partialorder %v3256_v58, 0.0  ;;  %v3264_v62 = vmul.f32 0.2, %v3256_v58  ;;  %v9597_v60 = vpack.c.bf16 %v3537_v56, %v3536_v55  ;;  %v6141_v55 = vld [vmem:[%s10197_s6 + $0x88] sm:$0xff] }
0x1379   : > { %vm3259_vm8 = vcmp.ge.f32.partialorder %v3255_v61, 0.0  ;;  %v3263_v1 = vmul.f32 0.2, %v3255_v61  ;;  %v6145_v56 = vld [vmem:[%s10197_s6 + $0xa8] sm:$0xff] }
0x137a   : > { %v3268_v2 = vsel %vm3260_vm7, %v3256_v58, %v3264_v62  ;;  %v6086_v58 = vld [vmem:[%s10196_s5 + $0x50] sm:$0xff]  ;;  %v3532_v62 = vld [vmem:[%s10198_s7 + $0x20] sm:$0xff] }
0x137b   : > { %3273 = vst.msk [vmem:[#allocation2 + $0x68] sm:$0xff] %vm3269_vm5, %v3268_v2  ;;  %v3267_v3 = vsel %vm3259_vm8, %v3255_v61, %v3263_v1  ;;  %v6087_v61 = vld [vmem:[%s10196_s5 + $0x58] sm:$0xff]  ;;  %v3533_v1 = vld [vmem:[%s10198_s7 + $0x30] sm:$0xff] }
0x137c   : > { %3272 = vst.msk [vmem:[#allocation2 + $0x48] sm:$0xff] %vm3269_vm5, %v3267_v3 }
0x137e   : > { %v3275_v4 = vld [vmem:[#allocation2 + $0x28] sm:$0xff] }
0x137f   : > { %v3274_v6 = vld [vmem:[#allocation2 + $0x8] sm:$0xff]  ;;  %v8228_v16 = vpack.i.bf16 %v3275_v4, %v9357_v59 }
0x1380   : > { %v8213_v7 = vpack.i.bf16 %v3275_v4, %v3274_v6  ;;  %v7279_v8 = vpack.c.bf16 %v3275_v4, %v3274_v6  ;;  %v8218_v11 = vpack.i.bf16 %v3274_v6, %v9357_v59  ;;  %v9615_v4 = vpack.c.bf16 %v3533_v1, %v3532_v62 }
0x1382   : > { %8214 = vrot.lane.b32.xlu1 %v8213_v7, %s10234_s16  ;;  %7280 = vmatprep.subr.bf16.mxu1 %v7279_v8  ;;  %v3277_v9 = vld [vmem:[#allocation2 + $0x68] sm:$0xff] }
0x1383   : > { %7296 = vmatprep.subr.bf16.mxu0 %v7279_v8  ;;  %7282 = vmatpush3.bf16.msra.mxu1 %v7279_v8  ;;  %v3276_v10 = vld [vmem:[#allocation2 + $0x48] sm:$0xff]  ;;  %v8238_v18 = vpack.i.bf16 %v3277_v9, %v9357_v59 }
0x1384   : > { %7298 = vmatpush3.bf16.msra.mxu0 %v7279_v8  ;;  %v8223_v12 = vpack.i.bf16 %v3277_v9, %v3276_v10  ;;  %v7283_v13 = vpack.c.bf16 %v3277_v9, %v3276_v10  ;;  %v8233_v15 = vpack.i.bf16 %v3276_v10, %v9357_v59 }
0x1386   : > { %8219 = vrot.lane.b32.xlu1 %v8218_v11, %s10231_s12  ;;  %8224 = vrot.lane.b32.xlu0 %v8223_v12, %s10234_s16 }
0x1387   : > { %7284 = vmatprep.subr.bf16.mxu1 %v7283_v13  ;;  %7300 = vmatprep.subr.bf16.mxu0 %v7283_v13 }
0x1388   : > { %7286 = vmatpush3.bf16.msra.mxu1 %v7283_v13  ;;  %7302 = vmatpush3.bf16.msra.mxu0 %v7283_v13 }
0x138a   : > { %8234 = vrot.lane.b32.xlu1 %v8233_v15, %s10231_s12  ;;  %8229 = vrot.lane.b32.xlu0 %v8228_v16, %s10231_s12 }
0x138e   : > { %3739 = vperm.xlu1 %7702, %v6108_v17   ;;  %8239 = vrot.lane.b32.xlu0 %v8238_v18, %s10231_s12 }
0x1392   : > { %3768 = vperm.xlu1 %7702, %v6112_v21   ;;  %3744 = vperm.xlu0 %7701, %v6109_v19  }
0x1396   : > { %3749 = vperm.xlu1 %7702, %v6110_v24   ;;  %3773 = vperm.xlu0 %7701, %v6113_v22  }
0x139a   : > { %3778 = vperm.xlu1 %7702, %v6114_v23   ;;  %3754 = vperm.xlu0 %7701, %v6111_v27  }
0x139e   : > { %3783 = vperm.xlu0 %7701, %v6115_v26  }
0x13f4   : > { %v8215_v28 = vpop.permute.xlu1 %8214 }
0x13f5   : > { %v8217_v31 = vunpack.i.h.bf16 %v8215_v28  ;;  %v8216_v29 = vunpack.i.l.bf16 %v8215_v28 }
0x13f7   : > { %v7303_v25 = vpack.c.bf16 %v8217_v31, %v8216_v29 }
0x13f8   : > { %v8220_v32 = vpop.permute.xlu1 %8219  ;;  %v8225_v30 = vpop.permute.xlu0 %8224 }
0x13f9   : > { %v8227_v33 = vunpack.i.h.bf16 %v8225_v30  ;;  %v8226_v34 = vunpack.i.l.bf16 %v8225_v30  ;;  %7304 = vmatprep.subr.bf16.mxu0 %v7303_v25  ;;  %v8222_v35 = vunpack.i.h.bf16 %v8220_v32  ;;  %v8221_v36 = vunpack.i.l.bf16 %v8220_v32 }
0x13fa   : > { %7306 = vmatpush3.bf16.msra.mxu0 %v7303_v25 }
0x13fb   : > { %v7307_v37 = vpack.c.bf16 %v8227_v33, %v8226_v34  ;;  %v3311_v44 = vsel %vm503_vm1, %v8221_v36, %v8222_v35 }
0x13fc   : > { %v8235_v38 = vpop.permute.xlu1 %8234  ;;  %v8230_v39 = vpop.permute.xlu0 %8229 }
0x13fd   : > { %v8232_v40 = vunpack.i.h.bf16 %v8230_v39  ;;  %v8231_v41 = vunpack.i.l.bf16 %v8230_v39  ;;  %7308 = vmatprep.subr.bf16.mxu0 %v7307_v37  ;;  %v8237_v63 = vunpack.i.h.bf16 %v8235_v38  ;;  %v8236_v43 = vunpack.i.l.bf16 %v8235_v38 }
0x13fe   : > { %7310 = vmatpush3.bf16.msra.mxu0 %v7307_v37 }
0x13ff   : > { %v3312_v45 = vsel %vm503_vm1, %v8231_v41, %v8232_v40  ;;  %v3313_v52 = vsel %vm503_vm1, %v8236_v43, %v8237_v63  ;;  %v6124_v41 = vld [vmem:[%s10196_s5 + $0xa0] sm:$0xff] }
0x1400   : > { %v8240_v47 = vpop.permute.xlu0 %8239  ;;  %v7287_v48 = vpack.c.bf16 %v3312_v45, %v3311_v44 }
0x1401   : > { %v8242_v49 = vunpack.i.h.bf16 %v8240_v47  ;;  %v8241_v50 = vunpack.i.l.bf16 %v8240_v47  ;;  %6858 = vmatmul.mubr.msk.f32.vlgmr.msra.gmra.mrb[24].mxu0 %vm2790_vm4, %v6093_v42 }
0x1402   : > { %7288 = vmatprep.subr.bf16.mxu1 %v7287_v48  ;;  %6860 = vmatprep.mubr.msk.f32.mxu0 %vm2790_vm4, %v6094_v0 }
0x1403   : > { %7290 = vmatpush3.bf16.msra.mxu1 %v7287_v48  ;;  %v3314_v53 = vsel %vm503_vm1, %v8241_v50, %v8242_v49 }
0x1404   : > { %v7291_v54 = vpack.c.bf16 %v3314_v53, %v3313_v52  ;;  %v6116_v53 = vld [vmem:[%s10196_s5 + $0x80] sm:$0xff] }
0x1405   : > { %6861 = vmatmul.mubr.msk.f32.gmra.mrb[26].mxu0 %vm2790_vm4, %v6095_v51  ;;  %v6140_v51 = vld [vmem:[%s10197_s6 + $0x80] sm:$0xff] }
0x1406   : > { %7292 = vmatprep.subr.bf16.mxu1 %v7291_v54  ;;  %6907 = vmatprep.mubr.msk.f32.mxu0 %vm2790_vm4, %v6116_v53 }
0x1407   : > { %7294 = vmatpush3.bf16.msra.mxu1 %v7291_v54  ;;  %v6144_v54 = vld [vmem:[%s10197_s6 + $0xa0] sm:$0xff] }
0x1408   : > { %7312 = vmatprep.subr.bf16.mxu1 %v9516_v20 }
0x140a   : > { %6836 = vmatmul.mubr.msk.f32.vlgmr.msra.gmra.mrb[28].mxu1 %vm2790_vm4, %v6085_v57  ;;  %v6146_v57 = vld [vmem:[%s10197_s6 + $0xb0] sm:$0xff] }
0x140b   : > { %6838 = vmatprep.mubr.msk.f32.mxu1 %vm2790_vm4, %v6086_v58  ;;  %7314 = vmatpush3.bf16.msra.mxu1 %v9516_v20  ;;  %v6143_v58 = vld [vmem:[%s10197_s6 + $0x98] sm:$0xff] }
0x140c   : > { %7316 = vmatprep.subr.bf16.mxu1 %v9597_v60 }
0x140d   : > { %v3740_v12 = vpop.permute.xlu1 %3739 }
0x140e   : > { %6839 = vmatmul.mubr.msk.f32.gmra.mrb[30].mxu1 %vm2790_vm4, %v6087_v61  ;;  %v6147_v61 = vld [vmem:[%s10197_s6 + $0xb8] sm:$0xff] }
0x140f   : > { %7318 = vmatpush3.bf16.msra.mxu1 %v9597_v60 }
0x1410   : > { %7320 = vmatprep.subr.bf16.mxu1 %v9476_v46 }
0x1411   : > { %v3745_v11 = vpop.permute.xlu0 %3744  ;;  %v3769_v14 = vpop.permute.xlu1 %3768 }
0x1415   : > { %v3774_v13 = vpop.permute.xlu0 %3773  ;;  %v3750_v17 = vpop.permute.xlu1 %3749 }
0x1419   : > { %v3755_v15 = vpop.permute.xlu0 %3754  ;;  %v3779_v32 = vpop.permute.xlu1 %3778 }
0x141d   : > { %v3784_v31 = vpop.permute.xlu0 %3783 }
0x14d4   : > { %v6859_v2 = vpop.f32.mrb[24].mxu0 }
0x14d5   : > { %v3511_v3 = vpop.f32.mrb[25].mxu0 }
0x14d6   : > { %6871 = vmatprep.mubr.msk.f32.mxu1 %vm3269_vm5, %v3511_v3 }
0x14d7   : > { %6872 = vmatmul.mubr.msk.f32.vlgmr.msra.gmra.mrb[32].mxu1 %vm3269_vm5, %v6859_v2 }
0x14d8   : > { %v6862_v5 = vpop.f32.mrb[26].mxu0  ;;  %7322 = vmatpush3.bf16.msra.mxu1 %v9476_v46 }
0x14d9   : > { %v3521_v6 = vpop.f32.mrb[27].mxu0  ;;  %7324 = vmatprep.subr.bf16.mxu1 %v9615_v4 }
0x14da   : > { %6874 = vmatprep.mubr.msk.f32.mxu1 %vm3269_vm5, %v3521_v6 }
0x14db   : > { %6875 = vmatmul.mubr.msk.f32.gmra.mrb[34].mxu1 %vm3269_vm5, %v6862_v5 }
0x14dc   : > { %7326 = vmatpush3.bf16.msra.mxu1 %v9615_v4 }
0x14dd   : > { %v6837_v7 = vpop.f32.mrb[28].mxu1 }
0x14de   : > { %v3397_v8 = vpop.f32.mrb[29].mxu1 }
0x14df   : > { %6885 = vmatprep.mubr.msk.f32.mxu1 %vm3269_vm5, %v3397_v8 }
0x14e0   : > { %6886 = vmatmul.mubr.msk.f32.vlgmr.msra.gmra.mrb[32].mxu1 %vm3269_vm5, %v6837_v7 }
0x14e1   : > { %v6840_v9 = vpop.f32.mrb[30].mxu1 }
0x14e2   : > { %v3407_v10 = vpop.f32.mrb[31].mxu1 }
0x14e3   : > { %6888 = vmatprep.mubr.msk.f32.mxu1 %vm3269_vm5, %v3407_v10 }
0x14e4   : > { %6889 = vmatmul.mubr.msk.f32.gmra.mrb[34].mxu1 %vm3269_vm5, %v6840_v9 }
0x14e5   : > { %6929 = vmatprep.mubr.msk.f32.mxu1 %vm2790_vm4, %v6124_v41  ;;  %v4066_v41 = vld [vmem:[%s10198_s7 + $0x40] sm:$0xff] }
0x15b3   : > { %v6887_v16 = vpop.f32.mrb[32].mxu1 }
0x15b4   : > { %v3758_v18 = vmul.f32 %v6887_v16, %v3745_v11  ;;  %v3713_v21 = vpop.f32.mrb[33].mxu1  ;;  %v6125_v16 = vld [vmem:[%s10196_s5 + $0xa8] sm:$0xff] }
0x15b5   : > { %v3757_v19 = vmul.f32 %v3740_v12, %v3713_v21 }
0x15b6   : > { %v3787_v24 = vadd.f32 %v3774_v13, %v3758_v18 }
0x15b7   : > { %v3786_v22 = vadd.f32 %v3769_v14, %v3757_v19  ;;  %v6890_v23 = vpop.f32.mrb[34].mxu1 }
0x15b8   : > { %vm3791_vm9 = vcmp.ge.f32.partialorder %v3787_v24, 0.0  ;;  %v3795_v27 = vmul.f32 0.2, %v3787_v24  ;;  %v3760_v26 = vmul.f32 %v6890_v23, %v3755_v15  ;;  %v3723_v28 = vpop.f32.mrb[35].mxu1 }
0x15b9   : > { %vm3790_vm10 = vcmp.ge.f32.partialorder %v3786_v22, 0.0  ;;  %v3794_v29 = vmul.f32 0.2, %v3786_v22  ;;  %v3759_v25 = vmul.f32 %v3750_v17, %v3723_v28  ;;  %v6127_v28 = vld [vmem:[%s10196_s5 + $0xb8] sm:$0xff] }
0x15ba   : > { %v3799_v30 = vsel %vm3791_vm9, %v3787_v24, %v3795_v27  ;;  %v3789_v33 = vadd.f32 %v3784_v31, %v3760_v26  ;;  %v6126_v24 = vld [vmem:[%s10196_s5 + $0xb0] sm:$0xff] }
0x15bb   : > { %3803 = vst.msk [vmem:[#allocation2 + $0x28] sm:$0xff] %vm2790_vm4, %v3799_v30  ;;  %v3798_v34 = vsel %vm3790_vm10, %v3786_v22, %v3794_v29  ;;  %v3788_v35 = vadd.f32 %v3779_v32, %v3759_v25  ;;  %v6117_v32 = vld [vmem:[%s10196_s5 + $0x88] sm:$0xff]  ;;  %v6118_v30 = vld [vmem:[%s10196_s5 + $0x90] sm:$0xff] }
0x15bc   : > { %3802 = vst.msk [vmem:[#allocation2 + $0x8] sm:$0xff] %vm2790_vm4, %v3798_v34  ;;  %vm3793_vm11 = vcmp.ge.f32.partialorder %v3789_v33, 0.0  ;;  %v3797_v36 = vmul.f32 0.2, %v3789_v33  ;;  %v4075_v34 = vld [vmem:[#allocation3 + $0x50] sm:$0xff] }
0x15bd   : > { %vm3792_vm12 = vcmp.ge.f32.partialorder %v3788_v35, 0.0  ;;  %v3796_v37 = vmul.f32 0.2, %v3788_v35 }
0x15be   : > { %v3801_v38 = vsel %vm3793_vm11, %v3789_v33, %v3797_v36  ;;  %v4074_v33 = vld [vmem:[#allocation3 + $0x40] sm:$0xff] }
0x15bf   : > { %3805 = vst.msk [vmem:[#allocation2 + $0x68] sm:$0xff] %vm2790_vm4, %v3801_v38  ;;  %v3800_v39 = vsel %vm3792_vm12, %v3788_v35, %v3796_v37  ;;  %v6119_v35 = vld [vmem:[%s10196_s5 + $0x98] sm:$0xff]  ;;  %v9704_v36 = vpack.c.bf16 %v4075_v34, %v4074_v33  ;;  %v4076_v37 = vld [vmem:[#allocation3 + $0x60] sm:$0xff]  ;;  %v4077_v38 = vld [vmem:[#allocation3 + $0x70] sm:$0xff] }
0x15c0   : > { %3804 = vst.msk [vmem:[#allocation2 + $0x48] sm:$0xff] %vm2790_vm4, %v3800_v39  ;;  %v9709_v39 = vpack.c.bf16 %v4077_v38, %v4076_v37  ;;  %v6164_v33 = vld [vmem:[%s10197_s6 + $0xc0] sm:$0xff]  ;;  %v6169_v34 = vld [vmem:[%s10197_s6 + $0xe8] sm:$0xff]  ;;  %v6167_v37 = vld [vmem:[%s10197_s6 + $0xd8] sm:$0xff] }
0x15c1   : > { %v6166_v38 = vld [vmem:[%s10197_s6 + $0xd0] sm:$0xff] }
0x15c2   : > { %v3807_v40 = vld [vmem:[#allocation2 + $0x28] sm:$0xff] }
0x15c3   : > { %v3806_v42 = vld [vmem:[#allocation2 + $0x8] sm:$0xff]  ;;  %v8258_v50 = vpack.i.bf16 %v3807_v40, %v9357_v59 }
0x15c4   : > { %v8243_v63 = vpack.i.bf16 %v3807_v40, %v3806_v42  ;;  %v7327_v43 = vpack.c.bf16 %v3807_v40, %v3806_v42  ;;  %v8253_v0 = vpack.i.bf16 %v3806_v42, %v9357_v59  ;;  %v4067_v42 = vld [vmem:[%s10198_s7 + $0x50] sm:$0xff] }
0x15c6   : > { %8244 = vrot.lane.b32.xlu1 %v8243_v63, %s10234_s16  ;;  %7328 = vmatprep.subr.bf16.mxu0 %v7327_v43  ;;  %v3809_v44 = vld [vmem:[#allocation2 + $0x68] sm:$0xff] }
0x15c7   : > { %7344 = vmatprep.subr.bf16.mxu1 %v7327_v43  ;;  %7330 = vmatpush3.bf16.msra.mxu0 %v7327_v43  ;;  %v3808_v45 = vld [vmem:[#allocation2 + $0x48] sm:$0xff]  ;;  %v8268_v52 = vpack.i.bf16 %v3809_v44, %v9357_v59 }
0x15c8   : > { %7346 = vmatpush3.bf16.msra.mxu1 %v7327_v43  ;;  %v8248_v47 = vpack.i.bf16 %v3809_v44, %v3808_v45  ;;  %v7331_v48 = vpack.c.bf16 %v3809_v44, %v3808_v45  ;;  %v8263_v49 = vpack.i.bf16 %v3808_v45, %v9357_v59  ;;  %v6142_v59 = vld [vmem:[%s10197_s6 + $0x90] sm:$0xff]  ;;  %v9725_v44 = vpack.c.bf16 %v4067_v42, %v4066_v41  ;;  %v4068_v45 = vld [vmem:[%s10198_s7 + $0x60] sm:$0xff]  ;;  %v4656_v41 = vld [vmem:[#allocation3 + $0x8] sm:$0xff] }
0x15c9   : > { %v4658_v42 = vld [vmem:[#allocation3 + $0x18] sm:$0xff] }
0x15ca   : > { %8254 = vrot.lane.b32.xlu1 %v8253_v0, %s10231_s12  ;;  %8249 = vrot.lane.b32.xlu0 %v8248_v47, %s10234_s16  ;;  %v4069_v0 = vld [vmem:[%s10198_s7 + $0x70] sm:$0xff] }
0x15cb   : > { %7332 = vmatprep.subr.bf16.mxu0 %v7331_v48  ;;  %7348 = vmatprep.subr.bf16.mxu1 %v7331_v48  ;;  %v9737_v47 = vpack.c.bf16 %v4069_v0, %v4068_v45  ;;  %v7423_v45 = vpack.c.bf16 %v4658_v42, %v4656_v41  ;;  %v4671_v42 = vld [vmem:[#allocation3 + $0x80] sm:$0xff] }
0x15cc   : > { %7334 = vmatpush3.bf16.msra.mxu0 %v7331_v48  ;;  %7350 = vmatpush3.bf16.msra.mxu1 %v7331_v48 }
0x15ce   : > { %8264 = vrot.lane.b32.xlu1 %v8263_v49, %s10231_s12  ;;  %8259 = vrot.lane.b32.xlu0 %v8258_v50, %s10231_s12 }
0x15d2   : > { %4279 = vperm.xlu1 %7702, %v6140_v51   ;;  %8269 = vrot.lane.b32.xlu0 %v8268_v52, %s10231_s12  ;;  %v9746_v51 = vld [vmem:[#allocation2] sm:$0xff] }
0x15d6   : > { %4308 = vperm.xlu1 %7702, %v6144_v54   ;;  %4284 = vperm.xlu0 %7701, %v6141_v55  }
0x15da   : > { %4289 = vperm.xlu1 %7702, %v6142_v59   ;;  %4313 = vperm.xlu0 %7701, %v6145_v56  }
0x15de   : > { %4318 = vperm.xlu1 %7702, %v6146_v57   ;;  %4294 = vperm.xlu0 %7701, %v6143_v58  }
0x15e2   : > { %4323 = vperm.xlu0 %7701, %v6147_v61  }
0x1638   : > { %v8245_v62 = vpop.permute.xlu1 %8244 }
0x1639   : > { %v8247_v1 = vunpack.i.h.bf16 %v8245_v62  ;;  %v8246_v2 = vunpack.i.l.bf16 %v8245_v62 }
0x163b   : > { %v7351_v3 = vpack.c.bf16 %v8247_v1, %v8246_v2 }
0x163c   : > { %v8255_v5 = vpop.permute.xlu1 %8254  ;;  %v8250_v6 = vpop.permute.xlu0 %8249 }
0x163d   : > { %v8252_v7 = vunpack.i.h.bf16 %v8250_v6  ;;  %v8251_v8 = vunpack.i.l.bf16 %v8250_v6  ;;  %7352 = vmatprep.subr.bf16.mxu1 %v7351_v3  ;;  %v8257_v9 = vunpack.i.h.bf16 %v8255_v5  ;;  %v8256_v10 = vunpack.i.l.bf16 %v8255_v5 }
0x163e   : > { %7354 = vmatpush3.bf16.msra.mxu1 %v7351_v3 }
0x163f   : > { %v7355_v11 = vpack.c.bf16 %v8252_v7, %v8251_v8  ;;  %v3843_v21 = vsel %vm503_vm1, %v8256_v10, %v8257_v9 }
0x1640   : > { %v8265_v12 = vpop.permute.xlu1 %8264  ;;  %v8260_v13 = vpop.permute.xlu0 %8259 }
0x1641   : > { %v8262_v14 = vunpack.i.h.bf16 %v8260_v13  ;;  %v8261_v15 = vunpack.i.l.bf16 %v8260_v13  ;;  %7356 = vmatprep.subr.bf16.mxu1 %v7355_v11  ;;  %v8267_v17 = vunpack.i.h.bf16 %v8265_v12  ;;  %v8266_v18 = vunpack.i.l.bf16 %v8265_v12 }
0x1642   : > { %7358 = vmatpush3.bf16.msra.mxu1 %v7355_v11 }
0x1643   : > { %v3844_v19 = vsel %vm503_vm1, %v8261_v15, %v8262_v14  ;;  %v3845_v31 = vsel %vm503_vm1, %v8266_v18, %v8267_v17 }
0x1644   : > { %v8270_v22 = vpop.permute.xlu0 %8269  ;;  %v7335_v23 = vpack.c.bf16 %v3844_v19, %v3843_v21 }
0x1645   : > { %v8272_v27 = vunpack.i.h.bf16 %v8270_v22  ;;  %v8271_v26 = vunpack.i.l.bf16 %v8270_v22  ;;  %6930 = vmatmul.mubr.msk.f32.vlgmr.msra.gmra.mrb[36].mxu1 %vm2790_vm4, %v6125_v16 }
0x1646   : > { %7336 = vmatprep.subr.bf16.mxu0 %v7335_v23  ;;  %6932 = vmatprep.mubr.msk.f32.mxu1 %vm2790_vm4, %v6126_v24  ;;  %v6148_v24 = vld [vmem:[%s10196_s5 + $0xc0] sm:$0xff] }
0x1647   : > { %7338 = vmatpush3.bf16.msra.mxu0 %v7335_v23  ;;  %v3846_v29 = vsel %vm503_vm1, %v8271_v26, %v8272_v27 }
0x1648   : > { %v7339_v25 = vpack.c.bf16 %v3846_v29, %v3845_v31 }
0x1649   : > { %6933 = vmatmul.mubr.msk.f32.gmra.mrb[38].mxu1 %vm2790_vm4, %v6127_v28 }
0x164a   : > { %7340 = vmatprep.subr.bf16.mxu0 %v7339_v25  ;;  %6995 = vmatprep.mubr.msk.f32.mxu1 %vm2790_vm4, %v6148_v24 }
0x164b   : > { %7342 = vmatpush3.bf16.msra.mxu0 %v7339_v25 }
0x164c   : > { %7360 = vmatprep.subr.bf16.mxu0 %v9516_v20 }
0x164e   : > { %6908 = vmatmul.mubr.msk.f32.vlgmr.msra.gmra.mrb[28].mxu0 %vm2790_vm4, %v6117_v32 }
0x164f   : > { %6910 = vmatprep.mubr.msk.f32.mxu0 %vm2790_vm4, %v6118_v30  ;;  %7362 = vmatpush3.bf16.msra.mxu0 %v9516_v20  ;;  %v6165_v30 = vld [vmem:[%s10197_s6 + $0xc8] sm:$0xff] }
0x1650   : > { %7364 = vmatprep.subr.bf16.mxu0 %v9597_v60 }
0x1651   : > { %v4280_v53 = vpop.permute.xlu1 %4279 }
0x1652   : > { %6911 = vmatmul.mubr.msk.f32.gmra.mrb[30].mxu0 %vm2790_vm4, %v6119_v35  ;;  %v6168_v35 = vld [vmem:[%s10197_s6 + $0xe0] sm:$0xff] }
0x1653   : > { %7366 = vmatpush3.bf16.msra.mxu0 %v9597_v60 }
0x1654   : > { %7368 = vmatprep.subr.bf16.mxu0 %v9704_v36 }
0x1655   : > { %v4285_v52 = vpop.permute.xlu0 %4284  ;;  %v4309_v55 = vpop.permute.xlu1 %4308 }
0x1657   : > { %7370 = vmatpush3.bf16.msra.mxu0 %v9704_v36 }
0x1658   : > { %7372 = vmatprep.subr.bf16.mxu0 %v9709_v39 }
0x1659   : > { %v4314_v54 = vpop.permute.xlu0 %4313  ;;  %v4290_v57 = vpop.permute.xlu1 %4289 }
0x165b   : > { %7374 = vmatpush3.bf16.msra.mxu0 %v9709_v39 }
0x165c   : > { %7376 = vmatprep.subr.bf16.mxu0 %v9476_v46 }
0x165d   : > { %v4295_v59 = vpop.permute.xlu0 %4294  ;;  %v4319_v11 = vpop.permute.xlu1 %4318 }
0x1661   : > { %v4324_v8 = vpop.permute.xlu0 %4323 }
0x1718   : > { %v6931_v20 = vpop.f32.mrb[36].mxu1 }
0x1719   : > { %v4043_v40 = vpop.f32.mrb[37].mxu1 }
0x171a   : > { %6951 = vmatprep.mubr.msk.f32.mxu0 %vm2790_vm4, %v4043_v40  ;;  %v6170_v40 = vld [vmem:[%s10197_s6 + $0xf0] sm:$0xff] }
0x171b   : > { %6952 = vmatmul.mubr.msk.f32.vlgmr.msra.gmra.mrb[32].mxu0 %vm2790_vm4, %v6931_v20  ;;  %v6171_v20 = vld [vmem:[%s10197_s6 + $0xf8] sm:$0xff] }
0x171c   : > { %7378 = vmatpush3.bf16.msra.mxu0 %v9476_v46  ;;  %v6934_v63 = vpop.f32.mrb[38].mxu1 }
0x171d   : > { %7380 = vmatprep.subr.bf16.mxu0 %v9615_v4  ;;  %v4053_v43 = vpop.f32.mrb[39].mxu1 }
0x171e   : > { %6954 = vmatprep.mubr.msk.f32.mxu0 %vm2790_vm4, %v4053_v43  ;;  %v4657_v43 = vld [vmem:[#allocation3 + $0x10] sm:$0xff] }
0x171f   : > { %6955 = vmatmul.mubr.msk.f32.gmra.mrb[34].mxu0 %vm2790_vm4, %v6934_v63  ;;  %v4655_v63 = vld [vmem:[#allocation3] sm:$0xff] }
0x1720   : > { %7382 = vmatpush3.bf16.msra.mxu0 %v9615_v4  ;;  %v7425_v0 = vpack.c.bf16 %v4657_v43, %v4655_v63  ;;  %v4673_v63 = vld [vmem:[#allocation3 + $0x90] sm:$0xff] }
0x1721   : > { %7384 = vmatprep.subr.bf16.mxu0 %v9725_v44  ;;  %v6909_v46 = vpop.f32.mrb[28].mxu0  ;;  %v7441_v43 = vpack.c.bf16 %v4673_v63, %v4671_v42 }
0x1722   : > { %v3929_v48 = vpop.f32.mrb[29].mxu0 }
0x1723   : > { %6973 = vmatprep.mubr.msk.f32.mxu0 %vm2790_vm4, %v3929_v48  ;;  %v4662_v48 = vld [vmem:[#allocation3 + $0x38] sm:$0xff] }
0x1724   : > { %7386 = vmatpush3.bf16.msra.mxu0 %v9725_v44 }
0x1725   : > { %7388 = vmatprep.subr.bf16.mxu0 %v9737_v47  ;;  %v6912_v49 = vpop.f32.mrb[30].mxu0 }
0x1726   : > { %v3939_v50 = vpop.f32.mrb[31].mxu0 }
0x1728   : > { %7390 = vmatpush3.bf16.msra.mxu0 %v9737_v47 }
0x1729   : > { %7424 = vmatprep.subr.bf16.mxu0 %v7423_v45  ;;  %v4676_v45 = vld [vmem:[#allocation3 + $0xa8] sm:$0xff] }
0x172b   : > { %6974 = vmatmul.mubr.msk.f32.vlgmr.msra.gmra.mrb[32].mxu0 %vm2790_vm4, %v6909_v46  ;;  %v4660_v46 = vld [vmem:[#allocation3 + $0x28] sm:$0xff] }
0x172c   : > { %6976 = vmatprep.mubr.msk.f32.mxu0 %vm2790_vm4, %v3939_v50  ;;  %v4664_v50 = vld [vmem:[#allocation3 + $0x48] sm:$0xff]  ;;  %7426 = vmatpush1.bf16.msra.mxu0 %v7425_v0  ;;  %v4678_v0 = vld [vmem:[#allocation3 + $0xb8] sm:$0xff] }
0x172f   : > { %6977 = vmatmul.mubr.msk.f32.gmra.mrb[34].mxu0 %vm2790_vm4, %v6912_v49  ;;  %v7427_v49 = vpack.c.bf16 %v4662_v48, %v4660_v46  ;;  %v4675_v46 = vld [vmem:[#allocation3 + $0xa0] sm:$0xff]  ;;  %v7443_v48 = vpack.c.bf16 %v4678_v0, %v4676_v45  ;;  %v4653_v45 = vld [vmem:[%s10198_s7 + $0xf0] sm:$0xff] }
0x1730   : > { %4751 = vmatprep.mubr.f32.mxu0 %v9746_v51 }
0x1731   : > { %7428 = vmatprep.subr.bf16.mxu0 %v7427_v49  ;;  %v4677_v49 = vld [vmem:[#allocation3 + $0xb0] sm:$0xff] }
0x1732   : > { %7430 = vmatpush1.bf16.msra.mxu0 %v9597_v60 }
0x17fe   : > { %v6975_v56 = vpop.f32.mrb[32].mxu0 }
0x17ff   : > { %v4298_v58 = vmul.f32 %v6975_v56, %v4285_v52  ;;  %v4253_v61 = vpop.f32.mrb[33].mxu0  ;;  %v4666_v52 = vld [vmem:[#allocation3 + $0x58] sm:$0xff] }
0x1800   : > { %v4297_v62 = vmul.f32 %v4280_v53, %v4253_v61  ;;  %v7431_v53 = vpack.c.bf16 %v4666_v52, %v4664_v50  ;;  %v4680_v50 = vld [vmem:[#allocation3 + $0xc8] sm:$0xff]  ;;  %v4682_v52 = vld [vmem:[#allocation3 + $0xd8] sm:$0xff] }
0x1801   : > { %v4327_v1 = vadd.f32 %v4314_v54, %v4298_v58  ;;  %v4668_v54 = vld [vmem:[#allocation3 + $0x68] sm:$0xff] }
0x1802   : > { %v4326_v2 = vadd.f32 %v4309_v55, %v4297_v62  ;;  %v6978_v3 = vpop.f32.mrb[34].mxu0  ;;  %v4670_v55 = vld [vmem:[#allocation3 + $0x78] sm:$0xff]  ;;  %7432 = vmatprep.subr.bf16.mxu0 %v7431_v53  ;;  %v7445_v53 = vpack.c.bf16 %v4677_v49, %v4675_v46  ;;  %v9947_v46 = vpack.i.bf16 %v9746_v51, %v9746_v51 }
0x1803   : > { %vm4331_vm2 = vcmp.ge.f32.partialorder %v4327_v1, 0.0  ;;  %v4335_v5 = vmul.f32 0.2, %v4327_v1  ;;  %v4300_v6 = vmul.f32 %v6978_v3, %v4295_v59  ;;  %v4263_v7 = vpop.f32.mrb[35].mxu0  ;;  %v7435_v59 = vpack.c.bf16 %v4670_v55, %v4668_v54  ;;  %7434 = vmatpush1.bf16.msra.mxu0 %v9704_v36  ;;  %v4679_v55 = vld [vmem:[#allocation3 + $0xc0] sm:$0xff] }
0x1804   : > { %vm4330_vm13 = vcmp.ge.f32.partialorder %v4326_v2, 0.0  ;;  %v4334_v9 = vmul.f32 0.2, %v4326_v2  ;;  %v4299_v10 = vmul.f32 %v4290_v57, %v4263_v7  ;;  %v7447_v54 = vpack.c.bf16 %v4682_v52, %v4680_v50 }
0x1805   : > { %v4339_v12 = vsel %vm4331_vm2, %v4327_v1, %v4335_v5  ;;  %v4329_v13 = vadd.f32 %v4324_v8, %v4300_v6  ;;  %7436 = vmatprep.subr.bf16.mxu0 %v7435_v59  ;;  %v4681_v59 = vld [vmem:[#allocation3 + $0xd0] sm:$0xff]  ;;  %vm5128_vm2 = vcmask 23552  }
0x1806   : > { %v4338_v14 = vsel %vm4330_vm13, %v4326_v2, %v4334_v9  ;;  %v4328_v15 = vadd.f32 %v4319_v11, %v4299_v10  ;;  %v8273_v16 = vpack.i.bf16 %v4339_v12, %v9746_v51  ;;  %v8298_v31 = vpack.i.bf16 %v9746_v51, %v4339_v12 }
0x1807   : > { %vm4333_vm14 = vcmp.ge.f32.partialorder %v4329_v13, 0.0  ;;  %v4337_v17 = vmul.f32 0.2, %v4329_v13  ;;  %v8278_v18 = vpack.i.bf16 %v4338_v14, %v9746_v51  ;;  %v9751_v21 = vpack.c.bf16 %v4339_v12, %v4338_v14  ;;  %7438 = vmatpush1.bf16.msra.mxu0 %v9709_v39 }
0x1808   : > { %vm4332_vm3 = vcmp.ge.f32.partialorder %v4328_v15, 0.0  ;;  %v4336_v19 = vmul.f32 0.2, %v4328_v15  ;;  %8274 = vrot.lane.b32.xlu0 %v8273_v16, %s10231_s12  ;;  %v8293_v29 = vpack.i.bf16 %v9746_v51, %v4338_v14 }
0x1809   : > { %v4341_v22 = vsel %vm4333_vm14, %v4329_v13, %v4337_v17  ;;  %8279 = vrot.lane.b32.xlu1 %v8278_v18, %s10231_s12  ;;  %7392 = vmatprep.subr.bf16.mxu1 %v9751_v21  ;;  %v6149_v18 = vld [vmem:[%s10196_s5 + $0xc8] sm:$0xff] }
0x180a   : > { %v4340_v23 = vsel %vm4332_vm3, %v4328_v15, %v4336_v19  ;;  %7394 = vmatpush3.bf16.msra.mxu1 %v9751_v21  ;;  %v8288_v27 = vpack.i.bf16 %v4341_v22, %v9746_v51  ;;  %v8308_v25 = vpack.i.bf16 %v9746_v51, %v4341_v22 }
0x180b   : > { %v8283_v26 = vpack.i.bf16 %v4340_v23, %v9746_v51  ;;  %v9763_v28 = vpack.c.bf16 %v4341_v22, %v4340_v23  ;;  %v8303_v32 = vpack.i.bf16 %v9746_v51, %v4340_v23  ;;  %v6150_v22 = vld [vmem:[%s10196_s5 + $0xd0] sm:$0xff] }
0x180c   : > { %8289 = vrot.lane.b32.xlu0 %v8288_v27, %s10231_s12 }
0x180d   : > { %8284 = vrot.lane.b32.xlu1 %v8283_v26, %s10231_s12  ;;  %7396 = vmatprep.subr.bf16.mxu1 %v9763_v28 }
0x180e   : > { %7398 = vmatpush3.bf16.msra.mxu1 %v9763_v28 }
0x1810   : > { %8299 = vrot.lane.b32.xlu0 %v8298_v31, %s10234_s16 }
0x1811   : > { %8294 = vrot.lane.b32.xlu1 %v8293_v29, %s10234_s16 }
0x1814   : > { %8309 = vrot.lane.b32.xlu0 %v8308_v25, %s10234_s16 }
0x1815   : > { %8304 = vrot.lane.b32.xlu1 %v8303_v32, %s10234_s16  ;;  %v6151_v32 = vld [vmem:[%s10196_s5 + $0xd8] sm:$0xff] }
0x1818   : > { %4877 = vperm.xlu0 %7701, %v6165_v30   ;;  %v6156_v30 = vld [vmem:[%s10196_s5 + $0xe0] sm:$0xff] }
0x1819   : > { %4872 = vperm.xlu1 %7702, %v6164_v33  }
0x181c   : > { %4910 = vperm.xlu0 %7701, %v6169_v34  }
0x181d   : > { %4905 = vperm.xlu1 %7702, %v6168_v35  }
0x1820   : > { %4887 = vperm.xlu0 %7701, %v6167_v37   ;;  %v6157_v37 = vld [vmem:[%s10196_s5 + $0xe8] sm:$0xff] }
0x1821   : > { %4882 = vperm.xlu1 %7702, %v6166_v38   ;;  %v6158_v38 = vld [vmem:[%s10196_s5 + $0xf0] sm:$0xff] }
0x1824   : > { %4920 = vperm.xlu0 %7701, %v6171_v20   ;;  %v4672_v20 = vld [vmem:[#allocation3 + $0x88] sm:$0xff] }
0x1825   : > { %4915 = vperm.xlu1 %7702, %v6170_v40   ;;  %v4674_v40 = vld [vmem:[#allocation3 + $0x98] sm:$0xff] }
0x1826   : > { %v7439_v41 = vpack.c.bf16 %v4674_v40, %v4672_v20  ;;  %v4649_v20 = vld [vmem:[%s10198_s7 + $0xd0] sm:$0xff]  ;;  %v4652_v40 = vld [vmem:[%s10198_s7 + $0xe8] sm:$0xff] }
0x1828   : > { %7440 = vmatprep.subr.bf16.mxu0 %v7439_v41  ;;  %v4654_v41 = vld [vmem:[%s10198_s7 + $0xf8] sm:$0xff]  ;;  %8319 = vrot.lane.b32.xlu0 %v9947_v46, %s10235_s26 }
0x1829   : > { %7442 = vmatpush1.bf16.msra.mxu0 %v7441_v43  ;;  %v7483_v63 = vpack.c.bf16 %v4654_v41, %v4652_v40  ;;  %v4651_v43 = vld [vmem:[%s10198_s7 + $0xe0] sm:$0xff]  ;;  %8314 = vrot.lane.b32.xlu1 %v9947_v46, %s10235_s26 }
0x182a   : > { %7444 = vmatprep.subr.bf16.mxu0 %v7443_v48  ;;  %v7485_v0 = vpack.c.bf16 %v4653_v45, %v4651_v43  ;;  %v5422_v45 = vld [vmem:[#allocation2 + $0x38] sm:$0xff] }
0x182c   : > { %8329 = vrot.lane.b32.xlu0 %v9947_v46, %s8611_s15 }
0x182d   : > { %7446 = vmatpush1.bf16.msra.mxu0 %v7445_v53  ;;  %8324 = vrot.lane.b32.xlu1 %v9947_v46, %s8611_s15 }
0x182e   : > { %7448 = vmatprep.subr.bf16.mxu0 %v7447_v54 }
0x187a   : > { %v8275_v56 = vpop.permute.xlu0 %8274 }
0x187b   : > { %v8277_v57 = vunpack.i.h.bf16 %v8275_v56  ;;  %v8276_v58 = vunpack.i.l.bf16 %v8275_v56  ;;  %v8280_v61 = vpop.permute.xlu1 %8279  ;;  %v4684_v56 = vld [vmem:[#allocation3 + $0xe8] sm:$0xff] }
0x187c   : > { %v8282_v62 = vunpack.i.h.bf16 %v8280_v61  ;;  %v8281_v1 = vunpack.i.l.bf16 %v8280_v61 }
0x187d   : > { %v4388_v2 = vsel %vm503_vm1, %v8276_v58, %v8277_v57  ;;  %v4686_v57 = vld [vmem:[#allocation3 + $0xf8] sm:$0xff]  ;;  %v7449_v58 = vpack.c.bf16 %v4681_v59, %v4679_v55 }
0x187e   : > { %v8290_v3 = vpop.permute.xlu0 %8289  ;;  %v4387_v5 = vsel %vm503_vm1, %v8281_v1, %v8282_v62  ;;  %v7451_v61 = vpack.c.bf16 %v4686_v57, %v4684_v56  ;;  %v4683_v62 = vld [vmem:[#allocation3 + $0xe0] sm:$0xff]  ;;  %v4685_v1 = vld [vmem:[#allocation3 + $0xf0] sm:$0xff] }
0x187f   : > { %v8292_v6 = vunpack.i.h.bf16 %v8290_v3  ;;  %v8291_v60 = vunpack.i.l.bf16 %v8290_v3  ;;  %v8285_v7 = vpop.permute.xlu1 %8284  ;;  %v7399_v8 = vpack.c.bf16 %v4388_v2, %v4387_v5  ;;  %7450 = vmatpush1.bf16.msra.mxu0 %v7449_v58  ;;  %v7453_v2 = vpack.c.bf16 %v4685_v1, %v4683_v62  ;;  %v4624_v3 = vld [vmem:[%s10198_s7 + $0x8] sm:$0xff]  ;;  %v4626_v5 = vld [vmem:[%s10198_s7 + $0x18] sm:$0xff] }
0x1880   : > { %v8287_v9 = vunpack.i.h.bf16 %v8285_v7  ;;  %v8286_v36 = vunpack.i.l.bf16 %v8285_v7  ;;  %7452 = vmatprep.subr.bf16.mxu0 %v7451_v61 }
0x1881   : > { %7400 = vmatprep.subr.bf16.mxu1 %v7399_v8  ;;  %v4390_v39 = vsel %vm503_vm1, %v8291_v60, %v8292_v6  ;;  %v7455_v6 = vpack.c.bf16 %v4626_v5, %v4624_v3 }
0x1882   : > { %v8300_v10 = vpop.permute.xlu0 %8299  ;;  %7402 = vmatpush3.bf16.msra.mxu1 %v7399_v8  ;;  %v4389_v11 = vsel %vm503_vm1, %v8286_v36, %v8287_v9  ;;  %v4623_v36 = vld [vmem:[%s10198_s7] sm:$0xff] }
0x1883   : > { %v8295_v12 = vpop.permute.xlu1 %8294  ;;  %v7403_v13 = vpack.c.bf16 %v4390_v39, %v4389_v11  ;;  %v8302_v14 = vunpack.i.h.bf16 %v8300_v10  ;;  %v8301_v15 = vunpack.i.l.bf16 %v8300_v10  ;;  %7454 = vmatpush1.bf16.msra.mxu0 %v7453_v2  ;;  %v4625_v39 = vld [vmem:[%s10198_s7 + $0x10] sm:$0xff]  ;;  %v4628_v10 = vld [vmem:[%s10198_s7 + $0x28] sm:$0xff]  ;;  %v4630_v11 = vld [vmem:[%s10198_s7 + $0x38] sm:$0xff] }
0x1884   : > { %v8297_v16 = vunpack.i.h.bf16 %v8295_v12  ;;  %v8296_v17 = vunpack.i.l.bf16 %v8295_v12  ;;  %7456 = vmatprep.subr.bf16.mxu0 %v7455_v6  ;;  %v7457_v12 = vpack.c.bf16 %v4625_v39, %v4623_v36 }
0x1885   : > { %7404 = vmatprep.subr.bf16.mxu1 %v7403_v13  ;;  %v4519_v27 = vsel %vm4517_vm0, %v8301_v15, %v8302_v14  ;;  %v7459_v14 = vpack.c.bf16 %v4630_v11, %v4628_v10 }
0x1886   : > { %7406 = vmatpush3.bf16.msra.mxu1 %v7403_v13  ;;  %v8310_v19 = vpop.permute.xlu0 %8309  ;;  %v4518_v23 = vsel %vm4517_vm0, %v8296_v17, %v8297_v16  ;;  %v4632_v16 = vld [vmem:[%s10198_s7 + $0x48] sm:$0xff]  ;;  %v4634_v17 = vld [vmem:[%s10198_s7 + $0x58] sm:$0xff] }
0x1887   : > { %v8305_v24 = vpop.permute.xlu1 %8304  ;;  %7408 = vmatprep.subr.bf16.mxu1 %v9751_v21  ;;  %v8312_v26 = vunpack.i.h.bf16 %v8310_v19  ;;  %v8311_v31 = vunpack.i.l.bf16 %v8310_v19  ;;  %v7415_v33 = vpack.c.bf16 %v4519_v27, %v4518_v23 }
0x1888   : > { %v8307_v29 = vunpack.i.h.bf16 %v8305_v24  ;;  %v8306_v25 = vunpack.i.l.bf16 %v8305_v24  ;;  %v4636_v24 = vld [vmem:[%s10198_s7 + $0x68] sm:$0xff] }
0x1889   : > { %6996 = vmatmul.mubr.msk.f32.vlgmr.msra.gmra.mrb[40].mxu1 %vm2790_vm4, %v6149_v18  ;;  %v7463_v18 = vpack.c.bf16 %v4634_v17, %v4632_v16 }
0x188a   : > { %7410 = vmatpush3.bf16.msra.mxu1 %v9751_v21  ;;  %6998 = vmatprep.mubr.msk.f32.mxu1 %vm2790_vm4, %v6150_v22  ;;  %v4520_v34 = vsel %vm4517_vm0, %v8306_v25, %v8307_v29  ;;  %v4521_v21 = vsel %vm4517_vm0, %v8311_v31, %v8312_v26  ;;  %v4638_v22 = vld [vmem:[%s10198_s7 + $0x78] sm:$0xff]  ;;  %v4640_v26 = vld [vmem:[%s10198_s7 + $0x88] sm:$0xff]  ;;  %v4641_v25 = vld [vmem:[%s10198_s7 + $0x90] sm:$0xff] }
0x188b   : > { %7412 = vmatprep.subr.bf16.mxu1 %v9763_v28  ;;  %v7419_v35 = vpack.c.bf16 %v4521_v21, %v4520_v34  ;;  %v7467_v27 = vpack.c.bf16 %v4638_v22, %v4636_v24  ;;  %v4642_v31 = vld [vmem:[%s10198_s7 + $0x98] sm:$0xff]  ;;  %v4643_v34 = vld [vmem:[%s10198_s7 + $0xa0] sm:$0xff]  ;;  %v4645_v21 = vld [vmem:[%s10198_s7 + $0xb0] sm:$0xff] }
0x188c   : > { %v7471_v29 = vpack.c.bf16 %v4642_v31, %v4640_v26 }
0x188d   : > { %6999 = vmatmul.mubr.msk.f32.gmra.mrb[42].mxu1 %vm2790_vm4, %v6151_v32  ;;  %v4644_v32 = vld [vmem:[%s10198_s7 + $0xa8] sm:$0xff] }
0x188e   : > { %7414 = vmatpush3.bf16.msra.mxu1 %v9763_v28  ;;  %7017 = vmatprep.mubr.msk.f32.mxu1 %vm2790_vm4, %v6156_v30  ;;  %v6159_v28 = vld [vmem:[%s10196_s5 + $0xf8] sm:$0xff] }
0x188f   : > { %7416 = vmatprep.subr.bf16.mxu1 %v7415_v33 }
0x1892   : > { %7418 = vmatpush3.bf16.msra.mxu1 %v7415_v33 }
0x1893   : > { %7420 = vmatprep.subr.bf16.mxu1 %v7419_v35 }
0x1896   : > { %7422 = vmatpush3.bf16.msra.mxu1 %v7419_v35  ;;  %v4648_v35 = vld [vmem:[%s10198_s7 + $0xc8] sm:$0xff] }
0x1897   : > { %v4878_v49 = vpop.permute.xlu0 %4877 }
0x1898   : > { %v4873_v48 = vpop.permute.xlu1 %4872 }
0x1899   : > { %7018 = vmatmul.mubr.msk.f32.vlgmr.msra.gmra.mrb[44].mxu1 %vm2790_vm4, %v6157_v37  ;;  %v7477_v37 = vpack.c.bf16 %v4645_v21, %v4643_v34 }
0x189a   : > { %7020 = vmatprep.mubr.msk.f32.mxu1 %vm2790_vm4, %v6158_v38 }
0x189b   : > { %v4911_v55 = vpop.permute.xlu0 %4910 }
0x189c   : > { %v4906_v50 = vpop.permute.xlu1 %4905 }
0x189d   : > { %7021 = vmatmul.mubr.msk.f32.gmra.mrb[46].mxu1 %vm2790_vm4, %v6159_v28  ;;  %v4647_v28 = vld [vmem:[%s10198_s7 + $0xc0] sm:$0xff] }
0x189e   : > { %5097 = vmatprep.mubr.f32.mxu1 %v9746_v51  ;;  %v7481_v42 = vpack.c.bf16 %v4649_v20, %v4647_v28 }
0x18a0   : > { %v4883_v57 = vpop.permute.xlu1 %4882 }
0x195c   : > { %v9851_v60 = vpop.f32.mrb[40].mxu1 }
0x195d   : > { %v9853_v7 = vpop.f32.mrb[41].mxu1 }
0x1960   : > { %v9855_v8 = vpop.f32.mrb[42].mxu1 }
0x1961   : > { %v9857_v9 = vpop.f32.mrb[43].mxu1 }
0x196c   : > { %v7019_v13 = vpop.f32.mrb[44].mxu1 }
0x196d   : > { %v4604_v15 = vpop.f32.mrb[45].mxu1 }
0x196e   : > { %4752 = vmatmul.mubr.f32.vlgmr.msra.gmra.mrb[36].mxu0 %v4604_v15 }
0x196f   : > { %7458 = vmatpush1.bf16.msra.mxu0 %v7457_v12  ;;  %4757 = vmatprep.mubr.f32.mxu0 %v9746_v51 }
0x1970   : > { %7460 = vmatprep.subr.bf16.mxu0 %v7459_v14  ;;  %v7022_v19 = vpop.f32.mrb[46].mxu1 }
0x1971   : > { %v4614_v23 = vpop.f32.mrb[47].mxu1 }
0x1972   : > { %4758 = vmatmul.mubr.f32.gmra.mrb[38].mxu0 %v7019_v13  ;;  %v4916_v13 = vpop.permute.xlu1 %4915 }
0x1973   : > { %7462 = vmatpush1.bf16.msra.mxu0 %v9615_v4  ;;  %4763 = vmatprep.mubr.f32.mxu0 %v9746_v51  ;;  %v4639_v4 = vld [vmem:[%s10198_s7 + $0x80] sm:$0xff] }
0x1974   : > { %7464 = vmatprep.subr.bf16.mxu0 %v7463_v18  ;;  %v7473_v30 = vpack.c.bf16 %v4641_v25, %v4639_v4 }
0x1976   : > { %4764 = vmatmul.mubr.f32.gmra.mrb[40].mxu0 %v4614_v23 }
0x1977   : > { %7466 = vmatpush1.bf16.msra.mxu0 %v9725_v44  ;;  %4769 = vmatprep.mubr.f32.mxu0 %v9746_v51  ;;  %v4646_v44 = vld [vmem:[%s10198_s7 + $0xb8] sm:$0xff] }
0x1978   : > { %7468 = vmatprep.subr.bf16.mxu0 %v7467_v27  ;;  %v7475_v33 = vpack.c.bf16 %v4646_v44, %v4644_v32 }
0x197a   : > { %4770 = vmatmul.mubr.f32.gmra.mrb[42].mxu0 %v7022_v19 }
0x197b   : > { %7470 = vmatpush1.bf16.msra.mxu0 %v9737_v47  ;;  %4840 = vmatprep.mubr.f32.mxu0 %v9746_v51  ;;  %v4650_v47 = vld [vmem:[%s10198_s7 + $0xd8] sm:$0xff] }
0x197c   : > { %7472 = vmatprep.subr.bf16.mxu0 %v7471_v29  ;;  %v7479_v38 = vpack.c.bf16 %v4650_v47, %v4648_v35 }
0x197f   : > { %7474 = vmatpush1.bf16.msra.mxu0 %v7473_v30 }
0x1980   : > { %7476 = vmatprep.subr.bf16.mxu0 %v7475_v33 }
0x1983   : > { %7478 = vmatpush1.bf16.msra.mxu0 %v7477_v37 }
0x1984   : > { %7480 = vmatprep.subr.bf16.mxu0 %v7479_v38 }
0x1987   : > { %7482 = vmatpush1.bf16.msra.mxu0 %v7481_v42 }
0x1988   : > { %7484 = vmatprep.subr.bf16.mxu0 %v7483_v63  ;;  %v5419_v63 = vld [vmem:[#allocation2 + $0x18] sm:$0xff] }
0x198b   : > { %7486 = vmatpush1.bf16.msra.mxu0 %v7485_v0 }
0x198e   : > { %4841 = vmatmul.mubr.f32.vlgmr.msra.gmra.mrb[36].mxu0 %v9853_v7  ;;  %v4888_v7 = vpop.permute.xlu0 %4887 }
0x198f   : > { %4846 = vmatprep.mubr.f32.mxu0 %v9746_v51 }
0x1992   : > { %4847 = vmatmul.mubr.f32.gmra.mrb[38].mxu0 %v9851_v60  ;;  %v4921_v4 = vpop.permute.xlu0 %4920 }
0x1993   : > { %4852 = vmatprep.mubr.f32.mxu0 %v9746_v51 }
0x1996   : > { %4853 = vmatmul.mubr.f32.gmra.mrb[40].mxu0 %v9857_v9 }
0x1997   : > { %4858 = vmatprep.mubr.f32.mxu0 %v9746_v51 }
0x199a   : > { %4859 = vmatmul.mubr.f32.gmra.mrb[42].mxu0 %v9855_v8 }
0x1a61   : > { %v4842_v52 = vpop.f32.mrb[36].mxu0 }
0x1a62   : > { %v4890_v53 = vmul.f32 %v4873_v48, %v4842_v52  ;;  %v4844_v54 = vpop.f32.mrb[37].mxu0  ;;  %v5795_v52 = vld [vmem:[%s10201_s10] sm:$0xff] }
0x1a63   : > { %v4891_v59 = vmul.f32 %v4873_v48, %v4844_v54  ;;  %v5425_v48 = vld [vmem:[#allocation2 + $0x58] sm:$0xff]  ;;  %v8315_v54 = vpop.permute.xlu1 %8314 }
0x1a64   : > { %v4923_v56 = vadd.f32 %v4906_v50, %v4890_v53  ;;  %v6185_v53 = vld [vmem:[%s10201_s10 + $0x8] sm:$0xff] }
0x1a65   : > { %v4924_v58 = vadd.f32 %v4906_v50, %v4891_v59  ;;  %v4848_v61 = vpop.f32.mrb[38].mxu0  ;;  %v5428_v50 = vld [vmem:[#allocation2 + $0x78] sm:$0xff] }
0x1a66   : > { %vm4931_vm4 = vcmp.ge.f32.partialorder %v4923_v56, 0.0  ;;  %v4939_v62 = vmul.f32 0.2, %v4923_v56  ;;  %v4892_v1 = vmul.f32 %v4878_v49, %v4848_v61  ;;  %v4850_v2 = vpop.f32.mrb[39].mxu0 }
0x1a67   : > { %vm4932_vm6 = vcmp.ge.f32.partialorder %v4924_v58, 0.0  ;;  %v4940_v3 = vmul.f32 0.2, %v4924_v58  ;;  %v4893_v5 = vmul.f32 %v4878_v49, %v4850_v2  ;;  %v8325_v59 = vpop.permute.xlu1 %8324  ;;  %v8317_v2 = vunpack.i.h.bf16 %v8315_v54 }
0x1a68   : > { %v9957_v6 = vsel %vm4931_vm4, %v4923_v56, %v4939_v62  ;;  %v4925_v60 = vadd.f32 %v4911_v55, %v4892_v1 }
0x1a69   : > { %4955 = vst [vmem:[#allocation2 + $0x8] sm:$0xff] %v9957_v6  ;;  %v9960_v8 = vsel %vm4932_vm6, %v4924_v58, %v4940_v3  ;;  %v4926_v9 = vadd.f32 %v4911_v55, %v4893_v5  ;;  %v4854_v36 = vpop.f32.mrb[40].mxu0  ;;  %v8320_v55 = vpop.permute.xlu0 %8319  ;;  %v8316_v3 = vunpack.i.l.bf16 %v8315_v54 }
0x1a6a   : > { %vm4933_vm7 = vcmp.ge.f32.partialorder %v4925_v60, 0.0  ;;  %v4941_v39 = vmul.f32 0.2, %v4925_v60  ;;  %v4894_v10 = vmul.f32 %v4883_v57, %v4854_v36  ;;  %v4856_v11 = vpop.f32.mrb[41].mxu0  ;;  %v8333_v12 = vpack.i.bf16 %v9960_v8, %v9957_v6 }
0x1a6b   : > { %vm4934_vm8 = vcmp.ge.f32.partialorder %v4926_v9, 0.0  ;;  %v4942_v14 = vmul.f32 0.2, %v4926_v9  ;;  %v4895_v15 = vmul.f32 %v4883_v57, %v4856_v11  ;;  %v8398_v43 = vpack.i.bf16 %v5419_v63, %v9960_v8 }
0x1a6c   : > { %v9964_v16 = vsel %vm4933_vm7, %v4925_v60, %v4941_v39  ;;  %v4927_v17 = vadd.f32 %v4916_v13, %v4894_v10  ;;  %8334 = vrot.lane.b32.xlu1 %v8333_v12, %s10235_s26 }
0x1a6d   : > { %4957 = vst [vmem:[#allocation2 + $0x28] sm:$0xff] %v9964_v16  ;;  %v9968_v18 = vsel %vm4934_vm8, %v4926_v9, %v4942_v14  ;;  %v4928_v19 = vadd.f32 %v4916_v13, %v4895_v15  ;;  %v4860_v24 = vpop.f32.mrb[42].mxu0  ;;  %v9972_v22 = vpack.i.bf16 %v9964_v16, %v9957_v6  ;;  %v7513_v23 = vpack.c.bf16 %v9964_v16, %v9957_v6  ;;  %v10040_v56 = vpop.permute.xlu0 %8329 }
0x1a6e   : > { %vm4935_vm9 = vcmp.ge.f32.partialorder %v4927_v17, 0.0  ;;  %v4943_v27 = vmul.f32 0.2, %v4927_v17  ;;  %v4896_v26 = vmul.f32 %v4888_v7, %v4860_v24  ;;  %v4862_v31 = vpop.f32.mrb[43].mxu0  ;;  %v8348_v29 = vpack.i.bf16 %v9968_v18, %v9964_v16 }
0x1a6f   : > { %vm4936_vm10 = vcmp.ge.f32.partialorder %v4928_v19, 0.0  ;;  %v4944_v25 = vmul.f32 0.2, %v4928_v19  ;;  %v4897_v32 = vmul.f32 %v4888_v7, %v4862_v31  ;;  %v7511_v33 = vpack.c.bf16 %v9968_v18, %v9960_v8 }
0x1a70   : > { %v9978_v44 = vsel %vm4935_vm9, %v4927_v17, %v4943_v27  ;;  %v4929_v30 = vadd.f32 %v4921_v4, %v4896_v26  ;;  %8339 = vrot.lane.b32.xlu1 %v8333_v12, %s8611_s15  ;;  %8349 = vrot.lane.b32.xlu0 %v8348_v29, %s10235_s26  ;;  %v8403_v0 = vpack.i.bf16 %v5422_v45, %v9968_v18  ;;  %v8322_v17 = vunpack.i.h.bf16 %v8320_v55 }
0x1a71   : > { %4959 = vst [vmem:[#allocation2 + $0x48] sm:$0xff] %v9978_v44  ;;  %v9985_v34 = vsel %vm4936_vm10, %v4928_v19, %v4944_v25  ;;  %v4930_v21 = vadd.f32 %v4921_v4, %v4897_v32  ;;  %v8321_v19 = vunpack.i.l.bf16 %v8320_v55  ;;  %v8327_v32 = vunpack.i.h.bf16 %v8325_v59 }
0x1a72   : > { %vm4937_vm11 = vcmp.ge.f32.partialorder %v4929_v30, 0.0  ;;  %v4945_v35 = vmul.f32 0.2, %v4929_v30  ;;  %v8358_v47 = vpack.i.bf16 %v9985_v34, %v9978_v44  ;;  %v8418_v49 = vpack.i.bf16 %v5425_v48, %v9985_v34 }
0x1a73   : > { %vm4938_vm12 = vcmp.ge.f32.partialorder %v4930_v21, 0.0  ;;  %v4946_v37 = vmul.f32 0.2, %v4930_v21  ;;  %v8326_v45 = vunpack.i.l.bf16 %v8325_v59  ;;  %v6172_v59 = vld [vmem:[%s10200_s9 + $0x8] sm:$0xff] }
0x1a74   : > { %v9989_v38 = vsel %vm4937_vm11, %v4929_v30, %v4945_v35  ;;  %8344 = vrot.lane.b32.xlu1 %v8333_v12, %s10231_s12  ;;  %8354 = vrot.lane.b32.xlu0 %v8348_v29, %s8611_s15 }
0x1a75   : > { %4961 = vst [vmem:[#allocation2 + $0x68] sm:$0xff] %v9989_v38  ;;  %v9994_v28 = vsel %vm4938_vm12, %v4930_v21, %v4946_v37  ;;  %v8423_v20 = vpack.i.bf16 %v9989_v38, %v9978_v44  ;;  %v7517_v40 = vpack.c.bf16 %v9989_v38, %v9978_v44 }
0x1a76   : > { %v8373_v41 = vpack.i.bf16 %v9994_v28, %v9989_v38  ;;  %v7515_v42 = vpack.c.bf16 %v9994_v28, %v9985_v34 }
0x1a78   : > { %8359 = vrot.lane.b32.xlu0 %v8358_v47, %s10235_s26  ;;  %8374 = vrot.lane.b32.xlu1 %v8373_v41, %s10235_s26 }
0x1a7c   : > { %8364 = vrot.lane.b32.xlu0 %v8348_v29, %s10231_s12  ;;  %8379 = vrot.lane.b32.xlu1 %v9947_v46, %s10231_s12 }
0x1a80   : > { %8369 = vrot.lane.b32.xlu0 %v8358_v47, %s8611_s15  ;;  %8394 = vrot.lane.b32.xlu1 %v8373_v41, %s8611_s15 }
0x1a84   : > { %8384 = vrot.lane.b32.xlu0 %v8358_v47, %s10231_s12  ;;  %8399 = vrot.lane.b32.xlu1 %v8398_v43, %s10234_s16 }
0x1a88   : > { %8389 = vrot.lane.b32.xlu0 %v9947_v46, %s10231_s12  ;;  %8409 = vrot.lane.b32.xlu1 %v8373_v41, %s10231_s12  ;;  %v8453_v46 = vpack.i.bf16 %v5428_v50, %v9994_v28  ;;  %s8612_s12 = smov 125  }
0x1a8c   : > { %8404 = vrot.lane.b32.xlu0 %v8403_v0, %s10234_s16  ;;  %8414 = vrot.lane.b32.xlu1 %v9972_v22, %s10234_s16 }
0x1a90   : > { %8419 = vrot.lane.b32.xlu0 %v8418_v49, %s10234_s16  ;;  %8429 = vrot.lane.b32.xlu1 %v8398_v43, %s10230_s29 }
0x1a94   : > { %8424 = vrot.lane.b32.xlu0 %v8423_v20, %s10234_s16  ;;  %8439 = vrot.lane.b32.xlu1 %v9972_v22, %s10230_s29 }
0x1a98   : > { %8434 = vrot.lane.b32.xlu0 %v8403_v0, %s10230_s29  ;;  %8454 = vrot.lane.b32.xlu1 %v8453_v46, %s10234_s16  ;;  %s8533_s16 = sshll.u32 %s8614_s21, 4  ;;  %s8534_s16 = int_to_ptr.vmem [resolvable:$false] %s8533_s16 }
0x1a99   : > { %s8535_s0 = scalar_lea.vmem %s8534_s16, 64  ;;  %p8536_p2 = scmp.lt.s32.totalorder %s10151_s13, %s8534_s16 }
0x1a9a   : > { %p8537_p3 = scmp.lt.s32.totalorder %s8535_s0, %s8529_s24 }
0x1a9c   : > { %8444 = vrot.lane.b32.xlu0 %v8418_v49, %s10230_s29  ;;  %8459 = vrot.lane.b32.xlu1 %v8398_v43, %s8612_s12  ;;  %p8538_p4 = por %p8537_p3, %p8536_p2 }
0x1a9e   : > { %p8539_p7 = pnand %p8538_p4, %p8532_p12 }
0x1aa0   : > { %8449 = vrot.lane.b32.xlu0 %v8423_v20, %s10230_s29  ;;  %8469 = vrot.lane.b32.xlu1 %v8453_v46, %s10230_s29 }
0x1aa4   : > { %8464 = vrot.lane.b32.xlu0 %v8403_v0, %s8612_s12  ;;  %8474 = vrot.lane.b32.xlu1 %v9972_v22, %s8612_s12 }
0x1aa8   : > { %8479 = vrot.lane.b32.xlu0 %v8418_v49, %s8612_s12  ;;  %8484 = vrot.lane.b32.xlu1 %v8453_v46, %s8612_s12 }
0x1aac   : > { %8489 = vrot.lane.b32.xlu0 %v8423_v20, %s8612_s12  ;;  %5798 = vperm.xlu1 %7702, %v5795_v52   ;;  %v8332_v52 = vunpack.i.h.bf16 %v10040_v56  ;;  %s10149_s12 = scalar_lea.hbm %s10202_s11, %s6192_s25 }
0x1ab0   : > { %5807 = vperm.xlu0 %7701, %v6185_v53   ;;  %v8331_v53 = vunpack.i.l.bf16 %v10040_v56 }
0x1ade   : > { %v8335_v57 = vpop.permute.xlu1 %8334 }
0x1adf   : > { %v8337_v58 = vunpack.i.h.bf16 %v8335_v57  ;;  %v8336_v61 = vunpack.i.l.bf16 %v8335_v57 }
0x1ae1   : > { %v5014_v7 = vsel %vm1275_vm15, %v8316_v3, %v8336_v61  ;;  %v5015_v36 = vsel %vm1275_vm15, %v8336_v61, %v8337_v58 }
0x1ae2   : > { %v8340_v62 = vpop.permute.xlu1 %8339  ;;  %v8350_v1 = vpop.permute.xlu0 %8349 }
0x1ae3   : > { %v8352_v5 = vunpack.i.h.bf16 %v8350_v1  ;;  %v8351_v60 = vunpack.i.l.bf16 %v8350_v1  ;;  %v8342_v24 = vunpack.i.h.bf16 %v8340_v62  ;;  %v8341_v22 = vunpack.i.l.bf16 %v8340_v62 }
0x1ae5   : > { %v5016_v9 = vsel %vm1275_vm15, %v8317_v2, %v8351_v60  ;;  %v5017_v39 = vsel %vm1275_vm15, %v8351_v60, %v8352_v5  ;;  %v5130_v48 = vsel %vm5128_vm2, %v8341_v22, %v8342_v24  ;;  %v5129_v54 = vsel %vm5128_vm2, %v8326_v45, %v8341_v22 }
0x1ae6   : > { %v7489_v10 = vpack.c.bf16 %v5016_v9, %v5014_v7  ;;  %v10046_v11 = vpop.permute.xlu1 %8344  ;;  %v8355_v12 = vpop.permute.xlu0 %8354  ;;  %v7487_v13 = vpack.c.bf16 %v5017_v39, %v5015_v36 }
0x1ae7   : > { %v8357_v14 = vunpack.i.h.bf16 %v8355_v12  ;;  %v8356_v15 = vunpack.i.l.bf16 %v8355_v12  ;;  %v8347_v55 = vunpack.i.h.bf16 %v10046_v11  ;;  %v8346_v57 = vunpack.i.l.bf16 %v10046_v11 }
0x1ae8   : > { %7488 = vmatprep.subr.bf16.mxu1 %v7487_v13 }
0x1ae9   : > { %7490 = vmatpush1.bf16.msra.mxu1 %v7489_v10  ;;  %v5132_v30 = vsel %vm5128_vm2, %v8356_v15, %v8357_v14  ;;  %v5131_v0 = vsel %vm5128_vm2, %v8327_v32, %v8356_v15 }
0x1aea   : > { %v8360_v27 = vpop.permute.xlu0 %8359  ;;  %v8375_v26 = vpop.permute.xlu1 %8374  ;;  %v7495_v46 = vpack.c.bf16 %v5132_v30, %v5130_v48  ;;  %v7497_v58 = vpack.c.bf16 %v5131_v0, %v5129_v54 }
0x1aeb   : > { %v8362_v31 = vunpack.i.h.bf16 %v8360_v27  ;;  %v8361_v29 = vunpack.i.l.bf16 %v8360_v27  ;;  %v8377_v4 = vunpack.i.h.bf16 %v8375_v26  ;;  %v8376_v25 = vunpack.i.l.bf16 %v8375_v26  ;;  %v4963_v26 = vld [vmem:[%s10200_s9] sm:$0xff] }
0x1aed   : > { %v5018_v21 = vsel %vm1275_vm15, %v8321_v19, %v8361_v29  ;;  %v5020_v35 = vsel %vm1275_vm15, %v8322_v17, %v8376_v25  ;;  %v5019_v47 = vsel %vm1275_vm15, %v8361_v29, %v8362_v31  ;;  %v5021_v37 = vsel %vm1275_vm15, %v8376_v25, %v8377_v4 }
0x1aee   : > { %v7493_v20 = vpack.c.bf16 %v5020_v35, %v5018_v21  ;;  %v8365_v41 = vpop.permute.xlu0 %8364  ;;  %v8380_v63 = vpop.permute.xlu1 %8379  ;;  %v7491_v43 = vpack.c.bf16 %v5021_v37, %v5019_v47  ;;  %v5246_v19 = vsel %vm503_vm1, %v8346_v57, %v8347_v55  ;;  %vm5702_vm15 = vcmask 1022976  }
0x1aef   : > { %v8367_v49 = vunpack.i.h.bf16 %v8365_v41  ;;  %v8366_v50 = vunpack.i.l.bf16 %v8365_v41  ;;  %v8382_v61 = vunpack.i.h.bf16 %v8380_v63  ;;  %v8381_v62 = vunpack.i.l.bf16 %v8380_v63 }
0x1af0   : > { %7492 = vmatprep.subr.bf16.mxu1 %v7491_v43 }
0x1af1   : > { %7494 = vmatpush1.bf16.msra.mxu1 %v7493_v20  ;;  %v5248_v7 = vsel %vm503_vm1, %v8366_v50, %v8367_v49  ;;  %v5247_v15 = vsel %vm503_vm1, %v8382_v61, %v8366_v50  ;;  %v5245_v17 = vsel %vm503_vm1, %v8381_v62, %v8346_v57  ;;  %v6175_v49 = vld [vmem:[%s10200_s9 + $0x10] sm:$0xff]  ;;  %v6177_v62 = vld [vmem:[%s10200_s9 + $0x18] sm:$0xff] }
0x1af2   : > { %v8370_v1 = vpop.permute.xlu0 %8369  ;;  %v8395_v2 = vpop.permute.xlu1 %8394  ;;  %7496 = vmatprep.subr.bf16.mxu1 %v7495_v46  ;;  %v7503_v27 = vpack.c.bf16 %v5248_v7, %v5246_v19  ;;  %v7505_v31 = vpack.c.bf16 %v5247_v15, %v5245_v17 }
0x1af3   : > { %v8372_v3 = vunpack.i.h.bf16 %v8370_v1  ;;  %v8371_v5 = vunpack.i.l.bf16 %v8370_v1  ;;  %v8397_v56 = vunpack.i.h.bf16 %v8395_v2  ;;  %v8396_v60 = vunpack.i.l.bf16 %v8395_v2 }
0x1af4   : > { %6173 = vmatmul.mubr.msk.f32.vlgmr.msra.gmra.mrb[48].mxu1 %vm3269_vm5, %v6172_v59  ;;  %v10093_v59 = vld [vmem:[#allocation2] sm:$0xff] }
0x1af5   : > { %v5133_v9 = vsel %vm5128_vm2, %v8331_v53, %v8371_v5  ;;  %v5135_v36 = vsel %vm5128_vm2, %v8332_v52, %v8396_v60  ;;  %7498 = vmatpush1.bf16.msra.mxu1 %v7497_v58  ;;  %v5134_v39 = vsel %vm5128_vm2, %v8371_v5, %v8372_v3  ;;  %v5136_v10 = vsel %vm5128_vm2, %v8396_v60, %v8397_v56 }
0x1af6   : > { %v7501_v11 = vpack.c.bf16 %v5135_v36, %v5133_v9  ;;  %v8385_v12 = vpop.permute.xlu0 %8384  ;;  %v8400_v13 = vpop.permute.xlu1 %8399  ;;  %v7499_v14 = vpack.c.bf16 %v5136_v10, %v5134_v39  ;;  %5212 = vmatprep.mubr.f32.mxu1 %v9746_v51 }
0x1af7   : > { %v8387_v24 = vunpack.i.h.bf16 %v8385_v12  ;;  %v8386_v22 = vunpack.i.l.bf16 %v8385_v12  ;;  %v8402_v52 = vunpack.i.h.bf16 %v8400_v13 }
0x1af8   : > { %7500 = vmatprep.subr.bf16.mxu1 %v7499_v14 }
0x1af9   : > { %7502 = vmatpush1.bf16.msra.mxu1 %v7501_v11  ;;  %v5250_v35 = vsel %vm503_vm1, %v8386_v22, %v8387_v24 }
0x1afa   : > { %v8390_v29 = vpop.permute.xlu0 %8389  ;;  %v8410_v4 = vpop.permute.xlu1 %8409  ;;  %7504 = vmatprep.subr.bf16.mxu1 %v7503_v27 }
0x1afb   : > { %v8392_v25 = vunpack.i.h.bf16 %v8390_v29  ;;  %v8391_v32 = vunpack.i.l.bf16 %v8390_v29  ;;  %v8412_v30 = vunpack.i.h.bf16 %v8410_v4  ;;  %v8411_v21 = vunpack.i.l.bf16 %v8410_v4 }
0x1afc   : > { %6174 = vmatmul.mubr.msk.f32.vlgmr.msra.gmra.mrb[48].mxu1 %vm3269_vm5, %v4963_v26  ;;  %v6179_v26 = vld [vmem:[%s10200_s9 + $0x20] sm:$0xff] }
0x1afd   : > { %v5249_v47 = vsel %vm503_vm1, %v8391_v32, %v8386_v22  ;;  %v5251_v37 = vsel %vm503_vm1, %v8392_v25, %v8411_v21  ;;  %7506 = vmatpush1.bf16.msra.mxu1 %v7505_v31  ;;  %v5252_v20 = vsel %vm503_vm1, %v8411_v21, %v8412_v30  ;;  %5328 = vmatprep.mubr.f32.mxu1 %v9746_v51  ;;  %v8401_v51 = vunpack.i.l.bf16 %v8400_v13 }
0x1afe   : > { %v7509_v41 = vpack.c.bf16 %v5251_v37, %v5249_v47  ;;  %v8405_v63 = vpop.permute.xlu0 %8404  ;;  %v8415_v43 = vpop.permute.xlu1 %8414  ;;  %v7507_v45 = vpack.c.bf16 %v5252_v20, %v5250_v35  ;;  %vm5583_vm1 = vcmask 1031168  }
0x1aff   : > { %v8407_v0 = vunpack.i.h.bf16 %v8405_v63  ;;  %v8406_v48 = vunpack.i.l.bf16 %v8405_v63  ;;  %v8417_v53 = vunpack.i.h.bf16 %v8415_v43  ;;  %v8416_v54 = vunpack.i.l.bf16 %v8415_v43 }
0x1b00   : > { %7508 = vmatprep.subr.bf16.mxu1 %v7507_v45 }
0x1b01   : > { %7510 = vmatpush1.bf16.msra.mxu1 %v7509_v41  ;;  %v5468_v55 = vsel %vm4517_vm0, %v8406_v48, %v8407_v0  ;;  %v5467_v8 = vsel %vm4517_vm0, %v8417_v53, %v8406_v48  ;;  %v5465_v18 = vsel %vm4517_vm0, %v8416_v54, %v8401_v51 }
0x1b02   : > { %v8420_v50 = vpop.permute.xlu0 %8419  ;;  %v8430_v46 = vpop.permute.xlu1 %8429  ;;  %7512 = vmatprep.subr.bf16.mxu1 %v7511_v33  ;;  %v5466_v33 = vsel %vm4517_vm0, %v8401_v51, %v8402_v52  ;;  %v7521_v34 = vpack.c.bf16 %v5467_v8, %v5465_v18 }
0x1b03   : > { %v8422_v6 = vunpack.i.h.bf16 %v8420_v50  ;;  %v8421_v16 = vunpack.i.l.bf16 %v8420_v50  ;;  %v8432_v28 = vunpack.i.h.bf16 %v8430_v46 }
0x1b04   : > { %6176 = vmatmul.mubr.msk.f32.vlgmr.msra.gmra.mrb[48].mxu1 %vm3269_vm5, %v6175_v49 }
0x1b05   : > { %7514 = vmatpush1.bf16.msra.mxu1 %v7513_v23  ;;  %5406 = vmatprep.mubr.f32.mxu1 %v10093_v59  ;;  %v7519_v23 = vpack.c.bf16 %v5468_v55, %v5466_v33  ;;  %v5470_v44 = vsel %vm4517_vm0, %v8421_v16, %v8422_v6 }
0x1b06   : > { %v8425_v57 = vpop.permute.xlu0 %8424  ;;  %v8440_v58 = vpop.permute.xlu1 %8439  ;;  %7516 = vmatprep.subr.bf16.mxu1 %v7515_v42  ;;  %v8431_v42 = vunpack.i.l.bf16 %v8430_v46 }
0x1b07   : > { %v8426_v61 = vunpack.i.l.bf16 %v8425_v57  ;;  %v8427_v1 = vunpack.i.h.bf16 %v8425_v57  ;;  %v8442_v9 = vunpack.i.h.bf16 %v8440_v58  ;;  %v8441_v36 = vunpack.i.l.bf16 %v8440_v58  ;;  %v6181_v57 = vld [vmem:[%s10200_s9 + $0x28] sm:$0xff] }
0x1b08   : > { %v5585_v17 = vsel %vm5583_vm1, %v8431_v42, %v8432_v28 }
0x1b09   : > { %7518 = vmatpush1.bf16.msra.mxu1 %v7517_v40  ;;  %v5469_v38 = vsel %vm4517_vm0, %v8426_v61, %v8421_v16  ;;  %v5584_v27 = vsel %vm5583_vm1, %v8441_v36, %v8431_v42 }
0x1b0a   : > { %v8435_v2 = vpop.permute.xlu0 %8434  ;;  %v8455_v3 = vpop.permute.xlu1 %8454  ;;  %7520 = vmatprep.subr.bf16.mxu1 %v7519_v23 }
0x1b0b   : > { %v8437_v5 = vunpack.i.h.bf16 %v8435_v2  ;;  %v8436_v56 = vunpack.i.l.bf16 %v8435_v2  ;;  %v8457_v60 = vunpack.i.h.bf16 %v8455_v3  ;;  %v8456_v7 = vunpack.i.l.bf16 %v8455_v3 }
0x1b0c   : > { %6178 = vmatmul.mubr.msk.f32.vlgmr.msra.gmra.mrb[48].mxu1 %vm3269_vm5, %v6177_v62 }
0x1b0d   : > { %v5471_v40 = vsel %vm4517_vm0, %v8427_v1, %v8456_v7  ;;  %7522 = vmatpush1.bf16.msra.mxu1 %v7521_v34  ;;  %v5472_v39 = vsel %vm4517_vm0, %v8456_v7, %v8457_v60  ;;  %v5587_v10 = vsel %vm5583_vm1, %v8436_v56, %v8437_v5  ;;  %5548 = vmatprep.mubr.f32.mxu1 %v10093_v59  ;;  %v6183_v60 = vld [vmem:[%s10200_s9 + $0x30] sm:$0xff] }
0x1b0e   : > { %v7525_v11 = vpack.c.bf16 %v5471_v40, %v5469_v38  ;;  %v8445_v12 = vpop.permute.xlu0 %8444  ;;  %v8460_v13 = vpop.permute.xlu1 %8459  ;;  %v7523_v14 = vpack.c.bf16 %v5472_v39, %v5470_v44  ;;  %v5586_v15 = vsel %vm5583_vm1, %v8442_v9, %v8436_v56  ;;  %v7527_v22 = vpack.c.bf16 %v5587_v10, %v5585_v17 }
0x1b0f   : > { %v8447_v19 = vunpack.i.h.bf16 %v8445_v12  ;;  %v8446_v24 = vunpack.i.l.bf16 %v8445_v12  ;;  %v7529_v31 = vpack.c.bf16 %v5586_v15, %v5584_v27  ;;  %v8462_v35 = vunpack.i.h.bf16 %v8460_v13 }
0x1b10   : > { %7524 = vmatprep.subr.bf16.mxu1 %v7523_v14  ;;  %v8461_v37 = vunpack.i.l.bf16 %v8460_v13  ;;  %v8613_v10 = vmov 1966171168   ;;  %v5820_v12 = vlaneseq }
0x1b11   : > { %7526 = vmatpush1.bf16.msra.mxu1 %v7525_v11  ;;  %v5589_v47 = vsel %vm5583_vm1, %v8446_v24, %v8447_v19  ;;  %v5818_v11 = vunpack.c.l.s4 %v8613_v10 }
0x1b12   : > { %v8450_v29 = vpop.permute.xlu0 %8449  ;;  %v8470_v4 = vpop.permute.xlu1 %8469  ;;  %7528 = vmatprep.subr.bf16.mxu1 %v7527_v22  ;;  %v5704_v54 = vsel %vm5702_vm15, %v8461_v37, %v8462_v35  ;;  %v5821_v14 = vshrl.u32 %v5820_v12, 7 }
0x1b13   : > { %v8452_v25 = vunpack.i.h.bf16 %v8450_v29  ;;  %v8451_v32 = vunpack.i.l.bf16 %v8450_v29  ;;  %v8472_v30 = vunpack.i.h.bf16 %v8470_v4  ;;  %v8471_v21 = vunpack.i.l.bf16 %v8470_v4 }
0x1b14   : > { %6180 = vmatmul.mubr.msk.f32.vlgmr.msra.gmra.mrb[48].mxu1 %vm3269_vm5, %v6179_v26  ;;  %v5819_v13 = vunpack.c.0.s8 %v5818_v11 }
0x1b15   : > { %v5588_v20 = vsel %vm5583_vm1, %v8451_v32, %v8446_v24  ;;  %v5590_v41 = vsel %vm5583_vm1, %v8452_v25, %v8471_v21  ;;  %7530 = vmatpush1.bf16.msra.mxu1 %v7529_v31  ;;  %v5591_v63 = vsel %vm5583_vm1, %v8471_v21, %v8472_v30  ;;  %5667 = vmatprep.mubr.f32.mxu1 %v10093_v59 }
0x1b16   : > { %v7533_v43 = vpack.c.bf16 %v5590_v41, %v5588_v20  ;;  %v8465_v45 = vpop.permute.xlu0 %8464  ;;  %v8475_v0 = vpop.permute.xlu1 %8474  ;;  %v7531_v48 = vpack.c.bf16 %v5591_v63, %v5589_v47  ;;  %v5822_v17 = vsub.s32 %v5819_v13, %v5821_v14 }
0x1b17   : > { %v8467_v49 = vunpack.i.h.bf16 %v8465_v45  ;;  %v8466_v50 = vunpack.i.l.bf16 %v8465_v45  ;;  %v8477_v46 = vunpack.i.h.bf16 %v8475_v0  ;;  %v8476_v52 = vunpack.i.l.bf16 %v8475_v0 }
0x1b18   : > { %7532 = vmatprep.subr.bf16.mxu1 %v7531_v48 }
0x1b19   : > { %v5705_v51 = vsel %vm5702_vm15, %v8477_v46, %v8466_v50  ;;  %v5703_v53 = vsel %vm5702_vm15, %v8476_v52, %v8461_v37  ;;  %7534 = vmatpush1.bf16.msra.mxu1 %v7533_v43  ;;  %v5706_v55 = vsel %vm5702_vm15, %v8466_v50, %v8467_v49 }
0x1b1a   : > { %v7537_v58 = vpack.c.bf16 %v5705_v51, %v5703_v53  ;;  %v8480_v8 = vpop.permute.xlu0 %8479  ;;  %v8485_v18 = vpop.permute.xlu1 %8484  ;;  %v7535_v33 = vpack.c.bf16 %v5706_v55, %v5704_v54 }
0x1b1b   : > { %v8482_v6 = vunpack.i.h.bf16 %v8480_v8  ;;  %v8481_v16 = vunpack.i.l.bf16 %v8480_v8  ;;  %v8487_v23 = vunpack.i.h.bf16 %v8485_v18  ;;  %v8486_v61 = vunpack.i.l.bf16 %v8485_v18 }
0x1b1c   : > { %7536 = vmatprep.subr.bf16.mxu1 %v7535_v33  ;;  %6182 = vmatmul.mubr.msk.f32.vlgmr.msra.gmra.mrb[48].mxu1 %vm3269_vm5, %v6181_v57 }
0x1b1d   : > { %7538 = vmatpush1.bf16.msra.mxu1 %v7537_v58  ;;  %v5708_v62 = vsel %vm5702_vm15, %v8481_v16, %v8482_v6  ;;  %v5710_v34 = vsel %vm5702_vm15, %v8486_v61, %v8487_v23  ;;  %5786 = vmatprep.mubr.f32.mxu1 %v10093_v59 }
0x1b1e   : > { %v8490_v28 = vpop.permute.xlu0 %8489  ;;  %v7539_v42 = vpack.c.bf16 %v5710_v34, %v5708_v62 }
0x1b1f   : > { %v8492_v1 = vunpack.i.h.bf16 %v8490_v28  ;;  %v8491_v2 = vunpack.i.l.bf16 %v8490_v28 }
0x1b20   : > { %7540 = vmatprep.subr.bf16.mxu1 %v7539_v42 }
0x1b21   : > { %v5707_v3 = vsel %vm5702_vm15, %v8491_v2, %v8481_v16  ;;  %v5709_v5 = vsel %vm5702_vm15, %v8492_v1, %v8486_v61 }
0x1b22   : > { %v7541_v56 = vpack.c.bf16 %v5709_v5, %v5707_v3 }
0x1b24   : > { %7542 = vmatpush1.bf16.msra.mxu1 %v7541_v56 }
0x1b27   : > { %6184 = vmatmul.mubr.msk.f32.vlgmr.msra.gmra.mrb[48].mxu1 %vm3269_vm5, %v6183_v60  ;;  %vm5834_vm5 = vcmp.lt.s32.totalorder %v5820_v12, 256 }
0x1b2b   : > { %v5799_v7 = vpop.permute.xlu1 %5798 }
0x1b2f   : > { %v5808_v44 = vpop.permute.xlu0 %5807 }
0x1bfa   : > { %v5788_v59 = vpop.f32.mrb[48].mxu1 }
0x1bfb   : > { %v5801_v9 = vmul.f32 %v5799_v7, %v5788_v59  ;;  %v5790_v36 = vpop.f32.mrb[49].mxu1 }
0x1bfc   : > { %v5802_v38 = vmul.f32 %v5799_v7, %v5790_v36 }
0x1bfd   : > { %v5810_v40 = vadd.f32 %v5808_v44, %v5801_v9 }
0x1bfe   : > { %v5811_v39 = vadd.f32 %v5808_v44, %v5802_v38 }
0x1bff   : > { %8493 = vtanh.f32 %v5810_v40 }
0x1c00   : > { %8495 = vtanh.f32 %v5811_v39 }
0x1c09   : > { %v8494_v15 = vpop.eup %8493 }
0x1c0a   : > { %v8496_v19 = vpop.eup %8495 }
0x1c0b   : > { %v5816_v24 = vcombine.low %v8494_v15, %v8496_v19 }
0x1c0d   : > { %v5823_v22 = vrot.slane %v5816_v24, %v5822_v17 }
0x1c0f   : > { %v5830_v27 = vrot.slane %v5823_v22, %v5822_v17 }
0x1c11   : > { %5836 = vst.msk [vmem:[%s394_s14] sm:$0x3] %vm5834_vm5, %v5830_v27 }
0x1c12   : > { %8542 = shalt.err (!%p8539_p7)
}
0x1c13   : > { %s8543_s29 = scalar_lea.hbm %s10149_s12, 32  ;;  %s8547_s25 = scalar_lea.hbm %s10202_s11, 64 }
0x1c14   : > { %p8544_p8 = scmp.ne.s32.totalorder %s10149_s12, %s8543_s29  ;;  %p8548_p1 = scmp.lt.u32.totalorder %s10149_s12, %s10202_s11 }
0x1c15   : > { %p8549_p0 = scmp.lt.u32.totalorder %s8547_s25, %s8543_s29  ;;  %p8551_p6 = scmp.lt.u32.totalorder %s8543_s29, %s10149_s12 }
0x1c16   : > { %p8545_p11 = pnand %p8544_p8, %p10236_p9 }
0x1c17   : > { %p8550_p5 = por %p8549_p0, %p8548_p1 }
0x1c18   : > { %p8546_p13 = pneg %p8545_p11 }
0x1c19   : > { %p8552_p10 = por %p8551_p6, %p8550_p5 }
0x1c1b   : > { %p8553_p12 = pnand %p8552_p10, %p8546_p13 }
0x1c1d   : > { %8556 = shalt.err (!%p8553_p12)
}
0x1c1e   : > { %7579 = dma.vmem_to_hbm [thread:$0]  (%p10236_p9), %s10151_s13, 32, %s10149_s12, %s5838_s22  }
0x1c1f PF: > { %p7591_p2 = scmp.ge.s32.totalorder %s8595_s20, 2  ;;  %s5864_s15 = sand.u32 1, %s8583_s17  }
0x1c20   : > { %p10237_p3 = scmp.ne.s32.totalorder %s10222_s28, 0  ;;  %s5865_s24 = scalar_lea.sflag [#allocation5], %s5864_s15 }
0x1c22   : > { %p7586_p4 = pnand %p7591_p2, %p10237_p3 }
0x1c24   : > { %8578 = dma.done.wait (!%p7586_p4), %s5865_s24, 32  }
0x1c25   : > { %8580 = vsyncadd (!%p7586_p4), %s5865_s24, 4294967264  ;;  %s10238_s21 = sld [smem:[#allocation9_spill]]  ;;  %p22_p7 = scmp.ge.s32.totalorder %s8700_s23, 4  }
0x1c26   : > { %s10239_s17 = smov %s8587_s18  ;;  %s10240_s18 = smov %s8591_s19 }
0x1c27   : > { %s10242_s20 = smov %s8700_s23  ;;  %24 = sbr.rel (!%p22_p7) target bundleno = 7 (0x7), region = 148 }
0x1c2b   : > { %s10241_s19 = smov %s10238_s21 }
0x1c2e   :  { %5870 = vsyncpa [#allocation4], 1 }
0x1c2f   :  { %5872 = vsyncpa [#allocation4 + $0x1], 1 }
0x1c30   :  { %5873 = vsyncpa [#allocation5], 1 }
0x1c31   :  { %5875 = vsyncpa [#allocation5 + $0x1], 1 }

</bundles_post_ra>
